<compile_context>
chip_gen: v7x
topology: tpu7x:2x2x1
jax: 0.10.0
libtpu: 0.0.40
codegen_flags: <defaults>
</compile_context>

<pallas_src>
import functools

import numpy as np

import jax
import jax.numpy as jnp
from jax.experimental import pallas as pl
from jax.experimental.pallas import tpu as pltpu

EPS = 1e-5
_PREC = jax.lax.Precision.HIGHEST  # 1e-4 tolerance does not allow bf16-class passes


def _full(shape):
    """Whole-array block for a grid-less pallas_call."""
    return pl.BlockSpec(shape, lambda: (0,) * len(shape))


# ----------------------- host-side layout plumbing (done once) -----------------------
# The kernel works in a lane-dense 2-D view of NHWC tensors: rows = (n, h), lanes = (w, c).


def _dense_conv3x3_weight(w_hwio, width):
    """(3,3,Cin,Cout) -> (3, width*Cin, width*Cout) with
    B[dy, (x, ci), (w, c)] = w[dy, x - w + 1, ci, c] for 0 <= x - w + 1 < 3, else 0,
    so the 'same'-padded conv along W becomes a plain matmul in the (w, c) lane layout."""
    w = np.asarray(w_hwio, dtype=np.float32)
    kh, kw, cin, cout = w.shape
    out = np.zeros((kh, width * cin, width * cout), np.float32)
    for dy in range(kh):
        for wo in range(width):
            for dx in range(kw):
                xi = wo + dx - 1
                if 0 <= xi < width:
                    out[dy, xi * cin:(xi + 1) * cin, wo * cout:(wo + 1) * cout] = w[dy, dx]
    return jnp.asarray(out)


def _dense_conv1x1_weight(w_io, width):
    """(Cin,Cout) -> block-diagonal (width*Cin, width*Cout) for the lane-dense layout."""
    w = np.asarray(w_io, dtype=np.float32)
    cin, cout = w.shape
    out = np.zeros((width * cin, width * cout), np.float32)
    for wo in range(width):
        out[wo * cin:(wo + 1) * cin, wo * cout:(wo + 1) * cout] = w
    return jnp.asarray(out)


def _channel_pool(width, c):
    """One-hot (width*c, c) matrix G (and its transpose): y @ G pools lane-groups back to
    per-channel sums; s @ G.T broadcasts per-channel values back to the lane layout."""
    g = np.zeros((width * c, c), np.float32)
    for lane in range(width * c):
        g[lane, lane % c] = 1.0
    return jnp.asarray(g), jnp.asarray(g.T)


# ----------------------------------- kernel helpers ----------------------------------


def _conv3x3_dense(src2d, pad_ref, wd_ref):
    """3x3 'same' conv in the lane-dense layout.

    src2d  : (N*H, W*Cin) value
    pad_ref: (N, H+2, W*Cin) VMEM scratch (H halo lives here, never in HBM)
    wd_ref : (3, W*Cin, W*Cout) dense weights (W halo folded into the weight matrix)
    returns: (N*H, W*Cout) float32
    """
    n, hp, wcin = pad_ref.shape
    h = hp - 2
    wcout = wd_ref.shape[-1]
    # H halo inside VMEM: zero the two border rows, write the interior.
    pad_ref[:, 0:1, :] = jnp.zeros((n, 1, wcin), jnp.float32)
    pad_ref[:, h + 1:h + 2, :] = jnp.zeros((n, 1, wcin), jnp.float32)
    pad_ref[:, 1:h + 1, :] = src2d.reshape(n, h, wcin)
    acc = jnp.zeros((n * h, wcout), jnp.float32)
    for dy in range(3):  # one MXU matmul per kernel row: K = W*Cin, N = W*Cout
        slab = pad_ref[:, dy:dy + h, :].reshape(n * h, wcin)
        acc = acc + jnp.dot(slab, wd_ref[dy],
                            preferred_element_type=jnp.float32, precision=_PREC)
    return acc


def _bn_dense(y, gamma_ref, beta_ref, gp_ref, gpt_ref):
    """Training-mode BatchNorm (stats over N,H,W per channel) in the lane-dense layout.

    One pass (sum / sum-of-squares), channel pooling and the channel->lane broadcast are
    tiny one-hot matmuls, gamma/beta folded into a single scale+shift FMA.
    """
    rows, lanes = y.shape
    c = gp_ref.shape[-1]
    cnt = rows * (lanes // c)  # = N*H*W
    s1 = jnp.sum(jnp.dot(y, gp_ref[...], preferred_element_type=jnp.float32,
                         precision=_PREC), axis=0, keepdims=True)            # (1, C)
    s2 = jnp.sum(jnp.dot(y * y, gp_ref[...], preferred_element_type=jnp.float32,
                         precision=_PREC), axis=0, keepdims=True)            # (1, C)
    mean = s1 / cnt
    var = jnp.maximum(s2 / cnt - mean * mean, 0.0)
    scale = gamma_ref[...] * jax.lax.rsqrt(var + EPS)                        # (1, C)
    shift = beta_ref[...] - mean * scale                                     # (1, C)
    scale_l = jnp.dot(scale, gpt_ref[...], preferred_element_type=jnp.float32,
                      precision=_PREC)                                       # (1, W*C)
    shift_l = jnp.dot(shift, gpt_ref[...], preferred_element_type=jnp.float32,
                      precision=_PREC)
    return y * scale_l + shift_l


# ------------------------------------- kernels ---------------------------------------


def identity_block_proj_kernel(x_ref, w1d_ref, g1_ref, b1_ref,
                               w2d_ref, g2_ref, b2_ref,
                               wid_ref, gid_ref, betaid_ref,
                               gp1_ref, gp1t_ref, gp2_ref, gp2t_ref,
                               o_ref, xp_ref, h1p_ref):
    """Fused IdentityBlock forward, channel-changing variant (1x1 projected identity)."""
    x2d = x_ref[...]
    # conv1 (3x3 same, no bias) + bn1 + relu
    h1 = jnp.maximum(_bn_dense(_conv3x3_dense(x2d, xp_ref, w1d_ref),
                               g1_ref, b1_ref, gp1_ref, gp1t_ref), 0.0)
    # conv2 (3x3 same, no bias) + bn2
    y2 = _bn_dense(_conv3x3_dense(h1, h1p_ref, w2d_ref),
                   g2_ref, b2_ref, gp2_ref, gp2t_ref)
    # identity path: 1x1 projection + bn (Conv2d bias dropped -- exactly cancelled by BN)
    idp = jnp.dot(x2d, wid_ref[...], preferred_element_type=jnp.float32, precision=_PREC)
    idn = _bn_dense(idp, gid_ref, betaid_ref, gp2_ref, gp2t_ref)
    # residual add + relu, lane-dense store
    o_ref[...] = jnp.maximum(y2 + idn, 0.0)


def identity_block_noproj_kernel(x_ref, w1d_ref, g1_ref, b1_ref,
                                 w2d_ref, g2_ref, b2_ref,
                                 gp1_ref, gp1t_ref, gp2_ref, gp2t_ref,
                                 o_ref, xp_ref, h1p_ref):
    """Fused IdentityBlock forward when in_channels == out_channels (raw identity)."""
    x2d = x_ref[...]
    h1 = jnp.maximum(_bn_dense(_conv3x3_dense(x2d, xp_ref, w1d_ref),
                               g1_ref, b1_ref, gp1_ref, gp1t_ref), 0.0)
    y2 = _bn_dense(_conv3x3_dense(h1, h1p_ref, w2d_ref),
                   g2_ref, b2_ref, gp2_ref, gp2t_ref)
    o_ref[...] = jnp.maximum(y2 + x2d, 0.0)


# ------------------------------------- wrapper ----------------------------------------


def identity_block(x_nchw, p):
    """Forward pass of IdentityBlock (conv=False, 2-deep). Input/output NCHW."""
    n, cin, h, w_ = x_nchw.shape
    c1 = p["w1"].shape[-1]
    c2 = p["w2"].shape[-1]

    # NCHW -> NHWC -> lane-dense 2-D view (rows = (n, h), lanes = (w, c)).
    # The reshape of contiguous NHWC bytes is free; only the transpose costs one pass.
    x2d = jnp.transpose(x_nchw, (0, 2, 3, 1)).astype(jnp.float32).reshape(n * h, w_ * cin)

    # Host-side weight packing (pure layout work; precomputed once in real use).
    w1d = _dense_conv3x3_weight(p["w1"], w_)
    w2d = _dense_conv3x3_weight(p["w2"], w_)
    gp1, gp1t = _channel_pool(w_, c1)
    gp2, gp2t = _channel_pool(w_, c2)

    scratch = [pltpu.VMEM((n, h + 2, w_ * cin), jnp.float32),   # x with H halo
               pltpu.VMEM((n, h + 2, w_ * c1), jnp.float32)]    # h1 with H halo

    if cin != c2:
        widd = _dense_conv1x1_weight(p["wid"], w_)
        args = (x2d, w1d, p["g1"], p["b1"], w2d, p["g2"], p["b2"],
                widd, p["gid"], p["betaid"], gp1, gp1t, gp2, gp2t)
        kernel = identity_block_proj_kernel
    else:
        args = (x2d, w1d, p["g1"], p["b1"], w2d, p["g2"], p["b2"],
                gp1, gp1t, gp2, gp2t)
        kernel = identity_block_noproj_kernel

    out2d = pl.pallas_call(
        kernel,
        out_shape=jax.ShapeDtypeStruct((n * h, w_ * c2), jnp.float32),
        in_specs=[_full(a.shape) for a in args],
        out_specs=_full((n * h, w_ * c2)),
        scratch_shapes=scratch,
    )(*args)

    # lane-dense 2-D -> NHWC -> NCHW
    return jnp.transpose(out2d.reshape(n, h, w_, c2), (0, 3, 1, 2))


# ----------------------------- pure-JAX reference ------------------------------


def _bn_ref(x, gamma, beta):
    mean = x.mean(axis=(0, 1, 2), keepdims=True)
    var = ((x - mean) ** 2).mean(axis=(0, 1, 2), keepdims=True)
    return (x - mean) * jax.lax.rsqrt(var + EPS) * gamma.reshape(1, 1, 1, -1) \
        + beta.reshape(1, 1, 1, -1)


def identity_block_ref(x_nchw, p):
    x = jnp.transpose(x_nchw, (0, 2, 3, 1)).astype(jnp.float32)
    dn = ("NHWC", "HWIO", "NHWC")
    conv = functools.partial(jax.lax.conv_general_dilated, window_strides=(1, 1),
                             padding="SAME", dimension_numbers=dn, precision=_PREC)
    h1 = jnp.maximum(_bn_ref(conv(x, p["w1"]), p["g1"], p["b1"]), 0.0)
    h2 = _bn_ref(conv(h1, p["w2"]), p["g2"], p["b2"])
    if x.shape[-1] != h2.shape[-1]:
        ident = conv(x, p["wid"][None, None]) + p["bid"].reshape(1, 1, 1, -1)
        ident = _bn_ref(ident, p["gid"], p["betaid"])
    else:
        ident = x
    out = jnp.maximum(h2 + ident, 0.0)
    return jnp.transpose(out, (0, 3, 1, 2))


# ----------------------------- main --------------------------------------------

if __name__ == "__main__":
    # NCHW input, in_channels=4, out_channels=[8, 8], conv=False
    # -> identity path needs the 1x1 projection (+ BN).  W*Cout = 128 -> lane-dense.
    N, Cin, H, W = 2, 4, 16, 16
    C1, C2 = 8, 8

    ks = jax.random.split(jax.random.PRNGKey(0), 11)
    params = {
        "w1": 0.1 * jax.random.normal(ks[0], (3, 3, Cin, C1), jnp.float32),   # conv1 (HWIO)
        "g1": 1.0 + 0.1 * jax.random.normal(ks[1], (1, C1), jnp.float32),     # bn1 gamma
        "b1": 0.1 * jax.random.normal(ks[2], (1, C1), jnp.float32),           # bn1 beta
        "w2": 0.1 * jax.random.normal(ks[3], (3, 3, C1, C2), jnp.float32),    # conv2 (HWIO)
        "g2": 1.0 + 0.1 * jax.random.normal(ks[4], (1, C2), jnp.float32),     # bn2 gamma
        "b2": 0.1 * jax.random.normal(ks[5], (1, C2), jnp.float32),           # bn2 beta
        "wid": 0.1 * jax.random.normal(ks[6], (Cin, C2), jnp.float32),        # identity 1x1
        "bid": 0.1 * jax.random.normal(ks[7], (1, C2), jnp.float32),          # identity bias
        "gid": 1.0 + 0.1 * jax.random.normal(ks[8], (1, C2), jnp.float32),    # identity bn gamma
        "betaid": 0.1 * jax.random.normal(ks[9], (1, C2), jnp.float32),       # identity bn beta
    }
    x = jax.random.normal(ks[10], (N, Cin, H, W), jnp.float32)

    out = jax.block_until_ready(identity_block(x, params))
    ref = identity_block_ref(x, params)

    assert out.shape == (N, C2, H, W), out.shape
    assert jnp.allclose(out, ref, atol=1e-4, rtol=1e-4), \
        float(jnp.max(jnp.abs(out - ref)))
    print("KERNEL_OK")
</pallas_src>

<mosaic_0001>
module attributes {stable_mosaic.version = 11 : i64} {
  func.func @identity_block_proj_kernel(%arg0: memref<32x64xf32, #tpu.memory_space<vmem>>, %arg1: memref<3x64x128xf32, #tpu.memory_space<vmem>>, %arg2: memref<1x8xf32, #tpu.memory_space<vmem>>, %arg3: memref<1x8xf32, #tpu.memory_space<vmem>>, %arg4: memref<3x128x128xf32, #tpu.memory_space<vmem>>, %arg5: memref<1x8xf32, #tpu.memory_space<vmem>>, %arg6: memref<1x8xf32, #tpu.memory_space<vmem>>, %arg7: memref<64x128xf32, #tpu.memory_space<vmem>>, %arg8: memref<1x8xf32, #tpu.memory_space<vmem>>, %arg9: memref<1x8xf32, #tpu.memory_space<vmem>>, %arg10: memref<128x8xf32, #tpu.memory_space<vmem>>, %arg11: memref<8x128xf32, #tpu.memory_space<vmem>>, %arg12: memref<128x8xf32, #tpu.memory_space<vmem>>, %arg13: memref<8x128xf32, #tpu.memory_space<vmem>>, %arg14: memref<32x128xf32, #tpu.memory_space<vmem>>, %arg15: memref<2x18x64xf32, #tpu.memory_space<vmem>>, %arg16: memref<2x18x128xf32, #tpu.memory_space<vmem>>) attributes {dimension_semantics = [], scalar_prefetch = 0 : i64, scratch_operands = 2 : i64, tpu.core_type = #tpu.core_type<tc>} {
    %c0 = arith.constant 0 : index
    %c0_0 = arith.constant 0 : index
    %0 = vector.load %arg0[%c0, %c0_0] : memref<32x64xf32, #tpu.memory_space<vmem>>, vector<32x64xf32>
    %cst = arith.constant 0.000000e+00 : f32
    %1 = vector.broadcast %cst : f32 to vector<2x1x64xf32>
    %c0_1 = arith.constant 0 : index
    %c0_2 = arith.constant 0 : index
    %c0_3 = arith.constant 0 : index
    %2 = vector.load %arg15[%c0_1, %c0_2, %c0_3] : memref<2x18x64xf32, #tpu.memory_space<vmem>>, vector<2x1x64xf32>
    tpu.vector_store %arg15[%c0_1, %c0_2, %c0_3], %1 {strides = array<i32>} : memref<2x18x64xf32, #tpu.memory_space<vmem>>, vector<2x1x64xf32>,
    %cst_4 = arith.constant 0.000000e+00 : f32
    %3 = vector.broadcast %cst_4 : f32 to vector<2x1x64xf32>
    %c0_5 = arith.constant 0 : index
    %c17 = arith.constant 17 : index
    %c0_6 = arith.constant 0 : index
    %4 = vector.load %arg15[%c0_5, %c17, %c0_6] : memref<2x18x64xf32, #tpu.memory_space<vmem>>, vector<2x1x64xf32>
    tpu.vector_store %arg15[%c0_5, %c17, %c0_6], %3 {strides = array<i32>} : memref<2x18x64xf32, #tpu.memory_space<vmem>>, vector<2x1x64xf32>,
    %5 = vector.shape_cast %0 : vector<32x64xf32> to vector<2x16x64xf32>
    %c0_7 = arith.constant 0 : index
    %c1 = arith.constant 1 : index
    %c0_8 = arith.constant 0 : index
    %6 = vector.load %arg15[%c0_7, %c1, %c0_8] : memref<2x18x64xf32, #tpu.memory_space<vmem>>, vector<2x16x64xf32>
    tpu.vector_store %arg15[%c0_7, %c1, %c0_8], %5 {strides = array<i32>} : memref<2x18x64xf32, #tpu.memory_space<vmem>>, vector<2x16x64xf32>,
    %cst_9 = arith.constant 0.000000e+00 : f32
    %7 = vector.broadcast %cst_9 : f32 to vector<32x128xf32>
    %c0_10 = arith.constant 0 : index
    %c0_11 = arith.constant 0 : index
    %c0_12 = arith.constant 0 : index
    %8 = vector.load %arg15[%c0_10, %c0_11, %c0_12] : memref<2x18x64xf32, #tpu.memory_space<vmem>>, vector<2x16x64xf32>
    %9 = vector.shape_cast %8 : vector<2x16x64xf32> to vector<32x64xf32>
    %c0_13 = arith.constant 0 : index
    %c0_14 = arith.constant 0 : index
    %c0_15 = arith.constant 0 : index
    %10 = vector.load %arg1[%c0_13, %c0_14, %c0_15] : memref<3x64x128xf32, #tpu.memory_space<vmem>>, vector<1x64x128xf32>
    %11 = vector.shape_cast %10 : vector<1x64x128xf32> to vector<64x128xf32>
    %cst_16 = arith.constant dense<0.000000e+00> : vector<32x128xf32>
    %12 = tpu.matmul %9, %11, %cst_16 {dimension_numbers = #tpu.dot_dimension_numbers<[1], [0], [0], [1], [0, 0, 1, 1], [], []>, precision = #tpu.contract_precision<fp32>} : vector<32x64xf32>, vector<64x128xf32>, vector<32x128xf32> -> vector<32x128xf32>
    %13 = arith.addf %7, %12 : vector<32x128xf32>
    %c0_17 = arith.constant 0 : index
    %c1_18 = arith.constant 1 : index
    %c0_19 = arith.constant 0 : index
    %14 = vector.load %arg15[%c0_17, %c1_18, %c0_19] : memref<2x18x64xf32, #tpu.memory_space<vmem>>, vector<2x16x64xf32>
    %15 = vector.shape_cast %14 : vector<2x16x64xf32> to vector<32x64xf32>
    %c1_20 = arith.constant 1 : index
    %c0_21 = arith.constant 0 : index
    %c0_22 = arith.constant 0 : index
    %16 = vector.load %arg1[%c1_20, %c0_21, %c0_22] : memref<3x64x128xf32, #tpu.memory_space<vmem>>, vector<1x64x128xf32>
    %17 = vector.shape_cast %16 : vector<1x64x128xf32> to vector<64x128xf32>
    %cst_23 = arith.constant dense<0.000000e+00> : vector<32x128xf32>
    %18 = tpu.matmul %15, %17, %cst_23 {dimension_numbers = #tpu.dot_dimension_numbers<[1], [0], [0], [1], [0, 0, 1, 1], [], []>, precision = #tpu.contract_precision<fp32>} : vector<32x64xf32>, vector<64x128xf32>, vector<32x128xf32> -> vector<32x128xf32>
    %19 = arith.addf %13, %18 : vector<32x128xf32>
    %c0_24 = arith.constant 0 : index
    %c2 = arith.constant 2 : index
    %c0_25 = arith.constant 0 : index
    %20 = vector.load %arg15[%c0_24, %c2, %c0_25] : memref<2x18x64xf32, #tpu.memory_space<vmem>>, vector<2x16x64xf32>
    %21 = vector.shape_cast %20 : vector<2x16x64xf32> to vector<32x64xf32>
    %c2_26 = arith.constant 2 : index
    %c0_27 = arith.constant 0 : index
    %c0_28 = arith.constant 0 : index
    %22 = vector.load %arg1[%c2_26, %c0_27, %c0_28] : memref<3x64x128xf32, #tpu.memory_space<vmem>>, vector<1x64x128xf32>
    %23 = vector.shape_cast %22 : vector<1x64x128xf32> to vector<64x128xf32>
    %cst_29 = arith.constant dense<0.000000e+00> : vector<32x128xf32>
    %24 = tpu.matmul %21, %23, %cst_29 {dimension_numbers = #tpu.dot_dimension_numbers<[1], [0], [0], [1], [0, 0, 1, 1], [], []>, precision = #tpu.contract_precision<fp32>} : vector<32x64xf32>, vector<64x128xf32>, vector<32x128xf32> -> vector<32x128xf32>
    %25 = arith.addf %19, %24 : vector<32x128xf32>
    %c0_30 = arith.constant 0 : index
    %c0_31 = arith.constant 0 : index
    %26 = vector.load %arg10[%c0_30, %c0_31] : memref<128x8xf32, #tpu.memory_space<vmem>>, vector<128x8xf32>
    %cst_32 = arith.constant dense<0.000000e+00> : vector<32x8xf32>
    %27 = tpu.matmul %25, %26, %cst_32 {dimension_numbers = #tpu.dot_dimension_numbers<[1], [0], [0], [1], [0, 0, 1, 1], [], []>, precision = #tpu.contract_precision<fp32>} : vector<32x128xf32>, vector<128x8xf32>, vector<32x8xf32> -> vector<32x8xf32>
    %cst_33 = arith.constant dense<0.000000e+00> : vector<8xf32>
    %28 = vector.multi_reduction <add>, %27, %cst_33 [0] : vector<32x8xf32> to vector<8xf32>
    %29 = vector.shape_cast %28 : vector<8xf32> to vector<1x8xf32>
    %30 = arith.mulf %25, %25 : vector<32x128xf32>
    %c0_34 = arith.constant 0 : index
    %c0_35 = arith.constant 0 : index
    %31 = vector.load %arg10[%c0_34, %c0_35] : memref<128x8xf32, #tpu.memory_space<vmem>>, vector<128x8xf32>
    %cst_36 = arith.constant dense<0.000000e+00> : vector<32x8xf32>
    %32 = tpu.matmul %30, %31, %cst_36 {dimension_numbers = #tpu.dot_dimension_numbers<[1], [0], [0], [1], [0, 0, 1, 1], [], []>, precision = #tpu.contract_precision<fp32>} : vector<32x128xf32>, vector<128x8xf32>, vector<32x8xf32> -> vector<32x8xf32>
    %cst_37 = arith.constant dense<0.000000e+00> : vector<8xf32>
    %33 = vector.multi_reduction <add>, %32, %cst_37 [0] : vector<32x8xf32> to vector<8xf32>
    %34 = vector.shape_cast %33 : vector<8xf32> to vector<1x8xf32>
    %cst_38 = arith.constant 5.120000e+02 : f32
    %35 = vector.broadcast %cst_38 : f32 to vector<1x8xf32>
    %36 = arith.divf %29, %35 : vector<1x8xf32>
    %cst_39 = arith.constant 5.120000e+02 : f32
    %37 = vector.broadcast %cst_39 : f32 to vector<1x8xf32>
    %38 = arith.divf %34, %37 : vector<1x8xf32>
    %39 = arith.mulf %36, %36 : vector<1x8xf32>
    %40 = arith.subf %38, %39 : vector<1x8xf32>
    %cst_40 = arith.constant 0.000000e+00 : f32
    %41 = vector.broadcast %cst_40 : f32 to vector<1x8xf32>
    %42 = arith.maximumf %40, %41 : vector<1x8xf32>
    %c0_41 = arith.constant 0 : index
    %c0_42 = arith.constant 0 : index
    %43 = vector.load %arg2[%c0_41, %c0_42] : memref<1x8xf32, #tpu.memory_space<vmem>>, vector<1x8xf32>
    %cst_43 = arith.constant 9.99999974E-6 : f32
    %44 = vector.broadcast %cst_43 : f32 to vector<1x8xf32>
    %45 = arith.addf %42, %44 : vector<1x8xf32>
    %46 = math.rsqrt %45 : vector<1x8xf32>
    %47 = arith.mulf %43, %46 : vector<1x8xf32>
    %c0_44 = arith.constant 0 : index
    %c0_45 = arith.constant 0 : index
    %48 = vector.load %arg3[%c0_44, %c0_45] : memref<1x8xf32, #tpu.memory_space<vmem>>, vector<1x8xf32>
    %49 = arith.mulf %36, %47 : vector<1x8xf32>
    %50 = arith.subf %48, %49 : vector<1x8xf32>
    %c0_46 = arith.constant 0 : index
    %c0_47 = arith.constant 0 : index
    %51 = vector.load %arg11[%c0_46, %c0_47] : memref<8x128xf32, #tpu.memory_space<vmem>>, vector<8x128xf32>
    %cst_48 = arith.constant dense<0.000000e+00> : vector<1x128xf32>
    %52 = tpu.matmul %47, %51, %cst_48 {dimension_numbers = #tpu.dot_dimension_numbers<[1], [0], [0], [1], [0, 0, 1, 1], [], []>, precision = #tpu.contract_precision<fp32>} : vector<1x8xf32>, vector<8x128xf32>, vector<1x128xf32> -> vector<1x128xf32>
    %c0_49 = arith.constant 0 : index
    %c0_50 = arith.constant 0 : index
    %53 = vector.load %arg11[%c0_49, %c0_50] : memref<8x128xf32, #tpu.memory_space<vmem>>, vector<8x128xf32>
    %cst_51 = arith.constant dense<0.000000e+00> : vector<1x128xf32>
    %54 = tpu.matmul %50, %53, %cst_51 {dimension_numbers = #tpu.dot_dimension_numbers<[1], [0], [0], [1], [0, 0, 1, 1], [], []>, precision = #tpu.contract_precision<fp32>} : vector<1x8xf32>, vector<8x128xf32>, vector<1x128xf32> -> vector<1x128xf32>
    %55 = vector.broadcast %52 : vector<1x128xf32> to vector<32x128xf32>
    %56 = arith.mulf %25, %55 : vector<32x128xf32>
    %57 = vector.broadcast %54 : vector<1x128xf32> to vector<32x128xf32>
    %58 = arith.addf %56, %57 : vector<32x128xf32>
    %cst_52 = arith.constant 0.000000e+00 : f32
    %59 = vector.broadcast %cst_52 : f32 to vector<32x128xf32>
    %60 = arith.maximumf %58, %59 : vector<32x128xf32>
    %cst_53 = arith.constant 0.000000e+00 : f32
    %61 = vector.broadcast %cst_53 : f32 to vector<2x1x128xf32>
    %c0_54 = arith.constant 0 : index
    %c0_55 = arith.constant 0 : index
    %c0_56 = arith.constant 0 : index
    %62 = vector.load %arg16[%c0_54, %c0_55, %c0_56] : memref<2x18x128xf32, #tpu.memory_space<vmem>>, vector<2x1x128xf32>
    tpu.vector_store %arg16[%c0_54, %c0_55, %c0_56], %61 {strides = array<i32>} : memref<2x18x128xf32, #tpu.memory_space<vmem>>, vector<2x1x128xf32>,
    %cst_57 = arith.constant 0.000000e+00 : f32
    %63 = vector.broadcast %cst_57 : f32 to vector<2x1x128xf32>
    %c0_58 = arith.constant 0 : index
    %c17_59 = arith.constant 17 : index
    %c0_60 = arith.constant 0 : index
    %64 = vector.load %arg16[%c0_58, %c17_59, %c0_60] : memref<2x18x128xf32, #tpu.memory_space<vmem>>, vector<2x1x128xf32>
    tpu.vector_store %arg16[%c0_58, %c17_59, %c0_60], %63 {strides = array<i32>} : memref<2x18x128xf32, #tpu.memory_space<vmem>>, vector<2x1x128xf32>,
    %65 = vector.shape_cast %60 : vector<32x128xf32> to vector<2x16x128xf32>
    %c0_61 = arith.constant 0 : index
    %c1_62 = arith.constant 1 : index
    %c0_63 = arith.constant 0 : index
    %66 = vector.load %arg16[%c0_61, %c1_62, %c0_63] : memref<2x18x128xf32, #tpu.memory_space<vmem>>, vector<2x16x128xf32>
    tpu.vector_store %arg16[%c0_61, %c1_62, %c0_63], %65 {strides = array<i32>} : memref<2x18x128xf32, #tpu.memory_space<vmem>>, vector<2x16x128xf32>,
    %cst_64 = arith.constant 0.000000e+00 : f32
    %67 = vector.broadcast %cst_64 : f32 to vector<32x128xf32>
    %c0_65 = arith.constant 0 : index
    %c0_66 = arith.constant 0 : index
    %c0_67 = arith.constant 0 : index
    %68 = vector.load %arg16[%c0_65, %c0_66, %c0_67] : memref<2x18x128xf32, #tpu.memory_space<vmem>>, vector<2x16x128xf32>
    %69 = vector.shape_cast %68 : vector<2x16x128xf32> to vector<32x128xf32>
    %c0_68 = arith.constant 0 : index
    %c0_69 = arith.constant 0 : index
    %c0_70 = arith.constant 0 : index
    %70 = vector.load %arg4[%c0_68, %c0_69, %c0_70] : memref<3x128x128xf32, #tpu.memory_space<vmem>>, vector<1x128x128xf32>
    %71 = vector.shape_cast %70 : vector<1x128x128xf32> to vector<128x128xf32>
    %cst_71 = arith.constant dense<0.000000e+00> : vector<32x128xf32>
    %72 = tpu.matmul %69, %71, %cst_71 {dimension_numbers = #tpu.dot_dimension_numbers<[1], [0], [0], [1], [0, 0, 1, 1], [], []>, precision = #tpu.contract_precision<fp32>} : vector<32x128xf32>, vector<128x128xf32>, vector<32x128xf32> -> vector<32x128xf32>
    %73 = arith.addf %67, %72 : vector<32x128xf32>
    %c0_72 = arith.constant 0 : index
    %c1_73 = arith.constant 1 : index
    %c0_74 = arith.constant 0 : index
    %74 = vector.load %arg16[%c0_72, %c1_73, %c0_74] : memref<2x18x128xf32, #tpu.memory_space<vmem>>, vector<2x16x128xf32>
    %75 = vector.shape_cast %74 : vector<2x16x128xf32> to vector<32x128xf32>
    %c1_75 = arith.constant 1 : index
    %c0_76 = arith.constant 0 : index
    %c0_77 = arith.constant 0 : index
    %76 = vector.load %arg4[%c1_75, %c0_76, %c0_77] : memref<3x128x128xf32, #tpu.memory_space<vmem>>, vector<1x128x128xf32>
    %77 = vector.shape_cast %76 : vector<1x128x128xf32> to vector<128x128xf32>
    %cst_78 = arith.constant dense<0.000000e+00> : vector<32x128xf32>
    %78 = tpu.matmul %75, %77, %cst_78 {dimension_numbers = #tpu.dot_dimension_numbers<[1], [0], [0], [1], [0, 0, 1, 1], [], []>, precision = #tpu.contract_precision<fp32>} : vector<32x128xf32>, vector<128x128xf32>, vector<32x128xf32> -> vector<32x128xf32>
    %79 = arith.addf %73, %78 : vector<32x128xf32>
    %c0_79 = arith.constant 0 : index
    %c2_80 = arith.constant 2 : index
    %c0_81 = arith.constant 0 : index
    %80 = vector.load %arg16[%c0_79, %c2_80, %c0_81] : memref<2x18x128xf32, #tpu.memory_space<vmem>>, vector<2x16x128xf32>
    %81 = vector.shape_cast %80 : vector<2x16x128xf32> to vector<32x128xf32>
    %c2_82 = arith.constant 2 : index
    %c0_83 = arith.constant 0 : index
    %c0_84 = arith.constant 0 : index
    %82 = vector.load %arg4[%c2_82, %c0_83, %c0_84] : memref<3x128x128xf32, #tpu.memory_space<vmem>>, vector<1x128x128xf32>
    %83 = vector.shape_cast %82 : vector<1x128x128xf32> to vector<128x128xf32>
    %cst_85 = arith.constant dense<0.000000e+00> : vector<32x128xf32>
    %84 = tpu.matmul %81, %83, %cst_85 {dimension_numbers = #tpu.dot_dimension_numbers<[1], [0], [0], [1], [0, 0, 1, 1], [], []>, precision = #tpu.contract_precision<fp32>} : vector<32x128xf32>, vector<128x128xf32>, vector<32x128xf32> -> vector<32x128xf32>
    %85 = arith.addf %79, %84 : vector<32x128xf32>
    %c0_86 = arith.constant 0 : index
    %c0_87 = arith.constant 0 : index
    %86 = vector.load %arg12[%c0_86, %c0_87] : memref<128x8xf32, #tpu.memory_space<vmem>>, vector<128x8xf32>
    %cst_88 = arith.constant dense<0.000000e+00> : vector<32x8xf32>
    %87 = tpu.matmul %85, %86, %cst_88 {dimension_numbers = #tpu.dot_dimension_numbers<[1], [0], [0], [1], [0, 0, 1, 1], [], []>, precision = #tpu.contract_precision<fp32>} : vector<32x128xf32>, vector<128x8xf32>, vector<32x8xf32> -> vector<32x8xf32>
    %cst_89 = arith.constant dense<0.000000e+00> : vector<8xf32>
    %88 = vector.multi_reduction <add>, %87, %cst_89 [0] : vector<32x8xf32> to vector<8xf32>
    %89 = vector.shape_cast %88 : vector<8xf32> to vector<1x8xf32>
    %90 = arith.mulf %85, %85 : vector<32x128xf32>
    %c0_90 = arith.constant 0 : index
    %c0_91 = arith.constant 0 : index
    %91 = vector.load %arg12[%c0_90, %c0_91] : memref<128x8xf32, #tpu.memory_space<vmem>>, vector<128x8xf32>
    %cst_92 = arith.constant dense<0.000000e+00> : vector<32x8xf32>
    %92 = tpu.matmul %90, %91, %cst_92 {dimension_numbers = #tpu.dot_dimension_numbers<[1], [0], [0], [1], [0, 0, 1, 1], [], []>, precision = #tpu.contract_precision<fp32>} : vector<32x128xf32>, vector<128x8xf32>, vector<32x8xf32> -> vector<32x8xf32>
    %cst_93 = arith.constant dense<0.000000e+00> : vector<8xf32>
    %93 = vector.multi_reduction <add>, %92, %cst_93 [0] : vector<32x8xf32> to vector<8xf32>
    %94 = vector.shape_cast %93 : vector<8xf32> to vector<1x8xf32>
    %cst_94 = arith.constant 5.120000e+02 : f32
    %95 = vector.broadcast %cst_94 : f32 to vector<1x8xf32>
    %96 = arith.divf %89, %95 : vector<1x8xf32>
    %cst_95 = arith.constant 5.120000e+02 : f32
    %97 = vector.broadcast %cst_95 : f32 to vector<1x8xf32>
    %98 = arith.divf %94, %97 : vector<1x8xf32>
    %99 = arith.mulf %96, %96 : vector<1x8xf32>
    %100 = arith.subf %98, %99 : vector<1x8xf32>
    %cst_96 = arith.constant 0.000000e+00 : f32
    %101 = vector.broadcast %cst_96 : f32 to vector<1x8xf32>
    %102 = arith.maximumf %100, %101 : vector<1x8xf32>
    %c0_97 = arith.constant 0 : index
    %c0_98 = arith.constant 0 : index
    %103 = vector.load %arg5[%c0_97, %c0_98] : memref<1x8xf32, #tpu.memory_space<vmem>>, vector<1x8xf32>
    %cst_99 = arith.constant 9.99999974E-6 : f32
    %104 = vector.broadcast %cst_99 : f32 to vector<1x8xf32>
    %105 = arith.addf %102, %104 : vector<1x8xf32>
    %106 = math.rsqrt %105 : vector<1x8xf32>
    %107 = arith.mulf %103, %106 : vector<1x8xf32>
    %c0_100 = arith.constant 0 : index
    %c0_101 = arith.constant 0 : index
    %108 = vector.load %arg6[%c0_100, %c0_101] : memref<1x8xf32, #tpu.memory_space<vmem>>, vector<1x8xf32>
    %109 = arith.mulf %96, %107 : vector<1x8xf32>
    %110 = arith.subf %108, %109 : vector<1x8xf32>
    %c0_102 = arith.constant 0 : index
    %c0_103 = arith.constant 0 : index
    %111 = vector.load %arg13[%c0_102, %c0_103] : memref<8x128xf32, #tpu.memory_space<vmem>>, vector<8x128xf32>
    %cst_104 = arith.constant dense<0.000000e+00> : vector<1x128xf32>
    %112 = tpu.matmul %107, %111, %cst_104 {dimension_numbers = #tpu.dot_dimension_numbers<[1], [0], [0], [1], [0, 0, 1, 1], [], []>, precision = #tpu.contract_precision<fp32>} : vector<1x8xf32>, vector<8x128xf32>, vector<1x128xf32> -> vector<1x128xf32>
    %c0_105 = arith.constant 0 : index
    %c0_106 = arith.constant 0 : index
    %113 = vector.load %arg13[%c0_105, %c0_106] : memref<8x128xf32, #tpu.memory_space<vmem>>, vector<8x128xf32>
    %cst_107 = arith.constant dense<0.000000e+00> : vector<1x128xf32>
    %114 = tpu.matmul %110, %113, %cst_107 {dimension_numbers = #tpu.dot_dimension_numbers<[1], [0], [0], [1], [0, 0, 1, 1], [], []>, precision = #tpu.contract_precision<fp32>} : vector<1x8xf32>, vector<8x128xf32>, vector<1x128xf32> -> vector<1x128xf32>
    %115 = vector.broadcast %112 : vector<1x128xf32> to vector<32x128xf32>
    %116 = arith.mulf %85, %115 : vector<32x128xf32>
    %117 = vector.broadcast %114 : vector<1x128xf32> to vector<32x128xf32>
    %118 = arith.addf %116, %117 : vector<32x128xf32>
    %c0_108 = arith.constant 0 : index
    %c0_109 = arith.constant 0 : index
    %119 = vector.load %arg7[%c0_108, %c0_109] : memref<64x128xf32, #tpu.memory_space<vmem>>, vector<64x128xf32>
    %cst_110 = arith.constant dense<0.000000e+00> : vector<32x128xf32>
    %120 = tpu.matmul %0, %119, %cst_110 {dimension_numbers = #tpu.dot_dimension_numbers<[1], [0], [0], [1], [0, 0, 1, 1], [], []>, precision = #tpu.contract_precision<fp32>} : vector<32x64xf32>, vector<64x128xf32>, vector<32x128xf32> -> vector<32x128xf32>
    %c0_111 = arith.constant 0 : index
    %c0_112 = arith.constant 0 : index
    %121 = vector.load %arg12[%c0_111, %c0_112] : memref<128x8xf32, #tpu.memory_space<vmem>>, vector<128x8xf32>
    %cst_113 = arith.constant dense<0.000000e+00> : vector<32x8xf32>
    %122 = tpu.matmul %120, %121, %cst_113 {dimension_numbers = #tpu.dot_dimension_numbers<[1], [0], [0], [1], [0, 0, 1, 1], [], []>, precision = #tpu.contract_precision<fp32>} : vector<32x128xf32>, vector<128x8xf32>, vector<32x8xf32> -> vector<32x8xf32>
    %cst_114 = arith.constant dense<0.000000e+00> : vector<8xf32>
    %123 = vector.multi_reduction <add>, %122, %cst_114 [0] : vector<32x8xf32> to vector<8xf32>
    %124 = vector.shape_cast %123 : vector<8xf32> to vector<1x8xf32>
    %125 = arith.mulf %120, %120 : vector<32x128xf32>
    %c0_115 = arith.constant 0 : index
    %c0_116 = arith.constant 0 : index
    %126 = vector.load %arg12[%c0_115, %c0_116] : memref<128x8xf32, #tpu.memory_space<vmem>>, vector<128x8xf32>
    %cst_117 = arith.constant dense<0.000000e+00> : vector<32x8xf32>
    %127 = tpu.matmul %125, %126, %cst_117 {dimension_numbers = #tpu.dot_dimension_numbers<[1], [0], [0], [1], [0, 0, 1, 1], [], []>, precision = #tpu.contract_precision<fp32>} : vector<32x128xf32>, vector<128x8xf32>, vector<32x8xf32> -> vector<32x8xf32>
    %cst_118 = arith.constant dense<0.000000e+00> : vector<8xf32>
    %128 = vector.multi_reduction <add>, %127, %cst_118 [0] : vector<32x8xf32> to vector<8xf32>
    %129 = vector.shape_cast %128 : vector<8xf32> to vector<1x8xf32>
    %cst_119 = arith.constant 5.120000e+02 : f32
    %130 = vector.broadcast %cst_119 : f32 to vector<1x8xf32>
    %131 = arith.divf %124, %130 : vector<1x8xf32>
    %cst_120 = arith.constant 5.120000e+02 : f32
    %132 = vector.broadcast %cst_120 : f32 to vector<1x8xf32>
    %133 = arith.divf %129, %132 : vector<1x8xf32>
    %134 = arith.mulf %131, %131 : vector<1x8xf32>
    %135 = arith.subf %133, %134 : vector<1x8xf32>
    %cst_121 = arith.constant 0.000000e+00 : f32
    %136 = vector.broadcast %cst_121 : f32 to vector<1x8xf32>
    %137 = arith.maximumf %135, %136 : vector<1x8xf32>
    %c0_122 = arith.constant 0 : index
    %c0_123 = arith.constant 0 : index
    %138 = vector.load %arg8[%c0_122, %c0_123] : memref<1x8xf32, #tpu.memory_space<vmem>>, vector<1x8xf32>
    %cst_124 = arith.constant 9.99999974E-6 : f32
    %139 = vector.broadcast %cst_124 : f32 to vector<1x8xf32>
    %140 = arith.addf %137, %139 : vector<1x8xf32>
    %141 = math.rsqrt %140 : vector<1x8xf32>
    %142 = arith.mulf %138, %141 : vector<1x8xf32>
    %c0_125 = arith.constant 0 : index
    %c0_126 = arith.constant 0 : index
    %143 = vector.load %arg9[%c0_125, %c0_126] : memref<1x8xf32, #tpu.memory_space<vmem>>, vector<1x8xf32>
    %144 = arith.mulf %131, %142 : vector<1x8xf32>
    %145 = arith.subf %143, %144 : vector<1x8xf32>
    %c0_127 = arith.constant 0 : index
    %c0_128 = arith.constant 0 : index
    %146 = vector.load %arg13[%c0_127, %c0_128] : memref<8x128xf32, #tpu.memory_space<vmem>>, vector<8x128xf32>
    %cst_129 = arith.constant dense<0.000000e+00> : vector<1x128xf32>
    %147 = tpu.matmul %142, %146, %cst_129 {dimension_numbers = #tpu.dot_dimension_numbers<[1], [0], [0], [1], [0, 0, 1, 1], [], []>, precision = #tpu.contract_precision<fp32>} : vector<1x8xf32>, vector<8x128xf32>, vector<1x128xf32> -> vector<1x128xf32>
    %c0_130 = arith.constant 0 : index
    %c0_131 = arith.constant 0 : index
    %148 = vector.load %arg13[%c0_130, %c0_131] : memref<8x128xf32, #tpu.memory_space<vmem>>, vector<8x128xf32>
    %cst_132 = arith.constant dense<0.000000e+00> : vector<1x128xf32>
    %149 = tpu.matmul %145, %148, %cst_132 {dimension_numbers = #tpu.dot_dimension_numbers<[1], [0], [0], [1], [0, 0, 1, 1], [], []>, precision = #tpu.contract_precision<fp32>} : vector<1x8xf32>, vector<8x128xf32>, vector<1x128xf32> -> vector<1x128xf32>
    %150 = vector.broadcast %147 : vector<1x128xf32> to vector<32x128xf32>
    %151 = arith.mulf %120, %150 : vector<32x128xf32>
    %152 = vector.broadcast %149 : vector<1x128xf32> to vector<32x128xf32>
    %153 = arith.addf %151, %152 : vector<32x128xf32>
    %154 = arith.addf %118, %153 : vector<32x128xf32>
    %cst_133 = arith.constant 0.000000e+00 : f32
    %155 = vector.broadcast %cst_133 : f32 to vector<32x128xf32>
    %156 = arith.maximumf %154, %155 : vector<32x128xf32>
    %c0_134 = arith.constant 0 : index
    %c0_135 = arith.constant 0 : index
    %157 = vector.load %arg14[%c0_134, %c0_135] : memref<32x128xf32, #tpu.memory_space<vmem>>, vector<32x128xf32>
    tpu.vector_store %arg14[%c0_134, %c0_135], %156 {strides = array<i32>} : memref<32x128xf32, #tpu.memory_space<vmem>>, vector<32x128xf32>,
    return
  }
}

</mosaic_0001>

<bundles_post_ra>
// kernel: tpu_custom_call.1
= control target key start
LH: loop header
LB: loop body
LE: loop exit
PB: predicated region body
PF: predicated region fallthrough
CT: control target
= control target key end

     0   :  { %19 = vsyncpa [#allocation5], 0  ;;  %s23494_s0 = inlined_call_operand.hbm [shape: f32[32,64], index: 0, kind: input, shape index: {}]   ;;  %s23495_s1 = inlined_call_operand.vmem [shape: f32[3,64,128], index: 1, kind: input, shape index: {}]   ;;  %s23496_s2 = inlined_call_operand.vmem [shape: f32[1,8], index: 2, kind: input, shape index: {}]   ;;  %s23497_s3 = inlined_call_operand.vmem [shape: f32[1,8], index: 3, kind: input, shape index: {}]   ;;  %s23498_s4 = inlined_call_operand.hbm [shape: f32[3,128,128], index: 4, kind: input, shape index: {}]   ;;  %s23499_s5 = inlined_call_operand.hbm [shape: f32[1,8], index: 5, kind: input, shape index: {}]   ;;  %s23500_s6 = inlined_call_operand.vmem [shape: f32[1,8], index: 6, kind: input, shape index: {}]   ;;  %s23501_s7 = inlined_call_operand.vmem [shape: f32[64,128], index: 7, kind: input, shape index: {}]   ;;  %s23502_s8 = inlined_call_operand.vmem [shape: f32[1,8], index: 8, kind: input, shape index: {}]   ;;  %s23503_s9 = inlined_call_operand.vmem [shape: f32[1,8], index: 9, kind: input, shape index: {}]   ;;  %s23504_s10 = inlined_call_operand.vmem [shape: f32[128,8], index: 10, kind: input, shape index: {}]   ;;  %s23505_s11 = inlined_call_operand.vmem [shape: f32[8,128], index: 11, kind: input, shape index: {}]   ;;  %s23506_s12 = inlined_call_operand.vmem [shape: f32[128,8], index: 12, kind: input, shape index: {}]   ;;  %s23507_s13 = inlined_call_operand.vmem [shape: f32[8,128], index: 13, kind: input, shape index: {}]   ;;  %s23508_s14 = inlined_call_operand.hbm [shape: f32[32,128], index: 14, kind: output, shape index: {}]  }
   0x1   :  { %20 = vsyncpa [#allocation8], 0 }
   0x2   :  { %21 = vsyncpa [#allocation6], 0  ;;  %s19577_s29 = smov [#allocation7]   ;;  %s19578_s15 = smov [#allocation4]  }
   0x3   :  { %s45_s30 = sshll.u32 %s19577_s29, 4  ;;  %s27_s16 = sshll.u32 %s19578_s15, 4  ;;  %s46_s30 = int_to_ptr.vmem [resolvable:$true] %s45_s30  ;;  %s19660_s16 = int_to_ptr.vmem [resolvable:$true] %s27_s16 }
   0x4   :  { %s19483_s19 = scalar_lea.hbm %s23498_s4, 6144 }
   0x5   :  { %p19484_p0 = scmp.ne.s32.totalorder %s23498_s4, %s19483_s19  ;;  %p19487_p1 = scmp.lt.u32.totalorder %s19483_s19, %s23498_s4 }
   0x7   :  { %p19489_p2 = pnand %p19487_p1, %p19484_p0 }
   0x9   :  { %19492 = shalt.err (!%p19489_p2)
}
   0xa   :  { %s19493_s24 = scalar_lea.vmem %s46_s30, 6144  ;;  %p19498_p4 = scmp.lt.s32.totalorder %s46_s30, %s46_s30 }
   0xb   :  { %p19494_p3 = scmp.ne.s32.totalorder %s46_s30, %s19493_s24  ;;  %p19499_p5 = scmp.lt.s32.totalorder %s19493_s24, %s19493_s24 }
   0xd   :  { %p19500_p6 = por %p19499_p5, %p19498_p4 }
   0xf   :  { %p19501_p7 = pnand %p19500_p6, %p19494_p3 }
  0x11   :  { %19504 = shalt.err (!%p19501_p7)
}
  0x12   :  { %s19579_s25 = smov 128   ;;  %s19580_s26 = smov 8  }
  0x13   :  { %51 = dma.hbm_to_vmem [thread:$0]  %s23498_s4, 6144, %s46_s30, [#allocation8], %s19579_s25, %s19579_s25, %s19580_s26  }
  0x14   :  { %s19505_s17 = scalar_lea.hbm %s23494_s0, 512 }
  0x15   :  { %p19506_p8 = scmp.ne.s32.totalorder %s23494_s0, %s19505_s17  ;;  %p19509_p9 = scmp.lt.u32.totalorder %s19505_s17, %s23494_s0 }
  0x17   :  { %p19511_p10 = pnand %p19509_p9, %p19506_p8 }
  0x19   :  { %19514 = shalt.err (!%p19511_p10)
}
  0x1a   :  { %s19515_s22 = scalar_lea.vmem %s19660_s16, 512  ;;  %p19520_p12 = scmp.lt.s32.totalorder %s19660_s16, %s19660_s16 }
  0x1b   :  { %p19516_p11 = scmp.ne.s32.totalorder %s19660_s16, %s19515_s22  ;;  %p19521_p13 = scmp.lt.s32.totalorder %s19515_s22, %s19515_s22 }
  0x1d   :  { %p19522_p0 = por %p19521_p13, %p19520_p12 }
  0x1f   :  { %p19523_p1 = pnand %p19522_p0, %p19516_p11 }
  0x21   :  { %19526 = shalt.err (!%p19523_p1)
}
  0x22   :  { %33 = dma.hbm_to_vmem [thread:$0]  %s23494_s0, 512, %s19660_s16, [#allocation5], %s19579_s25, %s19579_s25, %s19580_s26  }
  0x23   :  { %s19581_s23 = smov [#allocation9]   ;;  %s19527_s29 = scalar_lea.hbm %s23499_s5, 16 }
  0x24   :  { %s58_s24 = sshll.u32 %s19581_s23, 4  ;;  %p19528_p2 = scmp.ne.s32.totalorder %s23499_s5, %s19527_s29  ;;  %s59_s24 = int_to_ptr.vmem [resolvable:$true] %s58_s24 }
  0x25   :  { %p19531_p3 = scmp.lt.u32.totalorder %s19527_s29, %s23499_s5 }
  0x27   :  { %p19533_p4 = pnand %p19531_p3, %p19528_p2 }
  0x29   :  { %19536 = shalt.err (!%p19533_p4)
}
  0x2a   :  { %s19537_s20 = scalar_lea.vmem %s59_s24, 16  ;;  %s19541_s0 = scalar_lea.vmem %s59_s24, 32 }
  0x2b   :  { %p19538_p5 = scmp.ne.s32.totalorder %s59_s24, %s19537_s20  ;;  %p19542_p6 = scmp.lt.s32.totalorder %s59_s24, %s59_s24 }
  0x2c   :  { %p19543_p7 = scmp.lt.s32.totalorder %s19541_s0, %s19537_s20 }
  0x2e   :  { %p19544_p8 = por %p19543_p7, %p19542_p6 }
  0x30   :  { %p19545_p9 = pnand %p19544_p8, %p19538_p5 }
  0x32   :  { %19548 = shalt.err (!%p19545_p9)
}
  0x33   :  { %61 = dma.hbm_to_vmem [thread:$0]  %s23499_s5, 16, %s59_s24, [#allocation8]  }
  0x34   :  { %19571 = dma.done.wait [#allocation5], 512  }
  0x35   :  { %19572 = vsyncadd [#allocation5], 4294966784 }
  0x36   :  { %19573 = dma.done.wait [#allocation8], 6160  }
  0x37   :  { %19574 = vsyncadd [#allocation8], 4294961136  ;;  %vm91_vm0 = vcmask 516096   ;;  %v23519_v0 = vmov 0.0   ;;  %v12805_v1 = vld [vmem:[%s23495_s1 + $0x40] sm:$0xff]  ;;  %v12806_v2 = vld [vmem:[%s23495_s1 + $0x48] sm:$0xff] }
  0x38   :  { %92 = vst.msk [vmem:[#allocation2] sm:$0x1] %vm91_vm0, %v23519_v0  ;;  %93 = vst.msk [vmem:[#allocation2 + $0x18] sm:$0x1] %vm91_vm0, %v23519_v0  ;;  %v12807_v3 = vld [vmem:[%s23495_s1 + $0x50] sm:$0xff]  ;;  %vm96_vm1 = vcmask 523264  }
  0x39   :  { %94 = vst.msk [vmem:[#allocation2 + $0x11] sm:$0x1] %vm91_vm0, %v23519_v0  ;;  %95 = vst.msk [vmem:[#allocation2 + $0x29] sm:$0x1] %vm91_vm0, %v23519_v0  ;;  %v139_v4 = vand.u32 4294901760, %v12805_v1  ;;  %v142_v5 = vand.u32 4294901760, %v12806_v2 }
  0x3a   :  { %4696 = vst [vmem:[#allocation3] sm:$0x1] %v23519_v0  ;;  %4697 = vst [vmem:[#allocation3 + $0x18] sm:$0x1] %v23519_v0  ;;  %v12808_v6 = vld [vmem:[%s23495_s1 + $0x58] sm:$0xff]  ;;  %v145_v7 = vand.u32 4294901760, %v12807_v3 }
  0x3b   :  { %4698 = vst [vmem:[#allocation3 + $0x11] sm:$0x1] %v23519_v0  ;;  %4699 = vst [vmem:[#allocation3 + $0x29] sm:$0x1] %v23519_v0  ;;  %v12809_v8 = vld [vmem:[%s23495_s1 + $0x60] sm:$0xff]  ;;  %v12810_v9 = vld [vmem:[%s23495_s1 + $0x68] sm:$0xff]  ;;  %v19743_v14 = vpack.c.bf16 %v142_v5, %v139_v4  ;;  %v19747_v17 = vsub.f32 %v12805_v1, %v139_v4  ;;  %v19757_v22 = vsub.f32 %v12806_v2, %v142_v5 }
  0x3c   :  { %v148_v10 = vand.u32 4294901760, %v12808_v6  ;;  %v12811_v11 = vld [vmem:[%s23495_s1 + $0x70] sm:$0xff]  ;;  %v12812_v12 = vld [vmem:[%s23495_s1 + $0x78] sm:$0xff]  ;;  %v19741_v13 = vld [vmem:[#allocation4] sm:$0xff]  ;;  %v151_v15 = vand.u32 4294901760, %v12809_v8  ;;  %v154_v16 = vand.u32 4294901760, %v12810_v9  ;;  %v19761_v23 = vsub.f32 %v12807_v3, %v145_v7 }
  0x3d   :  { %97 = vst.msk [vmem:[#allocation2 + $0x1] sm:$0xff] %vm96_vm1, %v19741_v13  ;;  %v19749_v18 = vld [vmem:[#allocation4 + $0x8] sm:$0xff]  ;;  %v19751_v19 = vld [vmem:[#allocation4 + $0x10] sm:$0xff]  ;;  %v19753_v20 = vld [vmem:[#allocation4 + $0x18] sm:$0xff]  ;;  %17022 = vmatprep.subr.bf16.mxu0 %v19743_v14  ;;  %v254_v24 = vand.u32 4294901760, %v19747_v17  ;;  %v157_v26 = vand.u32 4294901760, %v12811_v11 }
  0x3e   :  { %23642 = vst [vmem:[#allocation14_spill] sm:$0xff] %v19749_v18  ;;  %23643 = vst [vmem:[#allocation15_spill] sm:$0xff] %v19751_v19  ;;  %v19755_v21 = vpack.c.bf16 %v148_v10, %v145_v7  ;;  %v19769_v25 = vsub.f32 %v12808_v6, %v148_v10  ;;  %17024 = vmatpush3.bf16.msra.mxu0 %v19743_v14  ;;  %v160_v27 = vand.u32 4294901760, %v12812_v12  ;;  %v261_v28 = vand.u32 4294901760, %v19757_v22 }
  0x3f   :  { %23644 = vst [vmem:[#allocation16_spill] sm:$0xff] %v19753_v20  ;;  %98 = vst.msk [vmem:[#allocation2 + $0x9] sm:$0xff] %vm96_vm1, %v19749_v18  ;;  %v19774_v29 = vpack.c.bf16 %v154_v16, %v151_v15  ;;  %v255_v30 = vsub.f32 %v19747_v17, %v254_v24  ;;  %v19779_v31 = vsub.f32 %v12809_v8, %v151_v15  ;;  %v268_v33 = vand.u32 4294901760, %v19761_v23 }
  0x40   :  { %99 = vst.msk [vmem:[#allocation2 + $0x19] sm:$0xff] %vm96_vm1, %v19751_v19  ;;  %100 = vst.msk [vmem:[#allocation2 + $0x21] sm:$0xff] %vm96_vm1, %v19753_v20  ;;  %17026 = vmatprep.subr.bf16.mxu0 %v19755_v21  ;;  %v262_v32 = vsub.f32 %v19757_v22, %v261_v28  ;;  %v275_v34 = vand.u32 4294901760, %v19769_v25  ;;  %v19786_v35 = vsub.f32 %v12810_v9, %v154_v16  ;;  %vm2963_vm2 = vcmask 64512  }
  0x41   :  { %v19789_v36 = vpack.c.bf16 %v160_v27, %v157_v26  ;;  %v19791_v38 = vsub.f32 %v12811_v11, %v157_v26  ;;  %v256_v40 = vand.u32 4294901760, %v255_v30  ;;  %v282_v43 = vand.u32 4294901760, %v19779_v31 }
  0x42   :  { %17028 = vmatpush3.bf16.msra.mxu0 %v19755_v21  ;;  %v263_v41 = vand.u32 4294901760, %v262_v32  ;;  %v269_v47 = vsub.f32 %v19761_v23, %v268_v33  ;;  %v19802_v48 = vsub.f32 %v12812_v12, %v160_v27  ;;  %v276_v51 = vsub.f32 %v19769_v25, %v275_v34 }
  0x43   :  { %17030 = vmatprep.subr.bf16.mxu0 %v19774_v29  ;;  %v289_v52 = vand.u32 4294901760, %v19786_v35  ;;  %v296_v56 = vand.u32 4294901760, %v19791_v38  ;;  %v283_v59 = vsub.f32 %v19779_v31, %v282_v43  ;;  %vm19583_vm3 = vmmov 0  }
  0x44   :  { %v113_v37 = vld [vmem:[#allocation2 + $0x1] sm:$0xff]  ;;  %v17037_v57 = vpack.c.bf16 %v263_v41, %v256_v40  ;;  %v303_v63 = vand.u32 4294901760, %v19802_v48  ;;  %v270_v3 = vand.u32 4294901760, %v269_v47  ;;  %v277_v4 = vand.u32 4294901760, %v276_v51 }
  0x45   :  { %v127_v39 = vsel %vm96_vm1, %v113_v37, 0  ;;  %v290_v5 = vsub.f32 %v19786_v35, %v289_v52  ;;  %v297_v10 = vsub.f32 %v19791_v38, %v296_v56  ;;  %v284_v12 = vand.u32 4294901760, %v283_v59 }
  0x46   :  { %v114_v42 = vld [vmem:[#allocation2 + $0x9] sm:$0xff]  ;;  %v19796_v45 = vand.u32 4294901760, %v127_v39  ;;  %17032 = vmatpush3.bf16.msra.mxu0 %v19774_v29  ;;  %v17041_v27 = vpack.c.bf16 %v277_v4, %v270_v3  ;;  %v304_v32 = vsub.f32 %v19802_v48, %v303_v63  ;;  %v17053_v47 = vpack.c.bf16 %v19757_v22, %v19747_v17  ;;  %v112_v4 = vld [vmem:[%s23495_s1 + $0x38] sm:$0xff] }
  0x47   :  { %v115_v44 = vld [vmem:[#allocation2 + $0x19] sm:$0xff]  ;;  %v130_v46 = vsel %vm96_vm1, %v114_v42, 0  ;;  %v116_v49 = vld [vmem:[#allocation2 + $0x21] sm:$0xff]  ;;  %17034 = vmatprep.subr.bf16.mxu0 %v19789_v36  ;;  %v291_v30 = vand.u32 4294901760, %v290_v5  ;;  %v298_v42 = vand.u32 4294901760, %v297_v10  ;;  %v17061_v51 = vpack.c.bf16 %v19786_v35, %v19779_v31  ;;  %v107_v35 = vld [vmem:[%s23495_s1 + $0x10] sm:$0xff] }
  0x48   :  { %v19804_v50 = vand.u32 4294901760, %v130_v46  ;;  %v133_v53 = vsel %vm96_vm1, %v115_v44, 0  ;;  %v19813_v54 = vsub.f32 %v127_v39, %v19796_v45  ;;  %v136_v60 = vsel %vm96_vm1, %v116_v49, 0  ;;  %v106_v31 = vld [vmem:[%s23495_s1 + $0x8] sm:$0xff]  ;;  %v111_v3 = vld [vmem:[%s23495_s1 + $0x30] sm:$0xff] }
  0x49   :  { %v19815_v55 = vand.u32 4294901760, %v133_v53  ;;  %v19831_v1 = vand.u32 4294901760, %v136_v60  ;;  %v17045_v41 = vpack.c.bf16 %v291_v30, %v284_v12  ;;  %v305_v44 = vand.u32 4294901760, %v304_v32 }
  0x4a   :  { %v19820_v58 = vsub.f32 %v130_v46, %v19804_v50  ;;  %v213_v61 = vand.u32 4294901760, %v19813_v54  ;;  %17036 = vmatpush3.bf16.msra.mxu0 %v19789_v36  ;;  %v17057_v49 = vpack.c.bf16 %v19769_v25, %v19761_v23  ;;  %v17093_v17 = vpack.c.bf16 %v289_v52, %v282_v43  ;;  %v101_v23 = vld [vmem:[#allocation2] sm:$0xff]  ;;  %v108_v43 = vld [vmem:[%s23495_s1 + $0x18] sm:$0xff] }
  0x4b   :  { %v19828_v62 = vsub.f32 %v133_v53, %v19815_v55  ;;  %v19843_v8 = vsub.f32 %v136_v60, %v19831_v1  ;;  %17038 = vmatprep.subr.bf16.mxu0 %v17037_v57  ;;  %v17049_v46 = vpack.c.bf16 %v305_v44, %v298_v42  ;;  %v17065_v53 = vpack.c.bf16 %v19802_v48, %v19791_v38  ;;  %v102_v38 = vld [vmem:[#allocation2 + $0x8] sm:$0xff]  ;;  %v103_v48 = vld [vmem:[#allocation2 + $0x18] sm:$0xff] }
  0x4c   :  { %v223_v2 = vand.u32 4294901760, %v19820_v58  ;;  %v214_v6 = vsub.f32 %v19813_v54, %v213_v61  ;;  %v17097_v22 = vpack.c.bf16 %v303_v63, %v296_v56  ;;  %v826_v60 = vand.u32 4294901760, %v108_v43  ;;  %v110_v63 = vld [vmem:[%s23495_s1 + $0x28] sm:$0xff] }
  0x4d   :  { %v233_v7 = vand.u32 4294901760, %v19828_v62  ;;  %v243_v16 = vand.u32 4294901760, %v19843_v8  ;;  %v832_v12 = vand.u32 4294901760, %v110_v63 }
  0x4e   :  { %v224_v9 = vsub.f32 %v19820_v58, %v223_v2  ;;  %v215_v11 = vand.u32 4294901760, %v214_v6 }
  0x4f   :  { %v234_v15 = vsub.f32 %v19828_v62, %v233_v7  ;;  %v244_v39 = vsub.f32 %v19843_v8, %v243_v16 }
  0x50   :  { %v225_v26 = vand.u32 4294901760, %v224_v9  ;;  %14277 = vmatprep.mubr.f32.mxu0 %v215_v11 }
  0x51   :  { %v235_v37 = vand.u32 4294901760, %v234_v15  ;;  %v245_v40 = vand.u32 4294901760, %v244_v39 }
  0x52   :  { %14278 = vmatmul.mubr.f32.vlgmr.msra.gmra.mrb[0].mxu0 %v225_v26  ;;  %v838_v26 = vand.u32 4294901760, %v112_v4 }
  0x53   :  { %17040 = vmatpush3.bf16.msra.mxu0 %v17037_v57  ;;  %14280 = vmatprep.mubr.f32.mxu0 %v235_v37  ;;  %v17085_v57 = vpack.c.bf16 %v261_v28, %v254_v24  ;;  %v805_v24 = vsel %vm96_vm1, %v101_v23, 0  ;;  %v105_v28 = vld [vmem:[%s23495_s1] sm:$0xff] }
  0x54   :  { %17042 = vmatprep.subr.bf16.mxu0 %v17041_v27  ;;  %v19911_v25 = vand.u32 4294901760, %v805_v24 }
  0x56   :  { %14281 = vmatmul.mubr.f32.gmra.mrb[2].mxu0 %v245_v40 }
  0x57   :  { %17044 = vmatpush3.bf16.msra.mxu0 %v17041_v27  ;;  %14299 = vmatprep.mubr.f32.mxu0 %v19796_v45 }
  0x58   :  { %17046 = vmatprep.subr.bf16.mxu0 %v17045_v41 }
  0x5b   :  { %17048 = vmatpush3.bf16.msra.mxu0 %v17045_v41  ;;  %v19988_v41 = vsub.f32 %v110_v63, %v832_v12 }
  0x5c   :  { %17050 = vmatprep.subr.bf16.mxu0 %v17049_v46 }
  0x5f   :  { %17052 = vmatpush3.bf16.msra.mxu0 %v17049_v46 }
  0x60   :  { %17054 = vmatprep.subr.bf16.mxu0 %v17053_v47 }
  0x62   :  { %14300 = vmatmul.mubr.f32.vlgmr.msra.gmra.mrb[0].mxu0 %v19804_v50 }
  0x63   :  { %17056 = vmatpush3.bf16.msra.mxu0 %v17053_v47  ;;  %14302 = vmatprep.mubr.f32.mxu0 %v19815_v55 }
  0x64   :  { %17058 = vmatprep.subr.bf16.mxu0 %v17057_v49 }
  0x66   :  { %14303 = vmatmul.mubr.f32.gmra.mrb[2].mxu0 %v19831_v1 }
  0x67   :  { %17060 = vmatpush3.bf16.msra.mxu0 %v17057_v49  ;;  %14321 = vmatprep.mubr.f32.mxu0 %v19813_v54  ;;  %v17089_v54 = vpack.c.bf16 %v275_v34, %v268_v33  ;;  %v817_v33 = vand.u32 4294901760, %v105_v28  ;;  %v820_v34 = vand.u32 4294901760, %v106_v31 }
  0x68   :  { %17062 = vmatprep.subr.bf16.mxu0 %v17061_v51 }
  0x69   :  { %v19938_v56 = vsub.f32 %v105_v28, %v817_v33  ;;  %v19942_v59 = vpack.c.bf16 %v820_v34, %v817_v33 }
  0x6b   :  { %17064 = vmatpush3.bf16.msra.mxu0 %v17061_v51 }
  0x6c   :  { %17066 = vmatprep.subr.bf16.mxu0 %v17065_v53 }
  0x6f   :  { %17068 = vmatpush3.bf16.msra.mxu0 %v17065_v53 }
  0x70   :  { %17070 = vmatprep.subr.bf16.mxu0 %v19743_v14 }
  0x72   :  { %14322 = vmatmul.mubr.f32.vlgmr.msra.gmra.mrb[0].mxu0 %v19820_v58  ;;  %v808_v58 = vsel %vm96_vm1, %v102_v38, 0 }
  0x73   :  { %17072 = vmatpush3.bf16.msra.mxu0 %v19743_v14  ;;  %14324 = vmatprep.mubr.f32.mxu0 %v19828_v62  ;;  %v104_v62 = vld [vmem:[#allocation2 + $0x20] sm:$0xff]  ;;  %v19956_v5 = vand.u32 4294901760, %v808_v58 }
  0x74   :  { %17074 = vmatprep.subr.bf16.mxu0 %v19755_v21  ;;  %v814_v10 = vsel %vm96_vm1, %v104_v62, 0 }
  0x75   :  { %v19976_v27 = vsub.f32 %v808_v58, %v19956_v5  ;;  %v19981_v37 = vand.u32 4294901760, %v814_v10 }
  0x76   :  { %14325 = vmatmul.mubr.f32.gmra.mrb[2].mxu0 %v19843_v8  ;;  %v932_v8 = vand.u32 4294901760, %v19938_v56 }
  0x77   :  { %17076 = vmatpush3.bf16.msra.mxu0 %v19755_v21  ;;  %14343 = vmatprep.mubr.f32.mxu0 %v213_v61  ;;  %v19944_v61 = vsub.f32 %v106_v31, %v820_v34  ;;  %v901_v47 = vand.u32 4294901760, %v19976_v27  ;;  %v20008_v51 = vsub.f32 %v814_v10, %v19981_v37 }
  0x78   :  { %17078 = vmatprep.subr.bf16.mxu0 %v19774_v29  ;;  %v933_v40 = vsub.f32 %v19938_v56, %v932_v8 }
  0x79   :  { %v939_v15 = vand.u32 4294901760, %v19944_v61  ;;  %v902_v28 = vsub.f32 %v19976_v27, %v901_v47  ;;  %v921_v31 = vand.u32 4294901760, %v20008_v51 }
  0x7a   :  { %v934_v53 = vand.u32 4294901760, %v933_v40 }
  0x7b   :  { %17080 = vmatpush3.bf16.msra.mxu0 %v19774_v29  ;;  %v940_v44 = vsub.f32 %v19944_v61, %v939_v15  ;;  %v903_v58 = vand.u32 4294901760, %v902_v28  ;;  %v20170_v28 = vld [vmem:[%s23504_s10 + $0x40] sm:$0xff] }
  0x7c   :  { %17082 = vmatprep.subr.bf16.mxu0 %v19789_v36 }
  0x7f   :  { %17084 = vmatpush3.bf16.msra.mxu0 %v19789_v36 }
  0x80   :  { %17086 = vmatprep.subr.bf16.mxu0 %v17085_v57 }
  0x82   :  { %14344 = vmatmul.mubr.f32.vlgmr.msra.gmra.mrb[0].mxu0 %v223_v2 }
  0x83   :  { %17088 = vmatpush3.bf16.msra.mxu0 %v17085_v57  ;;  %14346 = vmatprep.mubr.f32.mxu0 %v233_v7 }
  0x84   :  { %17090 = vmatprep.subr.bf16.mxu0 %v17089_v54 }
  0x86   :  { %14347 = vmatmul.mubr.f32.gmra.mrb[2].mxu0 %v243_v16  ;;  %v19972_v16 = vsub.f32 %v108_v43, %v826_v60 }
  0x87   :  { %17092 = vmatpush3.bf16.msra.mxu0 %v17089_v54  ;;  %14365 = vmatprep.mubr.f32.mxu0 %v19796_v45  ;;  %v967_v54 = vand.u32 4294901760, %v19988_v41 }
  0x88   :  { %17094 = vmatprep.subr.bf16.mxu0 %v17093_v17 }
  0x8b   :  { %17096 = vmatpush3.bf16.msra.mxu0 %v17093_v17 }
  0x8c   :  { %17098 = vmatprep.subr.bf16.mxu0 %v17097_v22 }
  0x8f   :  { %17100 = vmatpush3.bf16.msra.mxu0 %v17097_v22 }
  0x90   :  { %17102 = vmatprep.subr.bf16.mxu0 %v19743_v14 }
  0x92   :  { %14366 = vmatmul.mubr.f32.vlgmr.msra.gmra.mrb[0].mxu0 %v19804_v50 }
  0x93   :  { %17104 = vmatpush3.bf16.msra.mxu0 %v19743_v14  ;;  %14368 = vmatprep.mubr.f32.mxu0 %v19815_v55  ;;  %v19924_v14 = vsub.f32 %v805_v24, %v19911_v25  ;;  %v20020_v24 = vsub.f32 %v112_v4, %v838_v26 }
  0x94   :  { %17106 = vmatprep.subr.bf16.mxu0 %v19755_v21 }
  0x95   :  { %v891_v52 = vand.u32 4294901760, %v19924_v14 }
  0x96   :  { %14369 = vmatmul.mubr.f32.gmra.mrb[2].mxu0 %v19831_v1 }
  0x97   :  { %17108 = vmatpush3.bf16.msra.mxu0 %v19755_v21  ;;  %14387 = vmatprep.mubr.f32.mxu0 %v19796_v45  ;;  %v823_v21 = vand.u32 4294901760, %v107_v35  ;;  %v109_v45 = vld [vmem:[%s23495_s1 + $0x20] sm:$0xff]  ;;  %v892_v7 = vsub.f32 %v19924_v14, %v891_v52 }
  0x98   :  { %17110 = vmatprep.subr.bf16.mxu0 %v19774_v29  ;;  %v829_v2 = vand.u32 4294901760, %v109_v45 }
  0x99   :  { %v19958_v6 = vsub.f32 %v107_v35, %v823_v21  ;;  %v19969_v11 = vpack.c.bf16 %v826_v60, %v823_v21  ;;  %v893_v39 = vand.u32 4294901760, %v892_v7  ;;  %v968_v35 = vsub.f32 %v19988_v41, %v967_v54 }
  0x9a   :  { %v19979_v32 = vsub.f32 %v109_v45, %v829_v2  ;;  %v19994_v42 = vpack.c.bf16 %v832_v12, %v829_v2  ;;  %v981_v45 = vand.u32 4294901760, %v20020_v24  ;;  %v922_v60 = vsub.f32 %v20008_v51, %v921_v31 }
  0x9b   :  { %17112 = vmatpush3.bf16.msra.mxu0 %v19774_v29  ;;  %v811_v29 = vsel %vm96_vm1, %v103_v48, 0  ;;  %v946_v30 = vand.u32 4294901760, %v19958_v6  ;;  %v969_v2 = vand.u32 4294901760, %v968_v35  ;;  %v17153_v40 = vpack.c.bf16 %v19972_v16, %v19958_v6 }
  0x9c   :  { %17114 = vmatprep.subr.bf16.mxu0 %v19789_v36  ;;  %v19965_v9 = vand.u32 4294901760, %v811_v29  ;;  %v960_v57 = vand.u32 4294901760, %v19979_v32  ;;  %v982_v4 = vsub.f32 %v20020_v24, %v981_v45  ;;  %v923_v7 = vand.u32 4294901760, %v922_v60 }
  0x9d   :  { %v947_v49 = vsub.f32 %v19958_v6, %v946_v30  ;;  %v20106_v6 = vld [vmem:[%s23504_s10 + $0x10] sm:$0xff]  ;;  %v23510_v35 = vand.u32 4294901760, %v20170_v28 }
  0x9e   :  { %v961_v34 = vsub.f32 %v19979_v32, %v960_v57 }
  0x9f   :  { %17116 = vmatpush3.bf16.msra.mxu0 %v19789_v36  ;;  %v835_v36 = vand.u32 4294901760, %v111_v3  ;;  %v948_v33 = vand.u32 4294901760, %v947_v49 }
  0xa0   :  { %17118 = vmatprep.subr.bf16.mxu0 %v19942_v59 }
  0xa1   :  { %v20000_v46 = vpack.c.bf16 %v838_v26, %v835_v36  ;;  %v20018_v23 = vsub.f32 %v111_v3, %v835_v36  ;;  %v983_v36 = vand.u32 4294901760, %v982_v4 }
  0xa2   :  { %14388 = vmatmul.mubr.f32.vlgmr.msra.gmra.mrb[0].mxu0 %v19804_v50  ;;  %v19991_v50 = vsub.f32 %v811_v29, %v19965_v9  ;;  %v962_v29 = vand.u32 4294901760, %v961_v34 }
  0xa3   :  { %17120 = vmatpush3.bf16.msra.mxu0 %v19942_v59  ;;  %14390 = vmatprep.mubr.f32.mxu0 %v19815_v55  ;;  %v953_v55 = vand.u32 4294901760, %v19972_v16  ;;  %v974_v21 = vand.u32 4294901760, %v20018_v23  ;;  %v17161_v49 = vpack.c.bf16 %v20020_v24, %v20018_v23 }
  0xa4   :  { %17122 = vmatprep.subr.bf16.mxu0 %v19969_v11  ;;  %v911_v17 = vand.u32 4294901760, %v19991_v50  ;;  %v17141_v10 = vpack.c.bf16 %v969_v2, %v962_v29  ;;  %v1483_v29 = vld [vmem:[#allocation2 + $0xa] sm:$0xff] }
  0xa5   :  { %v954_v22 = vsub.f32 %v19972_v16, %v953_v55  ;;  %v975_v3 = vsub.f32 %v20018_v23, %v974_v21  ;;  %v20114_v16 = vld [vmem:[%s23504_s10 + $0x18] sm:$0xff]  ;;  %v1499_v4 = vsel %vm96_vm1, %v1483_v29, 0 }
  0xa6   :  { %14391 = vmatmul.mubr.f32.gmra.mrb[2].mxu0 %v19831_v1  ;;  %v941_v1 = vand.u32 4294901760, %v940_v44  ;;  %v912_v38 = vsub.f32 %v19991_v50, %v911_v17  ;;  %v17157_v44 = vpack.c.bf16 %v19988_v41, %v19979_v32  ;;  %v20125_v32 = vld [vmem:[%s23504_s10 + $0x28] sm:$0xff]  ;;  %v17193_v41 = vpack.c.bf16 %v981_v45, %v974_v21 }
  0xa7   :  { %17124 = vmatpush3.bf16.msra.mxu0 %v19969_v11  ;;  %14409 = vmatprep.mubr.f32.mxu0 %v893_v39  ;;  %v955_v48 = vand.u32 4294901760, %v954_v22  ;;  %v976_v12 = vand.u32 4294901760, %v975_v3  ;;  %v17149_v39 = vpack.c.bf16 %v19944_v61, %v19938_v56  ;;  %v20096_v56 = vld [vmem:[%s23504_s10] sm:$0xff]  ;;  %v20101_v61 = vld [vmem:[%s23504_s10 + $0x8] sm:$0xff] }
  0xa8   :  { %17126 = vmatprep.subr.bf16.mxu0 %v19994_v42  ;;  %v17133_v43 = vpack.c.bf16 %v941_v1, %v934_v53  ;;  %v913_v62 = vand.u32 4294901760, %v912_v38  ;;  %v17181_v53 = vpack.c.bf16 %v939_v15, %v932_v8  ;;  %v23518_v8 = vand.u32 4294901760, %v20096_v56  ;;  %v1482_v1 = vld [vmem:[#allocation2 + $0x2] sm:$0xff] }
  0xa9   :  { %v17137_v63 = vpack.c.bf16 %v955_v48, %v948_v33  ;;  %v17145_v26 = vpack.c.bf16 %v983_v36, %v976_v12  ;;  %v23517_v15 = vand.u32 4294901760, %v20101_v61  ;;  %v1496_v33 = vsel %vm96_vm1, %v1482_v1, 0  ;;  %v12813_v48 = vld [vmem:[%s23495_s1 + $0x80] sm:$0xff]  ;;  %v12814_v21 = vld [vmem:[%s23495_s1 + $0x88] sm:$0xff] }
  0xaa   :  { %v1511_v60 = vand.u32 4294901760, %v12814_v21 }
  0xab   :  { %17128 = vmatpush3.bf16.msra.mxu0 %v19994_v42 }
  0xac   :  { %17130 = vmatprep.subr.bf16.mxu0 %v20000_v46  ;;  %v20226_v2 = vsub.f32 %v12814_v21, %v1511_v60 }
  0xaf   :  { %17132 = vmatpush3.bf16.msra.mxu0 %v20000_v46 }
  0xb0   :  { %17134 = vmatprep.subr.bf16.mxu0 %v17133_v43 }
  0xb2   :  { %14410 = vmatmul.mubr.f32.vlgmr.msra.gmra.mrb[0].mxu0 %v903_v58  ;;  %v1508_v58 = vand.u32 4294901760, %v12813_v48 }
  0xb3   :  { %17136 = vmatpush3.bf16.msra.mxu0 %v17133_v43  ;;  %14412 = vmatprep.mubr.f32.mxu0 %v913_v62  ;;  %v20192_v43 = vand.u32 4294901760, %v1496_v33  ;;  %v12815_v62 = vld [vmem:[%s23495_s1 + $0x90] sm:$0xff] }
  0xb4   :  { %17138 = vmatprep.subr.bf16.mxu0 %v17137_v63 }
  0xb5   :  { %v20213_v45 = vsub.f32 %v1496_v33, %v20192_v43 }
  0xb6   :  { %14413 = vmatmul.mubr.f32.gmra.mrb[2].mxu0 %v923_v7  ;;  %v20232_v7 = vpack.c.bf16 %v1511_v60, %v1508_v58 }
  0xb7   :  { %17140 = vmatpush3.bf16.msra.mxu0 %v17137_v63  ;;  %14431 = vmatprep.mubr.f32.mxu0 %v19911_v25  ;;  %v1484_v63 = vld [vmem:[#allocation2 + $0x1a] sm:$0xff]  ;;  %v1582_v3 = vand.u32 4294901760, %v20213_v45 }
  0xb8   :  { %17142 = vmatprep.subr.bf16.mxu0 %v17141_v10  ;;  %v1502_v36 = vsel %vm96_vm1, %v1484_v63, 0 }
  0xb9   :  { %v20260_v33 = vand.u32 4294901760, %v1502_v36 }
  0xbb   :  { %17144 = vmatpush3.bf16.msra.mxu0 %v17141_v10  ;;  %v1514_v10 = vand.u32 4294901760, %v12815_v62 }
  0xbc   :  { %17146 = vmatprep.subr.bf16.mxu0 %v17145_v26 }
  0xbf   :  { %17148 = vmatpush3.bf16.msra.mxu0 %v17145_v26  ;;  %v1485_v26 = vld [vmem:[#allocation2 + $0x22] sm:$0xff] }
  0xc0   :  { %17150 = vmatprep.subr.bf16.mxu0 %v17149_v39 }
  0xc2   :  { %14432 = vmatmul.mubr.f32.vlgmr.msra.gmra.mrb[0].mxu0 %v19956_v5 }
  0xc3   :  { %17152 = vmatpush3.bf16.msra.mxu0 %v17149_v39  ;;  %14434 = vmatprep.mubr.f32.mxu0 %v19965_v9  ;;  %v12817_v39 = vld [vmem:[%s23495_s1 + $0xa0] sm:$0xff] }
  0xc4   :  { %17154 = vmatprep.subr.bf16.mxu0 %v17153_v40 }
  0xc6   :  { %14435 = vmatmul.mubr.f32.gmra.mrb[2].mxu0 %v19981_v37 }
  0xc7   :  { %17156 = vmatpush3.bf16.msra.mxu0 %v17153_v40  ;;  %14453 = vmatprep.mubr.f32.mxu0 %v19924_v14  ;;  %v17185_v14 = vpack.c.bf16 %v953_v55, %v946_v30  ;;  %v20120_v30 = vld [vmem:[%s23504_s10 + $0x20] sm:$0xff]  ;;  %v20136_v55 = vpack.c.bf16 %v23517_v15, %v23518_v8  ;;  %v12819_v40 = vld [vmem:[%s23495_s1 + $0xb0] sm:$0xff] }
  0xc8   :  { %17158 = vmatprep.subr.bf16.mxu0 %v17157_v44  ;;  %v1526_v29 = vand.u32 4294901760, %v12819_v40 }
  0xc9   :  { %17310 = vmatprep.subr.bf16.mxu1 %v20136_v55 }
  0xca   :  { %17312 = vmatpush3.bf16.msra.mxu1 %v20136_v55 }
  0xcb   :  { %17160 = vmatpush3.bf16.msra.mxu0 %v17157_v44  ;;  %v12820_v44 = vld [vmem:[%s23495_s1 + $0xb8] sm:$0xff] }
  0xcc   :  { %17162 = vmatprep.subr.bf16.mxu0 %v17161_v49 }
  0xcf   :  { %17164 = vmatpush3.bf16.msra.mxu0 %v17161_v49 }
  0xd0   :  { %17166 = vmatprep.subr.bf16.mxu0 %v19942_v59 }
  0xd2   :  { %14454 = vmatmul.mubr.f32.vlgmr.msra.gmra.mrb[0].mxu0 %v19976_v27  ;;  %v23516_v27 = vand.u32 4294901760, %v20106_v6 }
  0xd3   :  { %17168 = vmatpush3.bf16.msra.mxu0 %v19942_v59  ;;  %14456 = vmatprep.mubr.f32.mxu0 %v19991_v50  ;;  %v23515_v50 = vand.u32 4294901760, %v20114_v16 }
  0xd4   :  { %17170 = vmatprep.subr.bf16.mxu0 %v19969_v11 }
  0xd6   :  { %14457 = vmatmul.mubr.f32.gmra.mrb[2].mxu0 %v20008_v51  ;;  %v23513_v51 = vand.u32 4294901760, %v20125_v32 }
  0xd7   :  { %17172 = vmatpush3.bf16.msra.mxu0 %v19969_v11  ;;  %14475 = vmatprep.mubr.f32.mxu0 %v891_v52  ;;  %v17189_v52 = vpack.c.bf16 %v967_v54, %v960_v57  ;;  %v20144_v57 = vpack.c.bf16 %v23515_v50, %v23516_v27  ;;  %v20149_v54 = vld [vmem:[%s23504_s10 + $0x30] sm:$0xff] }
  0xd8   :  { %17174 = vmatprep.subr.bf16.mxu0 %v19994_v42  ;;  %v23512_v23 = vand.u32 4294901760, %v20149_v54 }
  0xd9   :  { %17314 = vmatprep.subr.bf16.mxu1 %v20144_v57 }
  0xda   :  { %17316 = vmatpush3.bf16.msra.mxu1 %v20144_v57 }
  0xdb   :  { %17176 = vmatpush3.bf16.msra.mxu0 %v19994_v42 }
  0xdc   :  { %17178 = vmatprep.subr.bf16.mxu0 %v20000_v46 }
  0xdf   :  { %17180 = vmatpush3.bf16.msra.mxu0 %v20000_v46 }
  0xe0   :  { %17182 = vmatprep.subr.bf16.mxu0 %v17181_v53 }
  0xe2   :  { %14476 = vmatmul.mubr.f32.vlgmr.msra.gmra.mrb[0].mxu0 %v901_v47  ;;  %v23514_v47 = vand.u32 4294901760, %v20120_v30 }
  0xe3   :  { %17184 = vmatpush3.bf16.msra.mxu0 %v17181_v53  ;;  %14478 = vmatprep.mubr.f32.mxu0 %v911_v17  ;;  %v20154_v17 = vld [vmem:[%s23504_s10 + $0x38] sm:$0xff]  ;;  %v1630_v53 = vand.u32 4294901760, %v20226_v2 }
  0xe4   :  { %17186 = vmatprep.subr.bf16.mxu0 %v17185_v14  ;;  %v20163_v22 = vpack.c.bf16 %v23513_v51, %v23514_v47  ;;  %v23511_v24 = vand.u32 4294901760, %v20154_v17 }
  0xe6   :  { %14479 = vmatmul.mubr.f32.gmra.mrb[2].mxu0 %v921_v31  ;;  %v20175_v31 = vld [vmem:[%s23504_s10 + $0x48] sm:$0xff]  ;;  %17318 = vmatprep.subr.bf16.mxu1 %v20163_v22  ;;  %v20185_v34 = vpack.c.bf16 %v23511_v24, %v23512_v23 }
  0xe7   :  { %17188 = vmatpush3.bf16.msra.mxu0 %v17185_v14  ;;  %14497 = vmatprep.mubr.f32.mxu0 %v19911_v25  ;;  %v23509_v38 = vand.u32 4294901760, %v20175_v31  ;;  %v20250_v14 = vand.u32 4294901760, %v1499_v4 }
  0xe8   :  { %17190 = vmatprep.subr.bf16.mxu0 %v17189_v52  ;;  %17320 = vmatpush3.bf16.msra.mxu1 %v20163_v22 }
  0xe9   :  { %17322 = vmatprep.subr.bf16.mxu1 %v20185_v34  ;;  %v20274_v63 = vsub.f32 %v1499_v4, %v20250_v14 }
  0xeb   :  { %17192 = vmatpush3.bf16.msra.mxu0 %v17189_v52  ;;  %v20252_v52 = vsub.f32 %v12815_v62, %v1514_v10  ;;  %v1529_v62 = vand.u32 4294901760, %v12820_v44 }
  0xec   :  { %17194 = vmatprep.subr.bf16.mxu0 %v17193_v41  ;;  %17324 = vmatpush3.bf16.msra.mxu1 %v20185_v34 }
  0xed   :  { %v20292_v23 = vpack.c.bf16 %v1529_v62, %v1526_v29 }
  0xef   :  { %17196 = vmatpush3.bf16.msra.mxu0 %v17193_v41  ;;  %v1583_v41 = vsub.f32 %v20213_v45, %v1582_v3 }
  0xf0   :  { %17198 = vmatprep.subr.bf16.mxu0 %v19942_v59 }
  0xf2   :  { %14498 = vmatmul.mubr.f32.vlgmr.msra.gmra.mrb[0].mxu0 %v19956_v5 }
  0xf3   :  { %17200 = vmatpush3.bf16.msra.mxu0 %v19942_v59  ;;  %14500 = vmatprep.mubr.f32.mxu0 %v19965_v9  ;;  %v20207_v59 = vpack.c.bf16 %v23509_v38, %v23510_v35  ;;  %v20283_v38 = vsub.f32 %v1502_v36, %v20260_v33 }
  0xf4   :  { %17202 = vmatprep.subr.bf16.mxu0 %v19969_v11 }
  0xf5   :  { %17326 = vmatprep.subr.bf16.mxu1 %v20207_v59 }
  0xf6   :  { %14501 = vmatmul.mubr.f32.gmra.mrb[2].mxu0 %v19981_v37  ;;  %17328 = vmatpush3.bf16.msra.mxu1 %v20207_v59 }
  0xf7   :  { %17204 = vmatpush3.bf16.msra.mxu0 %v19969_v11  ;;  %14519 = vmatprep.mubr.f32.mxu0 %v19911_v25  ;;  %v12816_v11 = vld [vmem:[%s23495_s1 + $0x98] sm:$0xff]  ;;  %v20224_v25 = vsub.f32 %v12813_v48, %v1508_v58  ;;  %v1505_v48 = vsel %vm96_vm1, %v1485_v26, 0  ;;  %v1520_v58 = vand.u32 4294901760, %v12817_v39 }
  0xf8   :  { %17206 = vmatprep.subr.bf16.mxu0 %v19994_v42  ;;  %v1517_v12 = vand.u32 4294901760, %v12816_v11  ;;  %v20276_v26 = vand.u32 4294901760, %v1505_v48 }
  0xf9   :  { %v1623_v49 = vand.u32 4294901760, %v20224_v25  ;;  %v20288_v4 = vsub.f32 %v12817_v39, %v1520_v58 }
  0xfa   :  { %v20258_v1 = vsub.f32 %v12816_v11, %v1517_v12  ;;  %v20264_v21 = vpack.c.bf16 %v1517_v12, %v1514_v10  ;;  %v1631_v11 = vsub.f32 %v20226_v2, %v1630_v53  ;;  %v1584_v10 = vand.u32 4294901760, %v1583_v41 }
  0xfb   :  { %17208 = vmatpush3.bf16.msra.mxu0 %v19994_v42  ;;  %v12818_v42 = vld [vmem:[%s23495_s1 + $0xa8] sm:$0xff]  ;;  %v1592_v41 = vand.u32 4294901760, %v20274_v63  ;;  %v20297_v51 = vsub.f32 %v1505_v48, %v20276_v26 }
  0xfc   :  { %17210 = vmatprep.subr.bf16.mxu0 %v20000_v46  ;;  %v1523_v60 = vand.u32 4294901760, %v12818_v42  ;;  %v1644_v12 = vand.u32 4294901760, %v20258_v1  ;;  %v1632_v36 = vand.u32 4294901760, %v1631_v11 }
  0xfd   :  { %v1593_v11 = vsub.f32 %v20274_v63, %v1592_v41 }
  0xfe   :  { %v20286_v35 = vpack.c.bf16 %v1523_v60, %v1520_v58  ;;  %v20290_v24 = vsub.f32 %v12818_v42, %v1523_v60  ;;  %v1645_v42 = vsub.f32 %v20258_v1, %v1644_v12  ;;  %v23522_v58 = vand.u32 4294901760, %v20288_v4 }
  0xff   :  { %17212 = vmatpush3.bf16.msra.mxu0 %v20000_v46  ;;  %v1624_v46 = vsub.f32 %v20224_v25, %v1623_v49  ;;  %v20310_v60 = vsub.f32 %v12819_v40, %v1526_v29 }
 0x100   :  { %17214 = vmatprep.subr.bf16.mxu0 %v20232_v7  ;;  %v23521_v48 = vand.u32 4294901760, %v20290_v24  ;;  %v1646_v27 = vand.u32 4294901760, %v1645_v42  ;;  %v1652_v40 = vsub.f32 %v20288_v4, %v23522_v58 }
 0x101   :  { %v1665_v29 = vand.u32 4294901760, %v20310_v60 }
 0x102   :  { %14520 = vmatmul.mubr.f32.vlgmr.msra.gmra.mrb[0].mxu0 %v19956_v5  ;;  %v1637_v5 = vand.u32 4294901760, %v20252_v52  ;;  %v1653_v8 = vand.u32 4294901760, %v1652_v40 }
 0x103   :  { %17216 = vmatpush3.bf16.msra.mxu0 %v20232_v7  ;;  %14522 = vmatprep.mubr.f32.mxu0 %v19965_v9  ;;  %v1625_v9 = vand.u32 4294901760, %v1624_v46  ;;  %v20312_v46 = vsub.f32 %v12820_v44, %v1529_v62  ;;  %v1659_v44 = vsub.f32 %v20290_v24, %v23521_v48  ;;  %v1666_v48 = vsub.f32 %v20310_v60, %v1665_v29 }
 0x104   :  { %17218 = vmatprep.subr.bf16.mxu0 %v20264_v21  ;;  %v1638_v39 = vsub.f32 %v20252_v52, %v1637_v5 }
 0x105   :  { %v17229_v47 = vpack.c.bf16 %v1632_v36, %v1625_v9  ;;  %v1672_v62 = vand.u32 4294901760, %v20312_v46  ;;  %v1594_v9 = vand.u32 4294901760, %v1593_v11  ;;  %v1660_v0 = vand.u32 4294901760, %v1659_v44 }
 0x106   :  { %14523 = vmatmul.mubr.f32.gmra.mrb[2].mxu0 %v19981_v37  ;;  %v23524_v37 = vand.u32 4294901760, %v20283_v38  ;;  %v1639_v50 = vand.u32 4294901760, %v1638_v39 }
 0x107   :  { %17220 = vmatpush3.bf16.msra.mxu0 %v20264_v21  ;;  %14541 = vmatprep.mubr.f32.mxu0 %v1584_v10  ;;  %v23523_v10 = vand.u32 4294901760, %v20297_v51  ;;  %v1673_v58 = vsub.f32 %v20312_v46, %v1672_v62 }
 0x108   :  { %17222 = vmatprep.subr.bf16.mxu0 %v20286_v35  ;;  %v1603_v15 = vsub.f32 %v20283_v38, %v23524_v37  ;;  %v17233_v39 = vpack.c.bf16 %v1646_v27, %v1639_v50  ;;  %v1667_v37 = vand.u32 4294901760, %v1666_v48  ;;  %v17245_v50 = vpack.c.bf16 %v20226_v2, %v20224_v25 }
 0x109   :  { %v1613_v36 = vsub.f32 %v20297_v51, %v23523_v10  ;;  %v17237_v10 = vpack.c.bf16 %v1660_v0, %v1653_v8  ;;  %v1674_v27 = vand.u32 4294901760, %v1673_v58  ;;  %v17253_v0 = vpack.c.bf16 %v20290_v24, %v20288_v4 }
 0x10a   :  { %v1604_v42 = vand.u32 4294901760, %v1603_v15  ;;  %v17257_v8 = vpack.c.bf16 %v20312_v46, %v20310_v60  ;;  %v23646_v25 = vand.u32 4294901760, %v20288_v4  ;;  %v23647_v2 = vand.u32 4294901760, %v20290_v24  ;;  %v2187_v24 = vld [vmem:[%s23504_s10 + $0x50] sm:$0xff] }
 0x10b   :  { %17224 = vmatpush3.bf16.msra.mxu0 %v20286_v35  ;;  %v1614_v11 = vand.u32 4294901760, %v1613_v36  ;;  %v17241_v15 = vpack.c.bf16 %v1674_v27, %v1667_v37  ;;  %v17277_v37 = vpack.c.bf16 %v1630_v53, %v1623_v49  ;;  %v23648_v53 = vand.u32 4294901760, %v20297_v51  ;;  %v2191_v4 = vld [vmem:[%s23504_s10 + $0x70] sm:$0xff] }
 0x10c   :  { %17226 = vmatprep.subr.bf16.mxu0 %v20292_v23  ;;  %v17285_v49 = vpack.c.bf16 %v23647_v2, %v23646_v25  ;;  %v2236_v58 = vand.u32 4294901760, %v2191_v4 }
 0x10f   :  { %17228 = vmatpush3.bf16.msra.mxu0 %v20292_v23 }
 0x110   :  { %17230 = vmatprep.subr.bf16.mxu0 %v17229_v47 }
 0x112   :  { %14542 = vmatmul.mubr.f32.vlgmr.msra.gmra.mrb[0].mxu0 %v1594_v9 }
 0x113   :  { %17232 = vmatpush3.bf16.msra.mxu0 %v17229_v47  ;;  %14544 = vmatprep.mubr.f32.mxu0 %v1604_v42  ;;  %v17249_v47 = vpack.c.bf16 %v20258_v1, %v20252_v52  ;;  %v17289_v52 = vpack.c.bf16 %v1672_v62, %v1665_v29 }
 0x114   :  { %17234 = vmatprep.subr.bf16.mxu0 %v17233_v39 }
 0x116   :  { %14545 = vmatmul.mubr.f32.gmra.mrb[2].mxu0 %v1614_v11 }
 0x117   :  { %17236 = vmatpush3.bf16.msra.mxu0 %v17233_v39  ;;  %14563 = vmatprep.mubr.f32.mxu0 %v20192_v43 }
 0x118   :  { %17238 = vmatprep.subr.bf16.mxu0 %v17237_v10 }
 0x11b   :  { %17240 = vmatpush3.bf16.msra.mxu0 %v17237_v10 }
 0x11c   :  { %17242 = vmatprep.subr.bf16.mxu0 %v17241_v15 }
 0x11f   :  { %17244 = vmatpush3.bf16.msra.mxu0 %v17241_v15 }
 0x120   :  { %17246 = vmatprep.subr.bf16.mxu0 %v17245_v50 }
 0x122   :  { %14564 = vmatmul.mubr.f32.vlgmr.msra.gmra.mrb[0].mxu0 %v20250_v14 }
 0x123   :  { %17248 = vmatpush3.bf16.msra.mxu0 %v17245_v50  ;;  %14566 = vmatprep.mubr.f32.mxu0 %v20260_v33 }
 0x124   :  { %17250 = vmatprep.subr.bf16.mxu0 %v17249_v47 }
 0x126   :  { %14567 = vmatmul.mubr.f32.gmra.mrb[2].mxu0 %v20276_v26 }
 0x127   :  { %17252 = vmatpush3.bf16.msra.mxu0 %v17249_v47  ;;  %14585 = vmatprep.mubr.f32.mxu0 %v20213_v45  ;;  %v17281_v45 = vpack.c.bf16 %v1644_v12, %v1637_v5  ;;  %v23651_v5 = vand.u32 4294901760, %v20101_v61 }
 0x128   :  { %17254 = vmatprep.subr.bf16.mxu0 %v17253_v0 }
 0x129   :  { %v20432_v12 = vsub.f32 %v20101_v61, %v23651_v5 }
 0x12b   :  { %17256 = vmatpush3.bf16.msra.mxu0 %v17253_v0  ;;  %v23535_v60 = vand.u32 4294901760, %v20432_v12 }
 0x12c   :  { %17258 = vmatprep.subr.bf16.mxu0 %v17257_v8 }
 0x12d   :  { %v2325_v10 = vsub.f32 %v20432_v12, %v23535_v60 }
 0x12f   :  { %17260 = vmatpush3.bf16.msra.mxu0 %v17257_v8  ;;  %v2326_v44 = vand.u32 4294901760, %v2325_v10 }
 0x130   :  { %17262 = vmatprep.subr.bf16.mxu0 %v20232_v7 }
 0x132   :  { %14586 = vmatmul.mubr.f32.vlgmr.msra.gmra.mrb[0].mxu0 %v20274_v63  ;;  %v23650_v63 = vand.u32 4294901760, %v20096_v56 }
 0x133   :  { %17264 = vmatpush3.bf16.msra.mxu0 %v20232_v7  ;;  %14588 = vmatprep.mubr.f32.mxu0 %v20283_v38 }
 0x134   :  { %17266 = vmatprep.subr.bf16.mxu0 %v20264_v21 }
 0x136   :  { %14589 = vmatmul.mubr.f32.gmra.mrb[2].mxu0 %v20297_v51  ;;  %v23649_v51 = vmov 0.0  }
 0x137   :  { %17268 = vmatpush3.bf16.msra.mxu0 %v20264_v21  ;;  %14607 = vmatprep.mubr.f32.mxu0 %v1582_v3  ;;  %v23645_v3 = vand.u32 4294901760, %v20283_v38  ;;  %v2224_v38 = vand.u32 4294901760, %v2187_v24 }
 0x138   :  { %17270 = vmatprep.subr.bf16.mxu0 %v20286_v35 }
 0x139   :  { %v20457_v62 = vsub.f32 %v2187_v24, %v2224_v38 }
 0x13b   :  { %17272 = vmatpush3.bf16.msra.mxu0 %v20286_v35  ;;  %v23530_v36 = vand.u32 4294901760, %v20457_v62 }
 0x13c   :  { %17274 = vmatprep.subr.bf16.mxu0 %v20292_v23 }
 0x13d   :  { %v2388_v42 = vsub.f32 %v20457_v62, %v23530_v36  ;;  %v23658_v36 = vand.u32 4294901760, %v20170_v28 }
 0x13f   :  { %17276 = vmatpush3.bf16.msra.mxu0 %v20292_v23  ;;  %v2389_v50 = vand.u32 4294901760, %v2388_v42 }
 0x140   :  { %17278 = vmatprep.subr.bf16.mxu0 %v17277_v37 }
 0x142   :  { %14608 = vmatmul.mubr.f32.vlgmr.msra.gmra.mrb[0].mxu0 %v1592_v41  ;;  %v2192_v41 = vld [vmem:[%s23504_s10 + $0x78] sm:$0xff] }
 0x143   :  { %17280 = vmatpush3.bf16.msra.mxu0 %v17277_v37  ;;  %14610 = vmatprep.mubr.f32.mxu0 %v23645_v3  ;;  %v2239_v48 = vand.u32 4294901760, %v2192_v41  ;;  %v20480_v3 = vsub.f32 %v2191_v4, %v2236_v58 }
 0x144   :  { %17282 = vmatprep.subr.bf16.mxu0 %v17281_v45 }
 0x145   :  { %v20444_v61 = vpack.c.bf16 %v2239_v48, %v2236_v58  ;;  %v20482_v25 = vsub.f32 %v2192_v41, %v2239_v48  ;;  %v23652_v41 = vand.u32 4294901760, %v20106_v6  ;;  %v23653_v48 = vand.u32 4294901760, %v20114_v16 }
 0x146   :  { %14611 = vmatmul.mubr.f32.gmra.mrb[2].mxu0 %v23648_v53  ;;  %v23526_v53 = vand.u32 4294901760, %v20480_v3 }
 0x147   :  { %17284 = vmatpush3.bf16.msra.mxu0 %v17281_v45  ;;  %14629 = vmatprep.mubr.f32.mxu0 %v20192_v43  ;;  %v20513_v4 = vpack.c.bf16 %v20482_v25, %v20480_v3  ;;  %v20518_v58 = vsub.f32 %v20106_v6, %v23652_v41 }
 0x148   :  { %17286 = vmatprep.subr.bf16.mxu0 %v17285_v49 }
 0x149   :  { %v23534_v10 = vand.u32 4294901760, %v20518_v58 }
 0x14b   :  { %17288 = vmatpush3.bf16.msra.mxu0 %v17285_v49 }
 0x14c   :  { %17290 = vmatprep.subr.bf16.mxu0 %v17289_v52 }
 0x14f   :  { %17292 = vmatpush3.bf16.msra.mxu0 %v17289_v52  ;;  %v23525_v52 = vand.u32 4294901760, %v20482_v25 }
 0x150   :  { %17294 = vmatprep.subr.bf16.mxu0 %v20232_v7 }
 0x152   :  { %14630 = vmatmul.mubr.f32.vlgmr.msra.gmra.mrb[0].mxu0 %v20250_v14 }
 0x153   :  { %17296 = vmatpush3.bf16.msra.mxu0 %v20232_v7  ;;  %14632 = vmatprep.mubr.f32.mxu0 %v20260_v33 }
 0x154   :  { %17298 = vmatprep.subr.bf16.mxu0 %v20264_v21 }
 0x156   :  { %14633 = vmatmul.mubr.f32.gmra.mrb[2].mxu0 %v20276_v26 }
 0x157   :  { %17300 = vmatpush3.bf16.msra.mxu0 %v20264_v21  ;;  %14651 = vmatprep.mubr.f32.mxu0 %v20192_v43 }
 0x158   :  { %17302 = vmatprep.subr.bf16.mxu0 %v20286_v35 }
 0x15b   :  { %17304 = vmatpush3.bf16.msra.mxu0 %v20286_v35  ;;  %v2188_v35 = vld [vmem:[%s23504_s10 + $0x58] sm:$0xff] }
 0x15c   :  { %17306 = vmatprep.subr.bf16.mxu0 %v20292_v23  ;;  %v2227_v43 = vand.u32 4294901760, %v2188_v35 }
 0x15e   :  { %v20412_v7 = vpack.c.bf16 %v2227_v43, %v2224_v38  ;;  %v20459_v9 = vsub.f32 %v2188_v35, %v2227_v43  ;;  %v2416_v35 = vsub.f32 %v20480_v3, %v23526_v53  ;;  %v2423_v38 = vsub.f32 %v20482_v25, %v23525_v52 }
 0x15f   :  { %17308 = vmatpush3.bf16.msra.mxu0 %v20292_v23  ;;  %v2189_v23 = vld [vmem:[%s23504_s10 + $0x60] sm:$0xff] }
 0x160   :  { %15113 = vmatprep.subr.mxu0 %v23649_v51  ;;  %17330 = vmatprep.subr.bf16.mxu1 %v20412_v7  ;;  %v2230_v1 = vand.u32 4294901760, %v2189_v23  ;;  %v23529_v39 = vand.u32 4294901760, %v20459_v9 }
 0x161   :  { %17332 = vmatpush3.bf16.msra.mxu1 %v20412_v7 }
 0x162   :  { %14652 = vmatmul.mubr.f32.vlgmr.msra.gmra.mrb[0].mxu0 %v20250_v14  ;;  %v2190_v14 = vld [vmem:[%s23504_s10 + $0x68] sm:$0xff]  ;;  %v2395_v11 = vsub.f32 %v20459_v9, %v23529_v39  ;;  %v20469_v27 = vsub.f32 %v2189_v23, %v2230_v1  ;;  %v2417_v23 = vand.u32 4294901760, %v2416_v35 }
 0x163   :  { %14654 = vmatprep.mubr.f32.mxu0 %v20260_v33  ;;  %v2233_v33 = vand.u32 4294901760, %v2190_v14 }
 0x164   :  { %v2396_v47 = vand.u32 4294901760, %v2395_v11  ;;  %v23528_v0 = vand.u32 4294901760, %v20469_v27  ;;  %v23655_v11 = vand.u32 4294901760, %v20125_v32 }
 0x165   :  { %v20422_v21 = vpack.c.bf16 %v2233_v33, %v2230_v1  ;;  %v20471_v15 = vsub.f32 %v2190_v14, %v2233_v33  ;;  %v2424_v14 = vand.u32 4294901760, %v2423_v38  ;;  %v23657_v38 = vand.u32 4294901760, %v20154_v17 }
 0x166   :  { %14655 = vmatmul.mubr.f32.gmra.mrb[2].mxu0 %v20276_v26  ;;  %v20427_v26 = vsub.f32 %v20096_v56, %v23650_v63  ;;  %v20475_v37 = vpack.c.bf16 %v2396_v47, %v2389_v50  ;;  %v2402_v45 = vsub.f32 %v20469_v27, %v23528_v0  ;;  %v20505_v63 = vpack.c.bf16 %v20459_v9, %v20457_v62 }
 0x167   :  { %17334 = vmatprep.subr.bf16.mxu1 %v20422_v21  ;;  %v23527_v8 = vand.u32 4294901760, %v20471_v15  ;;  %v20497_v1 = vpack.c.bf16 %v2424_v14, %v2417_v23  ;;  %v20509_v5 = vpack.c.bf16 %v20471_v15, %v20469_v27  ;;  %v20535_v50 = vsub.f32 %v20125_v32, %v23655_v11  ;;  %15115 = vmatprep.mubr.msk.f32.mxu0 %vm19583_vm3, %v23649_v51 }
 0x168   :  { %v23536_v56 = vand.u32 4294901760, %v20427_v26  ;;  %17336 = vmatpush3.bf16.msra.mxu1 %v20422_v21  ;;  %v2403_v49 = vand.u32 4294901760, %v2402_v45  ;;  %v20501_v33 = vpack.c.bf16 %v20432_v12, %v20427_v26  ;;  %v20563_v23 = vsub.f32 %v20154_v17, %v23657_v38 }
 0x169   :  { %17338 = vmatprep.subr.bf16.mxu1 %v20444_v61  ;;  %v2409_v2 = vsub.f32 %v20471_v15, %v23527_v8  ;;  %v23531_v32 = vand.u32 4294901760, %v20535_v50 }
 0x16a   :  { %v2318_v46 = vsub.f32 %v20427_v26, %v23536_v56  ;;  %v23661_v20 = vand.u32 4294901760, %v20563_v23 }
 0x16b   :  { %v2410_v24 = vand.u32 4294901760, %v2409_v2  ;;  %v2353_v52 = vsub.f32 %v20535_v50, %v23531_v32  ;;  %v20603_v32 = vsub.f32 %v20170_v28, %v23658_v36 }
 0x16c   :  { %v2319_v40 = vand.u32 4294901760, %v2318_v46  ;;  %17340 = vmatpush3.bf16.msra.mxu1 %v20444_v61  ;;  %v20523_v46 = vsub.f32 %v20114_v16, %v23653_v48  ;;  %v2332_v16 = vsub.f32 %v20518_v58, %v23534_v10  ;;  %v2367_v19 = vsub.f32 %v20563_v23, %v23661_v20 }
 0x16d   :  { %v20495_v43 = vpack.c.bf16 %v2410_v24, %v2403_v49  ;;  %v23656_v24 = vand.u32 4294901760, %v20149_v54  ;;  %v2354_v28 = vand.u32 4294901760, %v2353_v52 }
 0x16e   :  { %v20454_v29 = vpack.c.bf16 %v2326_v44, %v2319_v40  ;;  %v23533_v40 = vand.u32 4294901760, %v20523_v46  ;;  %v23654_v44 = vand.u32 4294901760, %v20120_v30 }
 0x16f   :  { %v20558_v35 = vsub.f32 %v20149_v54, %v23656_v24 }
 0x170   :  { %17342 = vmatprep.subr.bf16.mxu1 %v20454_v29  ;;  %v20530_v42 = vsub.f32 %v20120_v30, %v23654_v44  ;;  %v2339_v47 = vsub.f32 %v20523_v46, %v23533_v40  ;;  %v2333_v44 = vand.u32 4294901760, %v2332_v16 }
 0x172   :  { %v23532_v2 = vand.u32 4294901760, %v20530_v42  ;;  %v2340_v11 = vand.u32 4294901760, %v2339_v47 }
 0x174   :  { %v2346_v38 = vsub.f32 %v20530_v42, %v23532_v2  ;;  %v23659_v2 = vand.u32 4294901760, %v20175_v31  ;;  %v20617_v56 = vpack.c.bf16 %v2340_v11, %v2333_v44  ;;  %v2373_v11 = vand.u32 4294901760, %v20603_v32 }
 0x176   :  { %v20608_v40 = vsub.f32 %v20175_v31, %v23659_v2  ;;  %v2347_v8 = vand.u32 4294901760, %v2346_v38  ;;  %v23660_v31 = vand.u32 4294901760, %v20558_v35 }
 0x178   :  { %v2360_v2 = vsub.f32 %v20558_v35, %v23660_v31  ;;  %v2380_v52 = vand.u32 4294901760, %v20608_v40  ;;  %v20636_v31 = vpack.c.bf16 %v2354_v28, %v2347_v8 }
 0x17a   :  { %v2361_v20 = vand.u32 4294901760, %v2360_v2  ;;  %v20682_v2 = vpack.c.bf16 %v20563_v23, %v20558_v35 }
 0x235   :  { %v20537_v6 = vpop.f32.mrb[0].mxu0 }
 0x236   :  { %v20546_v45 = vand.u32 4294901760, %v20537_v6  ;;  %v20548_v30 = vpop.f32.mrb[1].mxu0 }
 0x237   :  { %v20553_v49 = vand.u32 4294901760, %v20548_v30 }
 0x238   :  { %v20567_v14 = vsub.f32 %v20537_v6, %v20546_v45 }
 0x239   :  { %v20569_v41 = vpop.f32.mrb[2].mxu0  ;;  %v20573_v48 = vsub.f32 %v20548_v30, %v20553_v49 }
 0x23a   :  { %v20576_v54 = vand.u32 4294901760, %v20569_v41  ;;  %v20578_v24 = vpop.f32.mrb[3].mxu0  ;;  %v23537_v17 = vand.u32 4294901760, %v20567_v14 }
 0x23b   :  { %v20588_v53 = vand.u32 4294901760, %v20578_v24  ;;  %v23542_v16 = vand.u32 4294901760, %v20573_v48 }
 0x23c   :  { %v20595_v0 = vsub.f32 %v20569_v41, %v20576_v54  ;;  %v2287_v39 = vsub.f32 %v20567_v14, %v23537_v17 }
 0x23d   :  { %v20612_v10 = vsub.f32 %v20578_v24, %v20588_v53  ;;  %v2277_v60 = vsub.f32 %v20573_v48, %v23542_v16  ;;  %v2374_v16 = vsub.f32 %v20603_v32, %v2373_v11 }
 0x23e   :  { %v23541_v17 = vand.u32 4294901760, %v20595_v0  ;;  %v2288_v18 = vand.u32 4294901760, %v2287_v39 }
 0x23f   :  { %v2278_v36 = vand.u32 4294901760, %v2277_v60  ;;  %v2296_v47 = vand.u32 4294901760, %v20612_v10  ;;  %v2375_v8 = vand.u32 4294901760, %v2374_v16  ;;  %v20674_v16 = vpack.c.bf16 %v20535_v50, %v20530_v42 }
 0x240   :  { %v2307_v44 = vsub.f32 %v20595_v0, %v23541_v17  ;;  %v2368_v17 = vand.u32 4294901760, %v2367_v19 }
 0x241   :  { %14689 = vmatprep.mubr.f32.mxu1 %v2278_v36  ;;  %v2297_v60 = vsub.f32 %v20612_v10, %v2296_v47  ;;  %v2381_v36 = vsub.f32 %v20608_v40, %v2380_v52 }
 0x242   :  { %14690 = vmatmul.mubr.f32.vlgmr.msra.gmra.mrb[0].mxu1 %v2288_v18  ;;  %v2308_v39 = vand.u32 4294901760, %v2307_v44  ;;  %v20648_v18 = vpack.c.bf16 %v2368_v17, %v2361_v20  ;;  %v20666_v17 = vpack.c.bf16 %v20523_v46, %v20518_v58  ;;  %v20688_v44 = vpack.c.bf16 %v20608_v40, %v20603_v32 }
 0x243   :  { %17344 = vmatpush3.bf16.msra.mxu1 %v20454_v29  ;;  %v2298_v38 = vand.u32 4294901760, %v2297_v60  ;;  %v2382_v19 = vand.u32 4294901760, %v2381_v36  ;;  %v23662_v60 = vand.u32 4294901760, %v20573_v48  ;;  %v23666_v36 = vand.u32 4294901760, %v20523_v46 }
 0x244   :  { %17346 = vmatprep.subr.bf16.mxu1 %v20617_v56  ;;  %v23671_v46 = vand.u32 4294901760, %v20558_v35  ;;  %v23675_v32 = vand.u32 4294901760, %v20469_v27  ;;  %v23676_v40 = vand.u32 4294901760, %v20471_v15  ;;  %v2977_v27 = vmul.f32 %v20548_v30, %v20548_v30 }
 0x245   :  { %14692 = vmatprep.mubr.f32.mxu1 %v2298_v38  ;;  %v20652_v28 = vpack.c.bf16 %v2382_v19, %v2375_v8  ;;  %v23664_v38 = vand.u32 4294901760, %v20432_v12  ;;  %v23667_v19 = vand.u32 4294901760, %v20567_v14  ;;  %v23669_v12 = vand.u32 4294901760, %v20535_v50 }
 0x246   :  { %14693 = vmatmul.mubr.f32.gmra.mrb[2].mxu1 %v2308_v39  ;;  %v23665_v39 = vand.u32 4294901760, %v20518_v58  ;;  %v23670_v58 = vand.u32 4294901760, %v20595_v0  ;;  %v23674_v50 = vand.u32 4294901760, %v20459_v9  ;;  %v23678_v9 = vand.u32 4294901760, %v20482_v25 }
 0x247   :  { %17348 = vmatpush3.bf16.msra.mxu1 %v20617_v56  ;;  %14727 = vmatprep.mubr.f32.mxu1 %v20553_v49  ;;  %v20808_v15 = vand.u32 4294901760, %v2977_v27 }
 0x248   :  { %17350 = vmatprep.subr.bf16.mxu1 %v20636_v31  ;;  %v20731_v8 = vpack.c.bf16 %v23666_v36, %v23665_v39 }
 0x24b   :  { %17352 = vmatpush3.bf16.msra.mxu1 %v20636_v31 }
 0x24c   :  { %17354 = vmatprep.subr.bf16.mxu1 %v20648_v18 }
 0x24f   :  { %17356 = vmatpush3.bf16.msra.mxu1 %v20648_v18 }
 0x250   :  { %17358 = vmatprep.subr.bf16.mxu1 %v20652_v28 }
 0x253   :  { %17360 = vmatpush3.bf16.msra.mxu1 %v20652_v28 }
 0x254   :  { %17362 = vmatprep.subr.bf16.mxu1 %v20475_v37 }
 0x257   :  { %17364 = vmatpush3.bf16.msra.mxu1 %v20475_v37 }
 0x258   :  { %17366 = vmatprep.subr.bf16.mxu1 %v20495_v43 }
 0x25b   :  { %17368 = vmatpush3.bf16.msra.mxu1 %v20495_v43 }
 0x25c   :  { %17370 = vmatprep.subr.bf16.mxu1 %v20497_v1 }
 0x25f   :  { %17372 = vmatpush3.bf16.msra.mxu1 %v20497_v1 }
 0x260   :  { %17374 = vmatprep.subr.bf16.mxu1 %v20501_v33 }
 0x262   :  { %14728 = vmatmul.mubr.f32.vlgmr.msra.gmra.mrb[0].mxu1 %v20546_v45 }
 0x263   :  { %14730 = vmatprep.mubr.f32.mxu1 %v20588_v53  ;;  %17376 = vmatpush3.bf16.msra.mxu1 %v20501_v33 }
 0x264   :  { %17378 = vmatprep.subr.bf16.mxu1 %v20666_v17 }
 0x266   :  { %14731 = vmatmul.mubr.f32.gmra.mrb[2].mxu1 %v20576_v54 }
 0x267   :  { %17380 = vmatpush3.bf16.msra.mxu1 %v20666_v17  ;;  %14765 = vmatprep.mubr.f32.mxu1 %v20573_v48  ;;  %v23663_v48 = vand.u32 4294901760, %v20427_v26  ;;  %v23668_v26 = vand.u32 4294901760, %v20530_v42  ;;  %v23673_v42 = vand.u32 4294901760, %v20457_v62  ;;  %v23677_v62 = vand.u32 4294901760, %v20480_v3 }
 0x268   :  { %17382 = vmatprep.subr.bf16.mxu1 %v20674_v16  ;;  %v20813_v3 = vsub.f32 %v2977_v27, %v20808_v15 }
 0x269   :  { %v20723_v20 = vpack.c.bf16 %v23664_v38, %v23663_v48  ;;  %v20770_v35 = vpack.c.bf16 %v23674_v50, %v23673_v42 }
 0x26a   :  { %v3064_v25 = vand.u32 4294901760, %v20813_v3 }
 0x26b   :  { %17384 = vmatpush3.bf16.msra.mxu1 %v20674_v16 }
 0x26c   :  { %17386 = vmatprep.subr.bf16.mxu1 %v20682_v2 }
 0x26f   :  { %17388 = vmatpush3.bf16.msra.mxu1 %v20682_v2 }
 0x270   :  { %17390 = vmatprep.subr.bf16.mxu1 %v20688_v44 }
 0x273   :  { %17392 = vmatpush3.bf16.msra.mxu1 %v20688_v44 }
 0x274   :  { %17394 = vmatprep.subr.bf16.mxu1 %v20505_v63 }
 0x277   :  { %17396 = vmatpush3.bf16.msra.mxu1 %v20505_v63 }
 0x278   :  { %17398 = vmatprep.subr.bf16.mxu1 %v20509_v5 }
 0x27b   :  { %17400 = vmatpush3.bf16.msra.mxu1 %v20509_v5 }
 0x27c   :  { %17402 = vmatprep.subr.bf16.mxu1 %v20513_v4 }
 0x27f   :  { %17404 = vmatpush3.bf16.msra.mxu1 %v20513_v4 }
 0x280   :  { %17406 = vmatprep.subr.bf16.mxu1 %v20136_v55 }
 0x282   :  { %14766 = vmatmul.mubr.f32.vlgmr.msra.gmra.mrb[0].mxu1 %v20567_v14 }
 0x283   :  { %14768 = vmatprep.mubr.f32.mxu1 %v20612_v10  ;;  %17408 = vmatpush3.bf16.msra.mxu1 %v20136_v55  ;;  %v23672_v10 = vand.u32 4294901760, %v20563_v23  ;;  %v20778_v23 = vpack.c.bf16 %v23676_v40, %v23675_v32 }
 0x284   :  { %17410 = vmatprep.subr.bf16.mxu1 %v20144_v57 }
 0x285   :  { %v20754_v14 = vpack.c.bf16 %v23672_v10, %v23671_v46 }
 0x286   :  { %14769 = vmatmul.mubr.f32.gmra.mrb[2].mxu1 %v20595_v0  ;;  %v20762_v0 = vpack.c.bf16 %v2380_v52, %v2373_v11  ;;  %v2978_v52 = vmul.f32 %v20537_v6, %v20537_v6 }
 0x287   :  { %17412 = vmatpush3.bf16.msra.mxu1 %v20144_v57  ;;  %14803 = vmatprep.mubr.f32.mxu1 %v23662_v60  ;;  %v20743_v60 = vpack.c.bf16 %v23669_v12, %v23668_v26 }
 0x288   :  { %17414 = vmatprep.subr.bf16.mxu1 %v20163_v22 }
 0x28b   :  { %17416 = vmatpush3.bf16.msra.mxu1 %v20163_v22 }
 0x28c   :  { %17418 = vmatprep.subr.bf16.mxu1 %v20185_v34 }
 0x28f   :  { %17420 = vmatpush3.bf16.msra.mxu1 %v20185_v34 }
 0x290   :  { %17422 = vmatprep.subr.bf16.mxu1 %v20207_v59 }
 0x293   :  { %17424 = vmatpush3.bf16.msra.mxu1 %v20207_v59 }
 0x294   :  { %17426 = vmatprep.subr.bf16.mxu1 %v20412_v7 }
 0x297   :  { %17428 = vmatpush3.bf16.msra.mxu1 %v20412_v7 }
 0x298   :  { %17430 = vmatprep.subr.bf16.mxu1 %v20422_v21 }
 0x29b   :  { %17432 = vmatpush3.bf16.msra.mxu1 %v20422_v21 }
 0x29c   :  { %17434 = vmatprep.subr.bf16.mxu1 %v20444_v61 }
 0x29f   :  { %17436 = vmatpush3.bf16.msra.mxu1 %v20444_v61 }
 0x2a0   :  { %17438 = vmatprep.subr.bf16.mxu1 %v20723_v20 }
 0x2a2   :  { %14804 = vmatmul.mubr.f32.vlgmr.msra.gmra.mrb[0].mxu1 %v23667_v19 }
 0x2a3   :  { %14806 = vmatprep.mubr.f32.mxu1 %v2296_v47  ;;  %17440 = vmatpush3.bf16.msra.mxu1 %v20723_v20  ;;  %v20786_v47 = vpack.c.bf16 %v23678_v9, %v23677_v62 }
 0x2a4   :  { %17442 = vmatprep.subr.bf16.mxu1 %v20731_v8 }
 0x2a6   :  { %14807 = vmatmul.mubr.f32.gmra.mrb[2].mxu1 %v23670_v58 }
 0x2a7   :  { %17444 = vmatpush3.bf16.msra.mxu1 %v20731_v8  ;;  %14841 = vmatprep.mubr.f32.mxu1 %v20553_v49 }
 0x2a8   :  { %17446 = vmatprep.subr.bf16.mxu1 %v20743_v60 }
 0x2ab   :  { %17448 = vmatpush3.bf16.msra.mxu1 %v20743_v60 }
 0x2ac   :  { %17450 = vmatprep.subr.bf16.mxu1 %v20754_v14 }
 0x2af   :  { %17452 = vmatpush3.bf16.msra.mxu1 %v20754_v14 }
 0x2b0   :  { %17454 = vmatprep.subr.bf16.mxu1 %v20762_v0 }
 0x2b3   :  { %17456 = vmatpush3.bf16.msra.mxu1 %v20762_v0 }
 0x2b4   :  { %17458 = vmatprep.subr.bf16.mxu1 %v20770_v35 }
 0x2b7   :  { %17460 = vmatpush3.bf16.msra.mxu1 %v20770_v35 }
 0x2b8   :  { %17462 = vmatprep.subr.bf16.mxu1 %v20778_v23 }
 0x2bb   :  { %17464 = vmatpush3.bf16.msra.mxu1 %v20778_v23 }
 0x2bc   :  { %17466 = vmatprep.subr.bf16.mxu1 %v20786_v47 }
 0x2bf   :  { %17468 = vmatpush3.bf16.msra.mxu1 %v20786_v47 }
 0x2c0   :  { %17470 = vmatprep.subr.bf16.mxu1 %v20136_v55 }
 0x2c2   :  { %14842 = vmatmul.mubr.f32.vlgmr.msra.gmra.mrb[0].mxu1 %v20546_v45 }
 0x2c3   :  { %14844 = vmatprep.mubr.f32.mxu1 %v20588_v53  ;;  %17472 = vmatpush3.bf16.msra.mxu1 %v20136_v55 }
 0x2c4   :  { %17474 = vmatprep.subr.bf16.mxu1 %v20144_v57 }
 0x2c6   :  { %14845 = vmatmul.mubr.f32.gmra.mrb[2].mxu1 %v20576_v54 }
 0x2c7   :  { %17476 = vmatpush3.bf16.msra.mxu1 %v20144_v57  ;;  %14879 = vmatprep.mubr.f32.mxu1 %v20553_v49  ;;  %v3065_v49 = vsub.f32 %v20813_v3, %v3064_v25 }
 0x2c8   :  { %17478 = vmatprep.subr.bf16.mxu1 %v20163_v22 }
 0x2c9   :  { %v3066_v11 = vand.u32 4294901760, %v3065_v49 }
 0x2cb   :  { %17480 = vmatpush3.bf16.msra.mxu1 %v20163_v22 }
 0x2cc   :  { %17482 = vmatprep.subr.bf16.mxu1 %v20185_v34 }
 0x2cf   :  { %17484 = vmatpush3.bf16.msra.mxu1 %v20185_v34 }
 0x2d0   :  { %17486 = vmatprep.subr.bf16.mxu1 %v20207_v59 }
 0x2d3   :  { %17488 = vmatpush3.bf16.msra.mxu1 %v20207_v59 }
 0x2d4   :  { %17490 = vmatprep.subr.bf16.mxu1 %v20412_v7 }
 0x2d7   :  { %17492 = vmatpush3.bf16.msra.mxu1 %v20412_v7 }
 0x2d8   :  { %17494 = vmatprep.subr.bf16.mxu1 %v20422_v21 }
 0x2db   :  { %17496 = vmatpush3.bf16.msra.mxu1 %v20422_v21 }
 0x2dc   :  { %17498 = vmatprep.subr.bf16.mxu1 %v20444_v61 }
 0x2df   :  { %17500 = vmatpush3.bf16.msra.mxu1 %v20444_v61 }
 0x2e0   :  { %17502 = vmatprep.subr.bf16.mxu1 %v20136_v55 }
 0x2e2   :  { %14880 = vmatmul.mubr.f32.vlgmr.msra.gmra.mrb[0].mxu1 %v20546_v45  ;;  %v20837_v45 = vand.u32 4294901760, %v2978_v52 }
 0x2e3   :  { %14882 = vmatprep.mubr.f32.mxu1 %v20588_v53  ;;  %17504 = vmatpush3.bf16.msra.mxu1 %v20136_v55  ;;  %v2979_v53 = vmul.f32 %v20578_v24, %v20578_v24 }
 0x2e4   :  { %17506 = vmatprep.subr.bf16.mxu1 %v20144_v57  ;;  %v20846_v38 = vsub.f32 %v2978_v52, %v20837_v45 }
 0x2e5   :  { %v20842_v48 = vand.u32 4294901760, %v2979_v53 }
 0x2e6   :  { %14883 = vmatmul.mubr.f32.gmra.mrb[2].mxu1 %v20576_v54  ;;  %v2980_v54 = vmul.f32 %v20569_v41, %v20569_v41  ;;  %v3074_v19 = vand.u32 4294901760, %v20846_v38 }
 0x2e7   :  { %17508 = vmatpush3.bf16.msra.mxu1 %v20144_v57  ;;  %14917 = vmatprep.mubr.f32.mxu1 %v3066_v11  ;;  %v20852_v36 = vsub.f32 %v2979_v53, %v20842_v48 }
 0x2e8   :  { %17510 = vmatprep.subr.bf16.mxu1 %v20163_v22  ;;  %v20848_v39 = vand.u32 4294901760, %v2980_v54  ;;  %v3075_v58 = vsub.f32 %v20846_v38, %v3074_v19 }
 0x2e9   :  { %v3084_v12 = vand.u32 4294901760, %v20852_v36 }
 0x2ea   :  { %v20857_v26 = vsub.f32 %v2980_v54, %v20848_v39  ;;  %v3076_v42 = vand.u32 4294901760, %v3075_v58 }
 0x2eb   :  { %17512 = vmatpush3.bf16.msra.mxu1 %v20163_v22  ;;  %v3085_v10 = vsub.f32 %v20852_v36, %v3084_v12 }
 0x2ec   :  { %17514 = vmatprep.subr.bf16.mxu1 %v20185_v34  ;;  %v3094_v46 = vand.u32 4294901760, %v20857_v26 }
 0x2ed   :  { %v3086_v32 = vand.u32 4294901760, %v3085_v10 }
 0x2ee   :  { %v3095_v50 = vsub.f32 %v20857_v26, %v3094_v46 }
 0x2ef   :  { %17516 = vmatpush3.bf16.msra.mxu1 %v20185_v34 }
 0x2f0   :  { %17518 = vmatprep.subr.bf16.mxu1 %v20207_v59  ;;  %v3096_v40 = vand.u32 4294901760, %v3095_v50 }
 0x2f3   :  { %17520 = vmatpush3.bf16.msra.mxu1 %v20207_v59 }
 0x2f4   :  { %17522 = vmatprep.subr.bf16.mxu1 %v20412_v7 }
 0x2f7   :  { %17524 = vmatpush3.bf16.msra.mxu1 %v20412_v7 }
 0x2f8   :  { %17526 = vmatprep.subr.bf16.mxu1 %v20422_v21 }
 0x2fb   :  { %17528 = vmatpush3.bf16.msra.mxu1 %v20422_v21 }
 0x2fc   :  { %17530 = vmatprep.subr.bf16.mxu1 %v20444_v61 }
 0x2ff   :  { %17532 = vmatpush3.bf16.msra.mxu1 %v20444_v61 }
 0x300   :  { %17534 = vmatprep.subr.bf16.mxu1 %v20454_v29 }
 0x302   :  { %14918 = vmatmul.mubr.f32.vlgmr.msra.gmra.mrb[4].mxu1 %v3076_v42 }
 0x303   :  { %14920 = vmatprep.mubr.f32.mxu1 %v3086_v32  ;;  %17536 = vmatpush3.bf16.msra.mxu1 %v20454_v29  ;;  %v3774_v32 = vld [vmem:[%s23497_s3] sm:$0x1] }
 0x304   :  { %17538 = vmatprep.subr.bf16.mxu1 %v20617_v56 }
 0x306   :  { %14921 = vmatmul.mubr.f32.gmra.mrb[6].mxu1 %v3096_v40 }
 0x307   :  { %17540 = vmatpush3.bf16.msra.mxu1 %v20617_v56  ;;  %14955 = vmatprep.mubr.f32.mxu1 %v20808_v15 }
 0x308   :  { %17542 = vmatprep.subr.bf16.mxu1 %v20636_v31 }
 0x30b   :  { %17544 = vmatpush3.bf16.msra.mxu1 %v20636_v31 }
 0x30c   :  { %17546 = vmatprep.subr.bf16.mxu1 %v20648_v18 }
 0x30f   :  { %17548 = vmatpush3.bf16.msra.mxu1 %v20648_v18 }
 0x310   :  { %17550 = vmatprep.subr.bf16.mxu1 %v20652_v28 }
 0x313   :  { %17552 = vmatpush3.bf16.msra.mxu1 %v20652_v28 }
 0x314   :  { %17554 = vmatprep.subr.bf16.mxu1 %v20475_v37 }
 0x317   :  { %17556 = vmatpush3.bf16.msra.mxu1 %v20475_v37 }
 0x318   :  { %17558 = vmatprep.subr.bf16.mxu1 %v20495_v43 }
 0x31b   :  { %17560 = vmatpush3.bf16.msra.mxu1 %v20495_v43  ;;  %v3777_v43 = vld [vmem:[%s23505_s11] sm:$0xff] }
 0x31c   :  { %17562 = vmatprep.subr.bf16.mxu1 %v20497_v1 }
 0x31f   :  { %17564 = vmatpush3.bf16.msra.mxu1 %v20497_v1  ;;  %v20985_v1 = vand.u32 4294901760, %v3777_v43 }
 0x320   :  { %17566 = vmatprep.subr.bf16.mxu1 %v20501_v33 }
 0x321   :  { %15114 = vmatpush3.msra.mxu0 %v20985_v1  ;;  %v3859_v54 = vsub.f32 %v3777_v43, %v20985_v1  ;;  %v4732_v43 = vld [vmem:[#allocation7 + $0x98] sm:$0xff] }
 0x322   :  { %14956 = vmatmul.mubr.f32.vlgmr.msra.gmra.mrb[4].mxu1 %v20837_v45  ;;  %15118 = vmatprep.subr.mxu0 %v23649_v51 }
 0x323   :  { %14958 = vmatprep.mubr.f32.mxu1 %v20842_v48  ;;  %17568 = vmatpush3.bf16.msra.mxu1 %v20501_v33 }
 0x324   :  { %17570 = vmatprep.subr.bf16.mxu1 %v20666_v17 }
 0x326   :  { %14959 = vmatmul.mubr.f32.gmra.mrb[6].mxu1 %v20848_v39 }
 0x327   :  { %17572 = vmatpush3.bf16.msra.mxu1 %v20666_v17  ;;  %14993 = vmatprep.mubr.f32.mxu1 %v20813_v3 }
 0x328   :  { %17574 = vmatprep.subr.bf16.mxu1 %v20674_v16 }
 0x32b   :  { %17576 = vmatpush3.bf16.msra.mxu1 %v20674_v16 }
 0x32c   :  { %17578 = vmatprep.subr.bf16.mxu1 %v20682_v2 }
 0x32f   :  { %17580 = vmatpush3.bf16.msra.mxu1 %v20682_v2 }
 0x330   :  { %17582 = vmatprep.subr.bf16.mxu1 %v20688_v44 }
 0x333   :  { %17584 = vmatpush3.bf16.msra.mxu1 %v20688_v44 }
 0x334   :  { %17586 = vmatprep.subr.bf16.mxu1 %v20505_v63 }
 0x337   :  { %17588 = vmatpush3.bf16.msra.mxu1 %v20505_v63 }
 0x338   :  { %17590 = vmatprep.subr.bf16.mxu1 %v20509_v5 }
 0x33b   :  { %17592 = vmatpush3.bf16.msra.mxu1 %v20509_v5 }
 0x33c   :  { %17594 = vmatprep.subr.bf16.mxu1 %v20513_v4 }
 0x33f   :  { %17596 = vmatpush3.bf16.msra.mxu1 %v20513_v4 }
 0x340   :  { %17598 = vmatprep.subr.bf16.mxu1 %v20136_v55 }
 0x342   :  { %14994 = vmatmul.mubr.f32.vlgmr.msra.gmra.mrb[4].mxu1 %v20846_v38 }
 0x343   :  { %14996 = vmatprep.mubr.f32.mxu1 %v20852_v36  ;;  %17600 = vmatpush3.bf16.msra.mxu1 %v20136_v55  ;;  %v3860_v36 = vand.u32 4294901760, %v3859_v54 }
 0x344   :  { %17602 = vmatprep.subr.bf16.mxu1 %v20144_v57 }
 0x345   :  { %v3861_v58 = vsub.f32 %v3859_v54, %v3860_v36 }
 0x346   :  { %14997 = vmatmul.mubr.f32.gmra.mrb[6].mxu1 %v20857_v26 }
 0x347   :  { %17604 = vmatpush3.bf16.msra.mxu1 %v20144_v57  ;;  %15031 = vmatprep.mubr.f32.mxu1 %v3064_v25  ;;  %v3862_v42 = vand.u32 4294901760, %v3861_v58 }
 0x348   :  { %17606 = vmatprep.subr.bf16.mxu1 %v20163_v22 }
 0x34b   :  { %17608 = vmatpush3.bf16.msra.mxu1 %v20163_v22 }
 0x34c   :  { %17610 = vmatprep.subr.bf16.mxu1 %v20185_v34 }
 0x34f   :  { %17612 = vmatpush3.bf16.msra.mxu1 %v20185_v34 }
 0x350   :  { %17614 = vmatprep.subr.bf16.mxu1 %v20207_v59 }
 0x353   :  { %17616 = vmatpush3.bf16.msra.mxu1 %v20207_v59 }
 0x354   :  { %17618 = vmatprep.subr.bf16.mxu1 %v20412_v7 }
 0x357   :  { %17620 = vmatpush3.bf16.msra.mxu1 %v20412_v7 }
 0x358   :  { %17622 = vmatprep.subr.bf16.mxu1 %v20422_v21 }
 0x35b   :  { %17624 = vmatpush3.bf16.msra.mxu1 %v20422_v21 }
 0x35c   :  { %17626 = vmatprep.subr.bf16.mxu1 %v20444_v61 }
 0x35f   :  { %17628 = vmatpush3.bf16.msra.mxu1 %v20444_v61 }
 0x360   :  { %17630 = vmatprep.subr.bf16.mxu1 %v20723_v20 }
 0x362   :  { %15032 = vmatmul.mubr.f32.vlgmr.msra.gmra.mrb[4].mxu1 %v3074_v19 }
 0x363   :  { %15034 = vmatprep.mubr.f32.mxu1 %v3084_v12  ;;  %17632 = vmatpush3.bf16.msra.mxu1 %v20723_v20 }
 0x364   :  { %17634 = vmatprep.subr.bf16.mxu1 %v20731_v8 }
 0x366   :  { %15035 = vmatmul.mubr.f32.gmra.mrb[6].mxu1 %v3094_v46 }
 0x367   :  { %17636 = vmatpush3.bf16.msra.mxu1 %v20731_v8  ;;  %15069 = vmatprep.mubr.f32.mxu1 %v20808_v15 }
 0x368   :  { %17638 = vmatprep.subr.bf16.mxu1 %v20743_v60 }
 0x36b   :  { %17640 = vmatpush3.bf16.msra.mxu1 %v20743_v60 }
 0x36c   :  { %17642 = vmatprep.subr.bf16.mxu1 %v20754_v14 }
 0x36f   :  { %17644 = vmatpush3.bf16.msra.mxu1 %v20754_v14 }
 0x370   :  { %17646 = vmatprep.subr.bf16.mxu1 %v20762_v0 }
 0x373   :  { %17648 = vmatpush3.bf16.msra.mxu1 %v20762_v0 }
 0x374   :  { %17650 = vmatprep.subr.bf16.mxu1 %v20770_v35 }
 0x377   :  { %17652 = vmatpush3.bf16.msra.mxu1 %v20770_v35 }
 0x378   :  { %17654 = vmatprep.subr.bf16.mxu1 %v20778_v23 }
 0x37b   :  { %17656 = vmatpush3.bf16.msra.mxu1 %v20778_v23 }
 0x37c   :  { %17658 = vmatprep.subr.bf16.mxu1 %v20786_v47 }
 0x37f   :  { %17660 = vmatpush3.bf16.msra.mxu1 %v20786_v47 }
 0x380   :  { %17662 = vmatprep.subr.bf16.mxu1 %v20136_v55 }
 0x382   :  { %15070 = vmatmul.mubr.f32.vlgmr.msra.gmra.mrb[4].mxu1 %v20837_v45 }
 0x383   :  { %15072 = vmatprep.mubr.f32.mxu1 %v20842_v48  ;;  %17664 = vmatpush3.bf16.msra.mxu1 %v20136_v55 }
 0x384   :  { %17666 = vmatprep.subr.bf16.mxu1 %v20144_v57 }
 0x386   :  { %15073 = vmatmul.mubr.f32.gmra.mrb[6].mxu1 %v20848_v39 }
 0x387   :  { %17668 = vmatpush3.bf16.msra.mxu1 %v20144_v57  ;;  %15107 = vmatprep.mubr.f32.mxu1 %v20808_v15 }
 0x388   :  { %17670 = vmatprep.subr.bf16.mxu1 %v20163_v22 }
 0x38b   :  { %17672 = vmatpush3.bf16.msra.mxu1 %v20163_v22 }
 0x38c   :  { %17674 = vmatprep.subr.bf16.mxu1 %v20185_v34 }
 0x38f   :  { %17676 = vmatpush3.bf16.msra.mxu1 %v20185_v34 }
 0x390   :  { %17678 = vmatprep.subr.bf16.mxu1 %v20207_v59 }
 0x393   :  { %17680 = vmatpush3.bf16.msra.mxu1 %v20207_v59 }
 0x394   :  { %17682 = vmatprep.subr.bf16.mxu1 %v20412_v7 }
 0x397   :  { %17684 = vmatpush3.bf16.msra.mxu1 %v20412_v7 }
 0x398   :  { %17686 = vmatprep.subr.bf16.mxu1 %v20422_v21 }
 0x39b   :  { %17688 = vmatpush3.bf16.msra.mxu1 %v20422_v21 }
 0x39c   :  { %17690 = vmatprep.subr.bf16.mxu1 %v20444_v61 }
 0x39f   :  { %17692 = vmatpush3.bf16.msra.mxu1 %v20444_v61 }
 0x3a2   :  { %15108 = vmatmul.mubr.f32.vlgmr.msra.gmra.mrb[4].mxu1 %v20837_v45  ;;  %v3770_v45 = vld [vmem:[%s23496_s2] sm:$0x1] }
 0x3a3   :  { %15110 = vmatprep.mubr.f32.mxu1 %v20842_v48 }
 0x3a6   :  { %15111 = vmatmul.mubr.f32.gmra.mrb[6].mxu1 %v20848_v39 }
 0x3b5   :  { %v14881_v55 = vpop.f32.mrb[0].mxu1 }
 0x3b6   :  { %v2965_v57 = vsel %vm2963_vm2, %v14881_v55, 0.0  ;;  %v2941_v22 = vpop.f32.mrb[1].mxu1 }
 0x3b7   :  { %v2964_v34 = vsel %vm2963_vm2, %v2941_v22, 0.0 }
 0x3b8   :  { %v2966_v59 = vadd.f32 %v2965_v57, %v2964_v34 }
 0x3b9   :  { %v14884_v7 = vpop.f32.mrb[2].mxu1 }
 0x3ba   :  { %v2953_v21 = vpop.f32.mrb[3].mxu1  ;;  %v2969_v61 = vsel %vm2963_vm2, %v14884_v7, 0.0 }
 0x3bb   :  { %v2967_v56 = vsel %vm2963_vm2, %v2953_v21, 0.0  ;;  %v4729_v21 = vld [vmem:[#allocation7 + $0x80] sm:$0xff] }
 0x3bc   :  { %v2968_v29 = vadd.f32 %v2967_v56, %v2966_v59  ;;  %v4730_v56 = vld [vmem:[#allocation7 + $0x88] sm:$0xff] }
 0x3be   :  { %v2970_v37 = vadd.f32 %v2969_v61, %v2968_v29  ;;  %v4731_v29 = vld [vmem:[#allocation7 + $0x90] sm:$0xff]  ;;  %v4746_v61 = vand.u32 4294901760, %v4729_v21 }
 0x3c0   :  { %v2971_v33 = vrot.slane %v2970_v37, 4 }
 0x3c2   :  { %v2972_v63 = vadd.f32 %v2971_v33, %v2970_v37  ;;  %v4749_v37 = vand.u32 4294901760, %v4730_v56  ;;  %v4752_v33 = vand.u32 4294901760, %v4731_v29 }
 0x3c4   :  { %v2973_v28 = vrot.slane %v2972_v63, 2  ;;  %v21113_v58 = vsub.f32 %v4731_v29, %v4752_v33 }
 0x3c6   :  { %v2974_v20 = vadd.f32 %v2973_v28, %v2972_v63  ;;  %v4755_v63 = vand.u32 4294901760, %v4732_v43 }
 0x3c8   :  { %v2975_v0 = vrot.slane %v2974_v20, 1 }
 0x3ca   :  { %v2976_v62 = vadd.f32 %v2975_v0, %v2974_v20 }
 0x3cc   :  { %v3765_v27 = vmul.f32 0.001953125, %v2976_v62  ;;  %v21065_v62 = vld [vmem:[#allocation7 + $0xd0] sm:$0xff] }
 0x3ce   :  { %v3767_v25 = vmul.f32 %v3765_v27, %v3765_v27 }
 0x475   :  { %v15109_v5 = vpop.f32.mrb[4].mxu1 }
 0x476   :  { %v3752_v4 = vsel %vm2963_vm2, %v15109_v5, 0.0  ;;  %v3729_v31 = vpop.f32.mrb[5].mxu1  ;;  %v21041_v5 = vpack.c.bf16 %v4749_v37, %v4746_v61 }
 0x477   :  { %v3751_v18 = vsel %vm2963_vm2, %v3729_v31, 0.0  ;;  %v4734_v31 = vld [vmem:[#allocation7 + $0xa8] sm:$0xff] }
 0x478   :  { %v3753_v17 = vadd.f32 %v3752_v4, %v3751_v18  ;;  %v21043_v4 = vpack.c.bf16 %v4755_v63, %v4752_v33  ;;  %v4761_v28 = vand.u32 4294901760, %v4734_v31 }
 0x479   :  { %v15112_v16 = vpop.f32.mrb[6].mxu1 }
 0x47a   :  { %v3741_v2 = vpop.f32.mrb[7].mxu1  ;;  %v3756_v60 = vsel %vm2963_vm2, %v15112_v16, 0.0  ;;  %v4735_v16 = vld [vmem:[#allocation7 + $0xb0] sm:$0xff] }
 0x47b   :  { %v3754_v44 = vsel %vm2963_vm2, %v3741_v2, 0.0  ;;  %v4736_v2 = vld [vmem:[#allocation7 + $0xb8] sm:$0xff] }
 0x47c   :  { %v3755_v8 = vadd.f32 %v3754_v44, %v3753_v17  ;;  %v4764_v44 = vand.u32 4294901760, %v4735_v16  ;;  %v4767_v20 = vand.u32 4294901760, %v4736_v2 }
 0x47e   :  { %v3757_v14 = vadd.f32 %v3756_v60, %v3755_v8  ;;  %v21053_v8 = vpack.c.bf16 %v4767_v20, %v4764_v44  ;;  %v21055_v60 = vld [vmem:[#allocation7 + $0xc0] sm:$0xff]  ;;  %v21146_v33 = vsub.f32 %v4735_v16, %v4764_v44 }
 0x47f   :  { %v4770_v0 = vand.u32 4294901760, %v21055_v60 }
 0x480   :  { %v3758_v35 = vrot.slane %v3757_v14, 4 }
 0x482   :  { %v3759_v23 = vadd.f32 %v3758_v35, %v3757_v14  ;;  %v21057_v14 = vld [vmem:[#allocation7 + $0xc8] sm:$0xff] }
 0x483   :  { %v4773_v35 = vand.u32 4294901760, %v21057_v14 }
 0x484   :  { %v3760_v9 = vrot.slane %v3759_v23, 2 }
 0x485   :  { %v21161_v16 = vsub.f32 %v21057_v14, %v4773_v35 }
 0x486   :  { %v3761_v47 = vadd.f32 %v3760_v9, %v3759_v23  ;;  %v21063_v23 = vpack.c.bf16 %v4773_v35, %v4770_v0  ;;  %v21067_v9 = vld [vmem:[#allocation7 + $0xd8] sm:$0xff] }
 0x488   :  { %v3762_v15 = vrot.slane %v3761_v47, 1 }
 0x48a   :  { %v3763_v3 = vadd.f32 %v3762_v15, %v3761_v47  ;;  %v4776_v47 = vand.u32 4294901760, %v21065_v62 }
 0x48c   :  { %v3766_v49 = vmul.f32 0.001953125, %v3763_v3  ;;  %v21075_v3 = vld [vmem:[#allocation7 + $0xe0] sm:$0xff]  ;;  %v21175_v14 = vsub.f32 %v21065_v62, %v4776_v47 }
 0x48e   :  { %v3768_v11 = vsub.f32 %v3766_v49, %v3767_v25  ;;  %v21077_v25 = vld [vmem:[#allocation7 + $0xe8] sm:$0xff]  ;;  %v4782_v49 = vand.u32 4294901760, %v21075_v3 }
 0x490   :  { %v3769_v52 = vmax.f32 %v3768_v11, 0.0  ;;  %v4785_v11 = vand.u32 4294901760, %v21077_v25 }
 0x492   :  { %v3771_v53 = vadd.f32 1e-05, %v3769_v52  ;;  %v21083_v52 = vld [vmem:[#allocation7 + $0xf0] sm:$0xff] }
 0x494   :  { %19477 = vrsqrt.f32 %v3771_v53  ;;  %v21085_v53 = vld [vmem:[#allocation7 + $0xf8] sm:$0xff] }
 0x49e   :  { %v19478_v48 = vpop.eup %19477 }
 0x49f   :  { %v3773_v38 = vmul.f32 %v19478_v48, %v3770_v45  ;;  %v21091_v45 = vpack.c.bf16 %v4785_v11, %v4782_v49  ;;  %v4791_v48 = vand.u32 4294901760, %v21085_v53 }
 0x4a1   :  { %v3779_v39 = vsel %vm2963_vm2, %v3773_v38, 0  ;;  %v3775_v19 = vmul.f32 %v3773_v38, %v3765_v27  ;;  %v4779_v27 = vand.u32 4294901760, %v21067_v9  ;;  %v21095_v38 = vsub.f32 %v4729_v21, %v4746_v61 }
 0x4a2   :  { %v3847_v26 = vand.u32 4294901760, %v3779_v39 }
 0x4a3   :  { %v3776_v40 = vsub.f32 %v3774_v32, %v3775_v19  ;;  %v21073_v15 = vpack.c.bf16 %v4779_v27, %v4776_v47  ;;  %v4869_v19 = vand.u32 4294901760, %v21095_v38  ;;  %v21200_v47 = vsub.f32 %v21077_v25, %v4785_v11 }
 0x4a4   :  { %v3848_v12 = vsub.f32 %v3779_v39, %v3847_v26  ;;  %v21097_v39 = vsub.f32 %v4730_v56, %v4749_v37  ;;  %v21217_v25 = vsub.f32 %v21085_v53, %v4791_v48 }
 0x4a5   :  { %v4228_v55 = vsel %vm2963_vm2, %v3776_v40, 0 }
 0x4a6   :  { %v3849_v46 = vand.u32 4294901760, %v3848_v12  ;;  %v4296_v57 = vand.u32 4294901760, %v4228_v55 }
 0x4a8   :  { %v3850_v10 = vsub.f32 %v3848_v12, %v3849_v46  ;;  %v4297_v22 = vsub.f32 %v4228_v55, %v4296_v57 }
 0x4aa   :  { %v3851_v50 = vand.u32 4294901760, %v3850_v10  ;;  %v4298_v34 = vand.u32 4294901760, %v4297_v22 }
 0x4ac   :  { %15116 = vmatmul.mubr.f32.vlgmr.msra.gmra.mrb[4].mxu0 %v3851_v50  ;;  %v4299_v59 = vsub.f32 %v4297_v22, %v4298_v34  ;;  %v23556_v50 = vand.u32 4294901760, %v21113_v58 }
 0x4ad   :  { %15119 = vmatpush3.msra.mxu0 %v3862_v42  ;;  %15120 = vmatprep.mubr.msk.f32.mxu0 %vm19583_vm3, %v23649_v51 }
 0x4ae   :  { %15123 = vmatprep.subr.mxu0 %v23649_v51  ;;  %v4300_v7 = vand.u32 4294901760, %v4299_v59  ;;  %v4884_v55 = vsub.f32 %v21113_v58, %v23556_v50 }
 0x4b4   :  { %15121 = vmatmul.mubr.f32.vlgmr.msra.gmra.mrb[4].mxu0 %v3847_v26 }
 0x4b5   :  { %15124 = vmatpush3.msra.mxu0 %v3859_v54  ;;  %15125 = vmatprep.mubr.msk.f32.mxu0 %vm19583_vm3, %v23649_v51 }
 0x4b6   :  { %15128 = vmatprep.subr.mxu0 %v23649_v51 }
 0x4bc   :  { %15126 = vmatmul.mubr.f32.vlgmr.msra.gmra.mrb[4].mxu0 %v3848_v12  ;;  %v4870_v12 = vsub.f32 %v21095_v38, %v4869_v19 }
 0x4bd   :  { %15129 = vmatpush3.msra.mxu0 %v20985_v1  ;;  %15130 = vmatprep.mubr.msk.f32.mxu0 %vm19583_vm3, %v23649_v51 }
 0x4be   :  { %15133 = vmatprep.subr.mxu0 %v23649_v51 }
 0x4c4   :  { %15131 = vmatmul.mubr.f32.vlgmr.msra.gmra.mrb[4].mxu0 %v3849_v46  ;;  %v21115_v46 = vsub.f32 %v4732_v43, %v4755_v63  ;;  %v21148_v63 = vsub.f32 %v4736_v2, %v4767_v20 }
 0x4c5   :  { %15134 = vmatpush3.msra.mxu0 %v3860_v36  ;;  %15135 = vmatprep.mubr.msk.f32.mxu0 %vm19583_vm3, %v23649_v51 }
 0x4c6   :  { %15138 = vmatprep.subr.mxu0 %v23649_v51  ;;  %v23555_v32 = vand.u32 4294901760, %v21115_v46 }
 0x4cc   :  { %15136 = vmatmul.mubr.f32.vlgmr.msra.gmra.mrb[4].mxu0 %v3847_v26 }
 0x4cd   :  { %15139 = vmatpush3.msra.mxu0 %v20985_v1  ;;  %15140 = vmatprep.mubr.msk.f32.mxu0 %vm19583_vm3, %v23649_v51 }
 0x4ce   :  { %15143 = vmatprep.subr.mxu0 %v23649_v51 }
 0x4d4   :  { %15141 = vmatmul.mubr.f32.vlgmr.msra.gmra.mrb[4].mxu0 %v3847_v26  ;;  %v23557_v26 = vand.u32 4294901760, %v21097_v39 }
 0x4d5   :  { %15144 = vmatpush3.msra.mxu0 %v20985_v1  ;;  %15145 = vmatprep.mubr.msk.f32.mxu0 %vm19583_vm3, %v23649_v51 }
 0x4d6   :  { %15148 = vmatprep.subr.mxu0 %v23649_v51  ;;  %v4877_v10 = vsub.f32 %v21097_v39, %v23557_v26 }
 0x4d8   :  { %15146 = vmatmul.mubr.f32.vlgmr.msra.gmra.mrb[6].mxu0 %v4300_v7  ;;  %v4878_v40 = vand.u32 4294901760, %v4877_v10  ;;  %v4885_v7 = vand.u32 4294901760, %v4884_v55 }
 0x4d9   :  { %15149 = vmatpush3.msra.mxu0 %v3862_v42  ;;  %15150 = vmatprep.mubr.msk.f32.mxu0 %vm19583_vm3, %v23649_v51  ;;  %v4871_v42 = vand.u32 4294901760, %v4870_v12 }
 0x4da   :  { %15153 = vmatprep.subr.mxu0 %v23649_v51 }
 0x4db   :  { %v21133_v59 = vpack.c.bf16 %v4878_v40, %v4871_v42  ;;  %v21158_v42 = vsub.f32 %v21055_v60, %v4770_v0  ;;  %v23549_v40 = vand.u32 4294901760, %v21161_v16  ;;  %v21178_v0 = vsub.f32 %v21067_v9, %v4779_v27 }
 0x4dc   :  { %v21195_v9 = vsub.f32 %v21075_v3, %v4782_v49 }
 0x4dd   :  { %v23550_v20 = vand.u32 4294901760, %v21158_v42  ;;  %v4933_v60 = vsub.f32 %v21161_v16, %v23549_v40 }
 0x4e0   :  { %15151 = vmatmul.mubr.f32.vlgmr.msra.gmra.mrb[6].mxu0 %v4296_v57 }
 0x4e1   :  { %15154 = vmatpush3.msra.mxu0 %v3859_v54  ;;  %15155 = vmatprep.mubr.msk.f32.mxu0 %vm19583_vm3, %v23649_v51  ;;  %v4788_v54 = vand.u32 4294901760, %v21083_v52 }
 0x4e2   :  { %15158 = vmatprep.subr.mxu0 %v23649_v51 }
 0x4e3   :  { %v21212_v3 = vsub.f32 %v21083_v52, %v4788_v54 }
 0x4e8   :  { %15156 = vmatmul.mubr.f32.vlgmr.msra.gmra.mrb[6].mxu0 %v4297_v22 }
 0x4e9   :  { %15159 = vmatpush3.msra.mxu0 %v20985_v1  ;;  %15160 = vmatprep.mubr.msk.f32.mxu0 %vm19583_vm3, %v23649_v51 }
 0x4ea   :  { %15163 = vmatprep.subr.mxu0 %v23649_v51 }
 0x4f0   :  { %15161 = vmatmul.mubr.f32.vlgmr.msra.gmra.mrb[6].mxu0 %v4298_v34  ;;  %v21131_v34 = vsub.f32 %v4734_v31, %v4761_v28 }
 0x4f1   :  { %15164 = vmatpush3.msra.mxu0 %v3860_v36  ;;  %15165 = vmatprep.mubr.msk.f32.mxu0 %vm19583_vm3, %v23649_v51  ;;  %v21104_v36 = vpack.c.bf16 %v4791_v48, %v4788_v54 }
 0x4f2   :  { %15168 = vmatprep.subr.mxu0 %v23649_v51  ;;  %v23553_v29 = vand.u32 4294901760, %v21131_v34 }
 0x4f4   :  { %v4905_v43 = vsub.f32 %v21131_v34, %v23553_v29 }
 0x4f6   :  { %v4906_v31 = vand.u32 4294901760, %v4905_v43  ;;  %v23547_v43 = vand.u32 4294901760, %v21178_v0 }
 0x4f8   :  { %15166 = vmatmul.mubr.f32.vlgmr.msra.gmra.mrb[6].mxu0 %v4296_v57  ;;  %v4947_v62 = vsub.f32 %v21178_v0, %v23547_v43 }
 0x4f9   :  { %15169 = vmatpush3.msra.mxu0 %v20985_v1  ;;  %15170 = vmatprep.mubr.msk.f32.mxu0 %vm19583_vm3, %v23649_v51  ;;  %v4733_v1 = vld [vmem:[#allocation7 + $0xa0] sm:$0xff] }
 0x4fa   :  { %17694 = vmatprep.subr.bf16.mxu0 %v21041_v5  ;;  %v4758_v18 = vand.u32 4294901760, %v4733_v1 }
 0x4fc   :  { %v21049_v17 = vpack.c.bf16 %v4761_v28, %v4758_v18  ;;  %v21129_v22 = vsub.f32 %v4733_v1, %v4758_v18  ;;  %v23552_v18 = vand.u32 4294901760, %v21146_v33  ;;  %v23551_v28 = vand.u32 4294901760, %v21148_v63 }
 0x4fe   :  { %v23554_v56 = vand.u32 4294901760, %v21129_v22  ;;  %v4912_v10 = vsub.f32 %v21146_v33, %v23552_v18  ;;  %v4919_v2 = vsub.f32 %v21148_v63, %v23551_v28 }
 0x500   :  { %15171 = vmatmul.mubr.f32.vlgmr.msra.gmra.mrb[6].mxu0 %v4296_v57  ;;  %v4891_v57 = vsub.f32 %v21115_v46, %v23555_v32  ;;  %v4898_v37 = vsub.f32 %v21129_v22, %v23554_v56  ;;  %v4913_v44 = vand.u32 4294901760, %v4912_v10  ;;  %v4920_v55 = vand.u32 4294901760, %v4919_v2 }
 0x501   :  { %17696 = vmatpush3.bf16.msra.mxu0 %v21041_v5  ;;  %v4948_v10 = vand.u32 4294901760, %v4947_v62  ;;  %v23546_v2 = vand.u32 4294901760, %v21195_v9 }
 0x502   :  { %17698 = vmatprep.subr.bf16.mxu0 %v21043_v4  ;;  %v4892_v21 = vand.u32 4294901760, %v4891_v57  ;;  %v4899_v1 = vand.u32 4294901760, %v4898_v37  ;;  %v4926_v57 = vsub.f32 %v21158_v42, %v23550_v20  ;;  %v21180_v35 = vpack.c.bf16 %v4920_v55, %v4913_v44 }
 0x503   :  { %v23548_v37 = vand.u32 4294901760, %v21175_v14  ;;  %v23545_v44 = vand.u32 4294901760, %v21200_v47 }
 0x504   :  { %v21138_v61 = vpack.c.bf16 %v4892_v21, %v4885_v7  ;;  %v21152_v12 = vpack.c.bf16 %v4906_v31, %v4899_v1  ;;  %v4927_v7 = vand.u32 4294901760, %v4926_v57  ;;  %v4934_v21 = vand.u32 4294901760, %v4933_v60 }
 0x505   :  { %17700 = vmatpush3.bf16.msra.mxu0 %v21043_v4  ;;  %v4940_v31 = vsub.f32 %v21175_v14, %v23548_v37  ;;  %v4954_v57 = vsub.f32 %v21195_v9, %v23546_v2  ;;  %v4961_v49 = vsub.f32 %v21200_v47, %v23545_v44  ;;  %v23544_v60 = vand.u32 4294901760, %v21212_v3 }
 0x506   :  { %17702 = vmatprep.subr.bf16.mxu0 %v21049_v17  ;;  %v21184_v1 = vpack.c.bf16 %v4934_v21, %v4927_v7  ;;  %v23543_v7 = vand.u32 4294901760, %v21217_v25 }
 0x507   :  { %v4941_v27 = vand.u32 4294901760, %v4940_v31  ;;  %v4955_v11 = vand.u32 4294901760, %v4954_v57  ;;  %v4962_v21 = vand.u32 4294901760, %v4961_v49  ;;  %v4968_v52 = vsub.f32 %v21212_v3, %v23544_v60 }
 0x508   :  { %v4975_v54 = vsub.f32 %v21217_v25, %v23543_v7  ;;  %v21244_v57 = vpack.c.bf16 %v21131_v34, %v21129_v22  ;;  %v21248_v49 = vpack.c.bf16 %v21148_v63, %v21146_v33 }
 0x509   :  { %17704 = vmatpush3.bf16.msra.mxu0 %v21049_v17  ;;  %v21204_v55 = vpack.c.bf16 %v4948_v10, %v4941_v27  ;;  %v21230_v53 = vpack.c.bf16 %v4962_v21, %v4955_v11  ;;  %v4969_v48 = vand.u32 4294901760, %v4968_v52  ;;  %v21236_v27 = vpack.c.bf16 %v21097_v39, %v21095_v38 }
 0x50a   :  { %17706 = vmatprep.subr.bf16.mxu0 %v21053_v8  ;;  %v4976_v31 = vand.u32 4294901760, %v4975_v54  ;;  %v21240_v10 = vpack.c.bf16 %v21115_v46, %v21113_v58  ;;  %v21252_v11 = vpack.c.bf16 %v21161_v16, %v21158_v42  ;;  %v21256_v21 = vpack.c.bf16 %v21178_v0, %v21175_v14 }
 0x50b   :  { %v21260_v52 = vpack.c.bf16 %v21200_v47, %v21195_v9  ;;  %v4676_v54 = vlaneseq  ;;  %v23683_v38 = vand.u32 4294901760, %v21129_v22  ;;  %v23688_v22 = vand.u32 4294901760, %v21161_v16 }
 0x50c   :  { %v21232_v62 = vpack.c.bf16 %v4976_v31, %v4969_v48  ;;  %v21264_v48 = vpack.c.bf16 %v21217_v25, %v21212_v3  ;;  %v23694_v16 = vand.u32 4294901760, %v21217_v25 }
 0x50d   :  { %17708 = vmatpush3.bf16.msra.mxu0 %v21053_v8  ;;  %v4677_v31 = vshrl.u32 %v4676_v54, 7 }
 0x50e   :  { %17710 = vmatprep.subr.bf16.mxu0 %v21063_v23 }
 0x50f   :  { %v21266_v7 = vsub.s32 0, %v4677_v31 }
 0x511   :  { %17712 = vmatpush3.bf16.msra.mxu0 %v21063_v23  ;;  %23679 = vst [vmem:[#allocation17_spill] sm:$0xff] %v21266_v7 }
 0x512   :  { %17714 = vmatprep.subr.bf16.mxu0 %v21073_v15 }
 0x515   :  { %17716 = vmatpush3.bf16.msra.mxu0 %v21073_v15 }
 0x516   :  { %17718 = vmatprep.subr.bf16.mxu0 %v21091_v45 }
 0x519   :  { %17720 = vmatpush3.bf16.msra.mxu0 %v21091_v45 }
 0x51a   :  { %17722 = vmatprep.subr.bf16.mxu0 %v21104_v36 }
 0x51d   :  { %17724 = vmatpush3.bf16.msra.mxu0 %v21104_v36 }
 0x51e   :  { %17726 = vmatprep.subr.bf16.mxu0 %v21133_v59 }
 0x5a7   :  { %v4223_v60 = vpop.f32.mrb[4].mxu0 }
 0x5a8   :  { %v4679_v44 = vrot.slane %v4223_v60, %v21266_v7  ;;  %v15142_v2 = vpop.f32.mrb[5].mxu0 }
 0x5aa   :  { %v4680_v43 = vmul.f32 %v4679_v44, %v20548_v30  ;;  %v4681_v37 = vmul.f32 %v20537_v6, %v4679_v44  ;;  %v4682_v40 = vmul.f32 %v4679_v44, %v20578_v24  ;;  %v4683_v20 = vmul.f32 %v20569_v41, %v4679_v44 }
 0x5d3   :  { %v4672_v28 = vpop.f32.mrb[6].mxu0 }
 0x5d4   :  { %v4687_v18 = vrot.slane %v4672_v28, %v21266_v7  ;;  %v15172_v29 = vpop.f32.mrb[7].mxu0 }
 0x5d6   :  { %v4688_v56 = vadd.f32 %v4687_v18, %v4680_v43  ;;  %v4689_v54 = vadd.f32 %v4687_v18, %v4681_v37  ;;  %v4690_v31 = vadd.f32 %v4687_v18, %v4682_v40  ;;  %v4691_v32 = vadd.f32 %v4687_v18, %v4683_v20 }
 0x5d8   :  { %v4692_v50 = vmax.f32 %v4688_v56, 0.0  ;;  %v4693_v26 = vmax.f32 %v4689_v54, 0.0  ;;  %v4694_v60 = vmax.f32 %v4690_v31, 0.0  ;;  %v4695_v2 = vmax.f32 %v4691_v32, 0.0 }
 0x5da   :  { %4700 = vst [vmem:[#allocation3 + $0x1] sm:$0xff] %v4692_v50  ;;  %4701 = vst [vmem:[#allocation3 + $0x9] sm:$0xff] %v4693_v26  ;;  %v21274_v6 = vand.u32 4294901760, %v4692_v50  ;;  %v21276_v30 = vand.u32 4294901760, %v4693_v26  ;;  %v21278_v41 = vand.u32 4294901760, %v4694_v60  ;;  %v21280_v24 = vand.u32 4294901760, %v4695_v2 }
 0x5db   :  { %4702 = vst [vmem:[#allocation3 + $0x19] sm:$0xff] %v4694_v60  ;;  %4703 = vst [vmem:[#allocation3 + $0x21] sm:$0xff] %v4695_v2 }
 0x5dc   :  { %v21283_v29 = vsub.f32 %v4692_v50, %v21274_v6  ;;  %v21286_v56 = vsub.f32 %v4693_v26, %v21276_v30  ;;  %v21289_v32 = vsub.f32 %v4694_v60, %v21278_v41  ;;  %v21292_v18 = vsub.f32 %v4695_v2, %v21280_v24 }
 0x5de   :  { %v4828_v28 = vand.u32 4294901760, %v21283_v29  ;;  %v4838_v20 = vand.u32 4294901760, %v21286_v56  ;;  %v4848_v40 = vand.u32 4294901760, %v21289_v32  ;;  %v4858_v37 = vand.u32 4294901760, %v21292_v18 }
 0x5e0   :  { %v4829_v50 = vsub.f32 %v21283_v29, %v4828_v28  ;;  %v4839_v26 = vsub.f32 %v21286_v56, %v4838_v20  ;;  %v4849_v43 = vsub.f32 %v21289_v32, %v4848_v40  ;;  %v4859_v31 = vsub.f32 %v21292_v18, %v4858_v37 }
 0x5e2   :  { %v4830_v44 = vand.u32 4294901760, %v4829_v50  ;;  %v4840_v54 = vand.u32 4294901760, %v4839_v26  ;;  %v4850_v60 = vand.u32 4294901760, %v4849_v43  ;;  %v4860_v2 = vand.u32 4294901760, %v4859_v31  ;;  %v21459_v26 = vld [vmem:[#allocation7 + $0x50] sm:$0xff]  ;;  %v21461_v43 = vld [vmem:[#allocation7 + $0x58] sm:$0xff] }
 0x5e4   :  { %15205 = vmatprep.mubr.f32.mxu0 %v4830_v44  ;;  %v21464_v44 = vld [vmem:[#allocation7 + $0x60] sm:$0xff] }
 0x5e5   :  { %15206 = vmatmul.mubr.f32.vlgmr.msra.gmra.mrb[8].mxu0 %v4840_v54  ;;  %v4705_v54 = vld [vmem:[#allocation3 + $0x8] sm:$0xff] }
 0x5e6   :  { %17728 = vmatpush3.bf16.msra.mxu0 %v21133_v59  ;;  %15208 = vmatprep.mubr.f32.mxu0 %v4850_v60  ;;  %v23680_v59 = vand.u32 4294901760, %v21097_v39  ;;  %v23684_v39 = vand.u32 4294901760, %v21131_v34 }
 0x5e7   :  { %17730 = vmatprep.subr.bf16.mxu0 %v21138_v61 }
 0x5e9   :  { %15209 = vmatmul.mubr.f32.gmra.mrb[10].mxu0 %v4860_v2 }
 0x5ea   :  { %17732 = vmatpush3.bf16.msra.mxu0 %v21138_v61  ;;  %15243 = vmatprep.mubr.f32.mxu0 %v21274_v6  ;;  %v17821_v61 = vpack.c.bf16 %v23680_v59, %v4869_v19  ;;  %v17829_v19 = vpack.c.bf16 %v23684_v39, %v23683_v38  ;;  %v5546_v59 = vand.u32 4294901760, %v21459_v26  ;;  %v4706_v38 = vld [vmem:[#allocation3 + $0x18] sm:$0xff] }
 0x5eb   :  { %17734 = vmatprep.subr.bf16.mxu0 %v21152_v12 }
 0x5ee   :  { %17736 = vmatpush3.bf16.msra.mxu0 %v21152_v12  ;;  %v23681_v12 = vand.u32 4294901760, %v21113_v58  ;;  %v23685_v58 = vand.u32 4294901760, %v21146_v33  ;;  %v23691_v33 = vand.u32 4294901760, %v21195_v9 }
 0x5ef   :  { %17738 = vmatprep.subr.bf16.mxu0 %v21180_v35 }
 0x5f2   :  { %17740 = vmatpush3.bf16.msra.mxu0 %v21180_v35  ;;  %v23682_v35 = vand.u32 4294901760, %v21115_v46  ;;  %v23686_v46 = vand.u32 4294901760, %v21148_v63  ;;  %v23692_v63 = vand.u32 4294901760, %v21200_v47  ;;  %v4710_v47 = vld [vmem:[#allocation7 + $0x10] sm:$0xff] }
 0x5f3   :  { %17742 = vmatprep.subr.bf16.mxu0 %v21184_v1  ;;  %v5522_v25 = vand.u32 4294901760, %v4710_v47 }
 0x5f6   :  { %17744 = vmatpush3.bf16.msra.mxu0 %v21184_v1  ;;  %v17825_v1 = vpack.c.bf16 %v23682_v35, %v23681_v12  ;;  %v5552_v12 = vand.u32 4294901760, %v21464_v44 }
 0x5f7   :  { %17746 = vmatprep.subr.bf16.mxu0 %v21204_v55 }
 0x5fa   :  { %17748 = vmatpush3.bf16.msra.mxu0 %v21204_v55  ;;  %v17833_v55 = vpack.c.bf16 %v23686_v46, %v23685_v58  ;;  %v4707_v58 = vld [vmem:[#allocation3 + $0x20] sm:$0xff] }
 0x5fb   :  { %17750 = vmatprep.subr.bf16.mxu0 %v21230_v53 }
 0x5fe   :  { %17752 = vmatpush3.bf16.msra.mxu0 %v21230_v53  ;;  %v23687_v53 = vand.u32 4294901760, %v21158_v42  ;;  %v23693_v42 = vand.u32 4294901760, %v21212_v3  ;;  %v4711_v3 = vld [vmem:[#allocation7 + $0x18] sm:$0xff] }
 0x5ff   :  { %17754 = vmatprep.subr.bf16.mxu0 %v21232_v62 }
 0x600   :  { %v17837_v34 = vpack.c.bf16 %v23688_v22, %v23687_v53  ;;  %v21497_v53 = vld [vmem:[#allocation7 + $0x78] sm:$0xff]  ;;  %v21499_v22 = vsub.f32 %v4710_v47, %v5522_v25 }
 0x602   :  { %17756 = vmatpush3.bf16.msra.mxu0 %v21232_v62  ;;  %v23689_v62 = vand.u32 4294901760, %v21175_v14  ;;  %v4704_v14 = vld [vmem:[#allocation3] sm:$0xff] }
 0x603   :  { %17758 = vmatprep.subr.bf16.mxu0 %v21236_v27 }
 0x605   :  { %15244 = vmatmul.mubr.f32.vlgmr.msra.gmra.mrb[8].mxu0 %v21276_v30 }
 0x606   :  { %15246 = vmatprep.mubr.f32.mxu0 %v21278_v41  ;;  %17760 = vmatpush3.bf16.msra.mxu0 %v21236_v27  ;;  %v23690_v27 = vand.u32 4294901760, %v21178_v0  ;;  %v4709_v0 = vld [vmem:[#allocation7 + $0x8] sm:$0xff] }
 0x607   :  { %17762 = vmatprep.subr.bf16.mxu0 %v21240_v10  ;;  %v5519_v9 = vand.u32 4294901760, %v4709_v0 }
 0x609   :  { %15247 = vmatmul.mubr.f32.gmra.mrb[10].mxu0 %v21280_v24  ;;  %v21470_v60 = vsub.f32 %v4709_v0, %v5519_v9 }
 0x60a   :  { %17764 = vmatpush3.bf16.msra.mxu0 %v21240_v10  ;;  %15281 = vmatprep.mubr.f32.mxu0 %v21283_v29  ;;  %v17841_v10 = vpack.c.bf16 %v23690_v27, %v23689_v62  ;;  %v21503_v62 = vand.u32 4294901760, %v4706_v38 }
 0x60b   :  { %17766 = vmatprep.subr.bf16.mxu0 %v21244_v57 }
 0x60e   :  { %17768 = vmatpush3.bf16.msra.mxu0 %v21244_v57  ;;  %v17845_v57 = vpack.c.bf16 %v23692_v63, %v23691_v33  ;;  %v21514_v33 = vand.u32 4294901760, %v4707_v58 }
 0x60f   :  { %17770 = vmatprep.subr.bf16.mxu0 %v21248_v49 }
 0x612   :  { %17772 = vmatpush3.bf16.msra.mxu0 %v21248_v49  ;;  %v17849_v49 = vpack.c.bf16 %v23694_v16, %v23693_v42 }
 0x613   :  { %17774 = vmatprep.subr.bf16.mxu0 %v21252_v11 }
 0x616   :  { %17776 = vmatpush3.bf16.msra.mxu0 %v21252_v11  ;;  %v5525_v11 = vand.u32 4294901760, %v4711_v3 }
 0x617   :  { %17778 = vmatprep.subr.bf16.mxu0 %v21256_v21 }
 0x61a   :  { %17780 = vmatpush3.bf16.msra.mxu0 %v21256_v21 }
 0x61b   :  { %17782 = vmatprep.subr.bf16.mxu0 %v21260_v52 }
 0x61e   :  { %17784 = vmatpush3.bf16.msra.mxu0 %v21260_v52  ;;  %v21431_v52 = vld [vmem:[#allocation7 + $0x28] sm:$0xff] }
 0x61f   :  { %17786 = vmatprep.subr.bf16.mxu0 %v21264_v48 }
 0x622   :  { %17788 = vmatpush3.bf16.msra.mxu0 %v21264_v48  ;;  %v21435_v48 = vpack.c.bf16 %v5525_v11, %v5522_v25 }
 0x623   :  { %17790 = vmatprep.subr.bf16.mxu0 %v21041_v5 }
 0x625   :  { %15282 = vmatmul.mubr.f32.vlgmr.msra.gmra.mrb[8].mxu0 %v21286_v56  ;;  %v4714_v56 = vld [vmem:[#allocation7 + $0x30] sm:$0xff] }
 0x626   :  { %15284 = vmatprep.mubr.f32.mxu0 %v21289_v32  ;;  %17792 = vmatpush3.bf16.msra.mxu0 %v21041_v5  ;;  %v4715_v32 = vld [vmem:[#allocation7 + $0x38] sm:$0xff] }
 0x627   :  { %17794 = vmatprep.subr.bf16.mxu0 %v21043_v4 }
 0x629   :  { %15285 = vmatmul.mubr.f32.gmra.mrb[10].mxu0 %v21292_v18  ;;  %v5534_v18 = vand.u32 4294901760, %v4714_v56 }
 0x62a   :  { %17796 = vmatpush3.bf16.msra.mxu0 %v21043_v4  ;;  %15319 = vmatprep.mubr.f32.mxu0 %v4828_v28  ;;  %v5537_v28 = vand.u32 4294901760, %v4715_v32 }
 0x62b   :  { %17798 = vmatprep.subr.bf16.mxu0 %v21049_v17  ;;  %v21540_v47 = vsub.f32 %v4714_v56, %v5534_v18 }
 0x62e   :  { %17800 = vmatpush3.bf16.msra.mxu0 %v21049_v17 }
 0x62f   :  { %17802 = vmatprep.subr.bf16.mxu0 %v21053_v8 }
 0x632   :  { %17804 = vmatpush3.bf16.msra.mxu0 %v21053_v8 }
 0x633   :  { %17806 = vmatprep.subr.bf16.mxu0 %v21063_v23 }
 0x636   :  { %17808 = vmatpush3.bf16.msra.mxu0 %v21063_v23 }
 0x637   :  { %17810 = vmatprep.subr.bf16.mxu0 %v21073_v15 }
 0x63a   :  { %17812 = vmatpush3.bf16.msra.mxu0 %v21073_v15 }
 0x63b   :  { %17814 = vmatprep.subr.bf16.mxu0 %v21091_v45 }
 0x63e   :  { %17816 = vmatpush3.bf16.msra.mxu0 %v21091_v45 }
 0x63f   :  { %17818 = vmatprep.subr.bf16.mxu0 %v21104_v36 }
 0x642   :  { %17820 = vmatpush3.bf16.msra.mxu0 %v21104_v36 }
 0x643   :  { %17822 = vmatprep.subr.bf16.mxu0 %v17821_v61 }
 0x645   :  { %15320 = vmatmul.mubr.f32.vlgmr.msra.gmra.mrb[8].mxu0 %v4838_v20 }
 0x646   :  { %15322 = vmatprep.mubr.f32.mxu0 %v4848_v40  ;;  %17824 = vmatpush3.bf16.msra.mxu0 %v17821_v61  ;;  %v21448_v40 = vld [vmem:[#allocation7 + $0x40] sm:$0xff]  ;;  %v5549_v61 = vand.u32 4294901760, %v21461_v43 }
 0x647   :  { %17826 = vmatprep.subr.bf16.mxu0 %v17825_v1 }
 0x648   :  { %v21493_v46 = vpack.c.bf16 %v5549_v61, %v5546_v59 }
 0x649   :  { %15323 = vmatmul.mubr.f32.gmra.mrb[10].mxu0 %v4858_v37  ;;  %v21450_v37 = vld [vmem:[#allocation7 + $0x48] sm:$0xff] }
 0x64a   :  { %17828 = vmatpush3.bf16.msra.mxu0 %v17825_v1  ;;  %15357 = vmatprep.mubr.f32.mxu0 %v21274_v6  ;;  %v5543_v50 = vand.u32 4294901760, %v21450_v37  ;;  %v21483_v1 = vand.u32 4294901760, %v4705_v54 }
 0x64b   :  { %17830 = vmatprep.subr.bf16.mxu0 %v17829_v19 }
 0x64e   :  { %17832 = vmatpush3.bf16.msra.mxu0 %v17829_v19  ;;  %v23567_v19 = vand.u32 4294901760, %v21470_v60 }
 0x64f   :  { %17834 = vmatprep.subr.bf16.mxu0 %v17833_v55 }
 0x650   :  { %v5647_v16 = vsub.f32 %v21470_v60, %v23567_v19 }
 0x652   :  { %17836 = vmatpush3.bf16.msra.mxu0 %v17833_v55  ;;  %v21495_v55 = vld [vmem:[#allocation7 + $0x70] sm:$0xff] }
 0x653   :  { %17838 = vmatprep.subr.bf16.mxu0 %v17837_v34  ;;  %v5558_v63 = vand.u32 4294901760, %v21495_v55 }
 0x656   :  { %17840 = vmatpush3.bf16.msra.mxu0 %v17837_v34  ;;  %v21501_v34 = vsub.f32 %v4711_v3, %v5525_v11  ;;  %v21542_v3 = vsub.f32 %v4715_v32, %v5537_v28 }
 0x657   :  { %17842 = vmatprep.subr.bf16.mxu0 %v17841_v10 }
 0x65a   :  { %17844 = vmatpush3.bf16.msra.mxu0 %v17841_v10  ;;  %v21512_v10 = vsub.f32 %v4705_v54, %v21483_v1 }
 0x65b   :  { %17846 = vmatprep.subr.bf16.mxu0 %v17845_v57 }
 0x65c   :  { %v23566_v11 = vand.u32 4294901760, %v21512_v10 }
 0x65e   :  { %17848 = vmatpush3.bf16.msra.mxu0 %v17845_v57  ;;  %v5561_v57 = vand.u32 4294901760, %v21497_v53  ;;  %v5609_v54 = vsub.f32 %v21512_v10, %v23566_v11 }
 0x65f   :  { %17850 = vmatprep.subr.bf16.mxu0 %v17849_v49 }
 0x660   :  { %v21549_v25 = vpack.c.bf16 %v5561_v57, %v5558_v63 }
 0x662   :  { %17852 = vmatpush3.bf16.msra.mxu0 %v17849_v49  ;;  %v23559_v49 = vand.u32 4294901760, %v21499_v22 }
 0x663   :  { %17854 = vmatprep.subr.bf16.mxu0 %v21041_v5 }
 0x665   :  { %15358 = vmatmul.mubr.f32.vlgmr.msra.gmra.mrb[8].mxu0 %v21276_v30 }
 0x666   :  { %15360 = vmatprep.mubr.f32.mxu0 %v21278_v41  ;;  %17856 = vmatpush3.bf16.msra.mxu0 %v21041_v5  ;;  %v4708_v5 = vld [vmem:[#allocation7] sm:$0xff] }
 0x667   :  { %17858 = vmatprep.subr.bf16.mxu0 %v21043_v4 }
 0x669   :  { %15361 = vmatmul.mubr.f32.gmra.mrb[10].mxu0 %v21280_v24 }
 0x66a   :  { %17860 = vmatpush3.bf16.msra.mxu0 %v21043_v4  ;;  %15395 = vmatprep.mubr.f32.mxu0 %v21274_v6  ;;  %v21417_v4 = vand.u32 4294901760, %v4704_v14  ;;  %v5531_v6 = vand.u32 4294901760, %v21431_v52 }
 0x66b   :  { %17862 = vmatprep.subr.bf16.mxu0 %v21049_v17 }
 0x66c   :  { %v21532_v0 = vsub.f32 %v21431_v52, %v5531_v6  ;;  %v5648_v52 = vand.u32 4294901760, %v5647_v16 }
 0x66e   :  { %17864 = vmatpush3.bf16.msra.mxu0 %v21049_v17  ;;  %v5516_v17 = vand.u32 4294901760, %v4708_v5  ;;  %v23562_v56 = vand.u32 4294901760, %v21532_v0 }
 0x66f   :  { %17866 = vmatprep.subr.bf16.mxu0 %v21053_v8 }
 0x670   :  { %v21468_v31 = vsub.f32 %v4708_v5, %v5516_v17 }
 0x672   :  { %17868 = vmatpush3.bf16.msra.mxu0 %v21053_v8  ;;  %v21422_v8 = vsub.f32 %v4704_v14, %v21417_v4  ;;  %v5639_v39 = vand.u32 4294901760, %v21468_v31  ;;  %v23558_v14 = vand.u32 4294901760, %v21501_v34 }
 0x673   :  { %17870 = vmatprep.subr.bf16.mxu0 %v21063_v23 }
 0x674   :  { %v5598_v21 = vand.u32 4294901760, %v21422_v8  ;;  %v5640_v42 = vsub.f32 %v21468_v31, %v5639_v39 }
 0x676   :  { %17872 = vmatpush3.bf16.msra.mxu0 %v21063_v23  ;;  %v21426_v23 = vpack.c.bf16 %v5519_v9, %v5516_v17  ;;  %v5599_v29 = vsub.f32 %v21422_v8, %v5598_v21  ;;  %v21535_v17 = vsub.f32 %v4706_v38, %v21503_v62  ;;  %v21538_v9 = vsub.f32 %v4707_v58, %v21514_v33 }
 0x677   :  { %17874 = vmatprep.subr.bf16.mxu0 %v21073_v15 }
 0x678   :  { %v5600_v20 = vand.u32 4294901760, %v5599_v29  ;;  %v23565_v32 = vand.u32 4294901760, %v21535_v17 }
 0x67a   :  { %17876 = vmatpush3.bf16.msra.mxu0 %v21073_v15  ;;  %v21429_v15 = vld [vmem:[#allocation7 + $0x20] sm:$0xff] }
 0x67b   :  { %17878 = vmatprep.subr.bf16.mxu0 %v21091_v45 }
 0x67e   :  { %17880 = vmatpush3.bf16.msra.mxu0 %v21091_v45  ;;  %v5528_v45 = vand.u32 4294901760, %v21429_v15 }
 0x67f   :  { %17882 = vmatprep.subr.bf16.mxu0 %v21104_v36 }
 0x680   :  { %v21529_v5 = vsub.f32 %v21429_v15, %v5528_v45  ;;  %v5641_v15 = vand.u32 4294901760, %v5640_v42  ;;  %v21577_v42 = vsub.f32 %v21450_v37, %v5543_v50 }
 0x682   :  { %17884 = vmatpush3.bf16.msra.mxu0 %v21104_v36  ;;  %v21446_v36 = vpack.c.bf16 %v5531_v6, %v5528_v45  ;;  %v5654_v45 = vsub.f32 %v21499_v22, %v23559_v49  ;;  %v5661_v6 = vsub.f32 %v21501_v34, %v23558_v14  ;;  %v23564_v29 = vand.u32 4294901760, %v21529_v5 }
 0x683   :  { %17886 = vmatprep.subr.bf16.mxu0 %v21426_v23  ;;  %v17917_v38 = vpack.c.bf16 %v5648_v52, %v5641_v15  ;;  %v5675_v15 = vsub.f32 %v21532_v0, %v23562_v56 }
 0x684   :  { %v5655_v16 = vand.u32 4294901760, %v5654_v45  ;;  %v5662_v14 = vand.u32 4294901760, %v5661_v6  ;;  %v5668_v49 = vsub.f32 %v21529_v5, %v23564_v29  ;;  %v5702_v45 = vand.u32 4294901760, %v21577_v42 }
 0x685   :  { %15396 = vmatmul.mubr.f32.vlgmr.msra.gmra.mrb[8].mxu0 %v21276_v30  ;;  %v21455_v30 = vpack.c.bf16 %v5537_v28, %v5534_v18  ;;  %v23560_v18 = vand.u32 4294901760, %v21538_v9  ;;  %v23561_v28 = vand.u32 4294901760, %v21540_v47  ;;  %v21604_v6 = vsub.f32 %v21459_v26, %v5546_v59 }
 0x686   :  { %15398 = vmatprep.mubr.f32.mxu0 %v21278_v41  ;;  %17888 = vmatpush3.bf16.msra.mxu0 %v21426_v23  ;;  %v5540_v41 = vand.u32 4294901760, %v21448_v40  ;;  %v17921_v56 = vpack.c.bf16 %v5662_v14, %v5655_v16  ;;  %v5676_v29 = vand.u32 4294901760, %v5675_v15 }
 0x687   :  { %17890 = vmatprep.subr.bf16.mxu0 %v21435_v48  ;;  %v5629_v37 = vsub.f32 %v21538_v9, %v23560_v18  ;;  %v21609_v18 = vsub.f32 %v21461_v43, %v5549_v61  ;;  %v5703_v43 = vsub.f32 %v21577_v42, %v5702_v45  ;;  %v5709_v59 = vand.u32 4294901760, %v21604_v6 }
 0x688   :  { %v21477_v2 = vpack.c.bf16 %v5543_v50, %v5540_v41  ;;  %v21572_v58 = vsub.f32 %v21448_v40, %v5540_v41  ;;  %v5619_v40 = vsub.f32 %v21535_v17, %v23565_v32  ;;  %v5682_v41 = vsub.f32 %v21540_v47, %v23561_v28 }
 0x689   :  { %15399 = vmatmul.mubr.f32.gmra.mrb[10].mxu0 %v21280_v24  ;;  %v21466_v24 = vld [vmem:[#allocation7 + $0x68] sm:$0xff]  ;;  %v5610_v28 = vand.u32 4294901760, %v5609_v54  ;;  %v5716_v61 = vand.u32 4294901760, %v21609_v18  ;;  %v5704_v16 = vand.u32 4294901760, %v5703_v43 }
 0x68a   :  { %17892 = vmatpush3.bf16.msra.mxu0 %v21435_v48  ;;  %15433 = vmatprep.mubr.f32.mxu0 %v5600_v20  ;;  %v5555_v35 = vand.u32 4294901760, %v21466_v24  ;;  %v23563_v20 = vand.u32 4294901760, %v21542_v3  ;;  %v5695_v52 = vand.u32 4294901760, %v21572_v58  ;;  %v5620_v32 = vand.u32 4294901760, %v5619_v40 }
 0x68b   :  { %17894 = vmatprep.subr.bf16.mxu0 %v21446_v36  ;;  %v5683_v11 = vand.u32 4294901760, %v5682_v41 }
 0x68c   :  { %v21509_v27 = vpack.c.bf16 %v5555_v35, %v5552_v12  ;;  %v5689_v50 = vsub.f32 %v21542_v3, %v23563_v20  ;;  %v5669_v20 = vand.u32 4294901760, %v5668_v49  ;;  %v5696_v26 = vsub.f32 %v21572_v58, %v5695_v52 }
 0x68d   :  { %v5630_v49 = vand.u32 4294901760, %v5629_v37 }
 0x68e   :  { %17896 = vmatpush3.bf16.msra.mxu0 %v21446_v36  ;;  %v5690_v19 = vand.u32 4294901760, %v5689_v50  ;;  %v17925_v14 = vpack.c.bf16 %v5676_v29, %v5669_v20  ;;  %v5710_v29 = vsub.f32 %v21604_v6, %v5709_v59 }
 0x68f   :  { %17898 = vmatprep.subr.bf16.mxu0 %v21455_v30 }
 0x690   :  { %v17929_v54 = vpack.c.bf16 %v5690_v19, %v5683_v11  ;;  %v21646_v19 = vsub.f32 %v21497_v53, %v5561_v57 }
 0x692   :  { %17900 = vmatpush3.bf16.msra.mxu0 %v21455_v30 }
 0x693   :  { %17902 = vmatprep.subr.bf16.mxu0 %v21477_v2 }
 0x696   :  { %17904 = vmatpush3.bf16.msra.mxu0 %v21477_v2 }
 0x697   :  { %17906 = vmatprep.subr.bf16.mxu0 %v21493_v46 }
 0x69a   :  { %17908 = vmatpush3.bf16.msra.mxu0 %v21493_v46 }
 0x69b   :  { %17910 = vmatprep.subr.bf16.mxu0 %v21509_v27 }
 0x69e   :  { %17912 = vmatpush3.bf16.msra.mxu0 %v21509_v27 }
 0x69f   :  { %17914 = vmatprep.subr.bf16.mxu0 %v21549_v25 }
 0x6a2   :  { %17916 = vmatpush3.bf16.msra.mxu0 %v21549_v25 }
 0x6a3   :  { %17918 = vmatprep.subr.bf16.mxu0 %v17917_v38 }
 0x6a5   :  { %15434 = vmatmul.mubr.f32.vlgmr.msra.gmra.mrb[8].mxu0 %v5610_v28  ;;  %v21627_v28 = vsub.f32 %v21466_v24, %v5555_v35  ;;  %v21641_v35 = vsub.f32 %v21495_v55, %v5558_v63  ;;  %v5744_v63 = vand.u32 4294901760, %v21646_v19 }
 0x6a6   :  { %15436 = vmatprep.mubr.f32.mxu0 %v5620_v32  ;;  %17920 = vmatpush3.bf16.msra.mxu0 %v17917_v38  ;;  %v21622_v32 = vsub.f32 %v21464_v44, %v5552_v12  ;;  %v5697_v38 = vand.u32 4294901760, %v5696_v26  ;;  %v5717_v44 = vsub.f32 %v21609_v18, %v5716_v61 }
 0x6a7   :  { %17922 = vmatprep.subr.bf16.mxu0 %v17921_v56  ;;  %v5730_v24 = vand.u32 4294901760, %v21627_v28  ;;  %v5737_v55 = vand.u32 4294901760, %v21641_v35  ;;  %v5745_v50 = vsub.f32 %v21646_v19, %v5744_v63 }
 0x6a8   :  { %v5723_v12 = vand.u32 4294901760, %v21622_v32  ;;  %v17933_v11 = vpack.c.bf16 %v5704_v16, %v5697_v38  ;;  %v5718_v20 = vand.u32 4294901760, %v5717_v44  ;;  %v17953_v38 = vpack.c.bf16 %v21501_v34, %v21499_v22 }
 0x6a9   :  { %15437 = vmatmul.mubr.f32.gmra.mrb[10].mxu0 %v5630_v49  ;;  %v5731_v40 = vsub.f32 %v21627_v28, %v5730_v24  ;;  %v5738_v41 = vsub.f32 %v21641_v35, %v5737_v55  ;;  %v5746_v49 = vand.u32 4294901760, %v5745_v50  ;;  %v17957_v16 = vpack.c.bf16 %v21532_v0, %v21529_v5 }
 0x6aa   :  { %17924 = vmatpush3.bf16.msra.mxu0 %v17921_v56  ;;  %15471 = vmatprep.mubr.f32.mxu0 %v21417_v4  ;;  %v5711_v56 = vand.u32 4294901760, %v5710_v29  ;;  %v5724_v15 = vsub.f32 %v21622_v32, %v5723_v12  ;;  %v17961_v29 = vpack.c.bf16 %v21542_v3, %v21540_v47  ;;  %v17965_v44 = vpack.c.bf16 %v21577_v42, %v21572_v58  ;;  %v6293_v58 = vld [vmem:[#allocation7 + $0x118] sm:$0xff] }
 0x6ab   :  { %17926 = vmatprep.subr.bf16.mxu0 %v17925_v14  ;;  %v5732_v37 = vand.u32 4294901760, %v5731_v40  ;;  %v5739_v43 = vand.u32 4294901760, %v5738_v41  ;;  %v23697_v40 = vand.u32 4294901760, %v21501_v34  ;;  %v23702_v41 = vand.u32 4294901760, %v21538_v9 }
 0x6ac   :  { %v17937_v53 = vpack.c.bf16 %v5718_v20, %v5711_v56  ;;  %v5725_v57 = vand.u32 4294901760, %v5724_v15  ;;  %v17973_v56 = vpack.c.bf16 %v21627_v28, %v21622_v32  ;;  %v17977_v20 = vpack.c.bf16 %v21646_v19, %v21641_v35  ;;  %v6296_v28 = vld [vmem:[#allocation7 + $0x130] sm:$0xff] }
 0x6ad   :  { %v23696_v15 = vand.u32 4294901760, %v21499_v22  ;;  %v23703_v22 = vand.u32 4294901760, %v21540_v47  ;;  %v23704_v34 = vand.u32 4294901760, %v21542_v3  ;;  %v6285_v47 = vld [vmem:[#allocation3 + $0x2] sm:$0xff]  ;;  %v6291_v3 = vld [vmem:[#allocation7 + $0x108] sm:$0xff] }
 0x6ae   :  { %17928 = vmatpush3.bf16.msra.mxu0 %v17925_v14  ;;  %v17941_v26 = vpack.c.bf16 %v5732_v37, %v5725_v57  ;;  %v17945_v14 = vpack.c.bf16 %v5746_v49, %v5739_v43  ;;  %v23698_v57 = vand.u32 4294901760, %v21512_v10  ;;  %v23699_v37 = vand.u32 4294901760, %v21535_v17  ;;  %v21801_v43 = vld [vmem:[#allocation7 + $0x158] sm:$0xff]  ;;  %v21804_v49 = vld [vmem:[#allocation7 + $0x160] sm:$0xff] }
 0x6af   :  { %17930 = vmatprep.subr.bf16.mxu0 %v17929_v54 }
 0x6b2   :  { %17932 = vmatpush3.bf16.msra.mxu0 %v17929_v54  ;;  %v17949_v54 = vpack.c.bf16 %v21470_v60, %v21468_v31  ;;  %v23700_v31 = vand.u32 4294901760, %v21529_v5  ;;  %v18029_v5 = vpack.c.bf16 %v5702_v45, %v5695_v52  ;;  %v6316_v52 = vand.u32 4294901760, %v6293_v58 }
 0x6b3   :  { %17934 = vmatprep.subr.bf16.mxu0 %v17933_v11 }
 0x6b6   :  { %17936 = vmatpush3.bf16.msra.mxu0 %v17933_v11  ;;  %v17969_v11 = vpack.c.bf16 %v21609_v18, %v21604_v6  ;;  %v6292_v18 = vld [vmem:[#allocation7 + $0x110] sm:$0xff]  ;;  %v21771_v6 = vld [vmem:[#allocation7 + $0x128] sm:$0xff] }
 0x6b7   :  { %17938 = vmatprep.subr.bf16.mxu0 %v17937_v53  ;;  %v6313_v42 = vand.u32 4294901760, %v6292_v18 }
 0x6ba   :  { %17940 = vmatpush3.bf16.msra.mxu0 %v17937_v53  ;;  %v18017_v53 = vpack.c.bf16 %v23697_v40, %v23696_v15  ;;  %v6288_v40 = vld [vmem:[#allocation3 + $0x22] sm:$0xff] }
 0x6bb   :  { %17942 = vmatprep.subr.bf16.mxu0 %v17941_v26 }
 0x6be   :  { %17944 = vmatpush3.bf16.msra.mxu0 %v17941_v26  ;;  %v21799_v26 = vld [vmem:[#allocation7 + $0x150] sm:$0xff] }
 0x6bf   :  { %17946 = vmatprep.subr.bf16.mxu0 %v17945_v14 }
 0x6c2   :  { %17948 = vmatpush3.bf16.msra.mxu0 %v17945_v14  ;;  %v6286_v14 = vld [vmem:[#allocation3 + $0xa] sm:$0xff] }
 0x6c3   :  { %17950 = vmatprep.subr.bf16.mxu0 %v17949_v54 }
 0x6c5   :  { %15472 = vmatmul.mubr.f32.vlgmr.msra.gmra.mrb[8].mxu0 %v21483_v1 }
 0x6c6   :  { %15474 = vmatprep.mubr.f32.mxu0 %v21503_v62  ;;  %17952 = vmatpush3.bf16.msra.mxu0 %v17949_v54 }
 0x6c7   :  { %17954 = vmatprep.subr.bf16.mxu0 %v17953_v38 }
 0x6c9   :  { %15475 = vmatmul.mubr.f32.gmra.mrb[10].mxu0 %v21514_v33 }
 0x6ca   :  { %17956 = vmatpush3.bf16.msra.mxu0 %v17953_v38  ;;  %15509 = vmatprep.mubr.f32.mxu0 %v21422_v8  ;;  %v23695_v8 = vand.u32 4294901760, %v21470_v60  ;;  %v23701_v60 = vand.u32 4294901760, %v21532_v0  ;;  %v18033_v0 = vpack.c.bf16 %v5716_v61, %v5709_v59  ;;  %v21775_v59 = vpack.c.bf16 %v6316_v52, %v6313_v42 }
 0x6cb   :  { %17958 = vmatprep.subr.bf16.mxu0 %v17957_v16  ;;  %v6322_v61 = vand.u32 4294901760, %v21771_v6 }
 0x6ce   :  { %17960 = vmatpush3.bf16.msra.mxu0 %v17957_v16 }
 0x6cf   :  { %17962 = vmatprep.subr.bf16.mxu0 %v17961_v29 }
 0x6d2   :  { %17964 = vmatpush3.bf16.msra.mxu0 %v17961_v29  ;;  %v6337_v29 = vand.u32 4294901760, %v21799_v26 }
 0x6d3   :  { %17966 = vmatprep.subr.bf16.mxu0 %v17965_v44 }
 0x6d6   :  { %17968 = vmatpush3.bf16.msra.mxu0 %v17965_v44  ;;  %v6340_v44 = vand.u32 4294901760, %v21801_v43 }
 0x6d7   :  { %17970 = vmatprep.subr.bf16.mxu0 %v17969_v11 }
 0x6da   :  { %17972 = vmatpush3.bf16.msra.mxu0 %v17969_v11  ;;  %v6343_v11 = vand.u32 4294901760, %v21804_v49 }
 0x6db   :  { %17974 = vmatprep.subr.bf16.mxu0 %v17973_v56 }
 0x6de   :  { %17976 = vmatpush3.bf16.msra.mxu0 %v17973_v56 }
 0x6df   :  { %17978 = vmatprep.subr.bf16.mxu0 %v17977_v20 }
 0x6e2   :  { %17980 = vmatpush3.bf16.msra.mxu0 %v17977_v20  ;;  %v21823_v20 = vand.u32 4294901760, %v6286_v14 }
 0x6e3   :  { %17982 = vmatprep.subr.bf16.mxu0 %v21426_v23 }
 0x6e5   :  { %15510 = vmatmul.mubr.f32.vlgmr.msra.gmra.mrb[8].mxu0 %v21512_v10  ;;  %v18025_v10 = vpack.c.bf16 %v23704_v34, %v23703_v22  ;;  %v21852_v22 = vsub.f32 %v6286_v14, %v21823_v20  ;;  %v21854_v34 = vand.u32 4294901760, %v6288_v40 }
 0x6e6   :  { %15512 = vmatprep.mubr.f32.mxu0 %v21535_v17  ;;  %17984 = vmatpush3.bf16.msra.mxu0 %v21426_v23  ;;  %v18037_v17 = vpack.c.bf16 %v5730_v24, %v5723_v12  ;;  %v6297_v12 = vld [vmem:[#allocation7 + $0x138] sm:$0xff]  ;;  %v6325_v24 = vand.u32 4294901760, %v6296_v28 }
 0x6e7   :  { %17986 = vmatprep.subr.bf16.mxu0 %v21435_v48  ;;  %v6328_v35 = vand.u32 4294901760, %v6297_v12 }
 0x6e9   :  { %15513 = vmatmul.mubr.f32.gmra.mrb[10].mxu0 %v21538_v9  ;;  %v18041_v9 = vpack.c.bf16 %v5744_v63, %v5737_v55  ;;  %v21788_v55 = vld [vmem:[#allocation7 + $0x140] sm:$0xff]  ;;  %v21790_v63 = vld [vmem:[#allocation7 + $0x148] sm:$0xff] }
 0x6ea   :  { %17988 = vmatpush3.bf16.msra.mxu0 %v21435_v48  ;;  %15547 = vmatprep.mubr.f32.mxu0 %v5598_v21  ;;  %v18013_v21 = vpack.c.bf16 %v23695_v8, %v5639_v39  ;;  %v18021_v39 = vpack.c.bf16 %v23701_v60, %v23700_v31  ;;  %v6334_v50 = vand.u32 4294901760, %v21790_v63  ;;  %v6287_v8 = vld [vmem:[#allocation3 + $0x1a] sm:$0xff]  ;;  %v21839_v31 = vsub.f32 %v6292_v18, %v6313_v42 }
 0x6eb   :  { %17990 = vmatprep.subr.bf16.mxu0 %v21446_v36  ;;  %v21841_v60 = vsub.f32 %v6293_v58, %v6316_v52  ;;  %v21878_v18 = vsub.f32 %v6296_v28, %v6325_v24  ;;  %v21880_v58 = vsub.f32 %v6297_v12, %v6328_v35 }
 0x6ee   :  { %17992 = vmatpush3.bf16.msra.mxu0 %v21446_v36 }
 0x6ef   :  { %17994 = vmatprep.subr.bf16.mxu0 %v21455_v30 }
 0x6f2   :  { %17996 = vmatpush3.bf16.msra.mxu0 %v21455_v30 }
 0x6f3   :  { %17998 = vmatprep.subr.bf16.mxu0 %v21477_v2 }
 0x6f6   :  { %18000 = vmatpush3.bf16.msra.mxu0 %v21477_v2 }
 0x6f7   :  { %18002 = vmatprep.subr.bf16.mxu0 %v21493_v46 }
 0x6fa   :  { %18004 = vmatpush3.bf16.msra.mxu0 %v21493_v46 }
 0x6fb   :  { %18006 = vmatprep.subr.bf16.mxu0 %v21509_v27 }
 0x6fe   :  { %18008 = vmatpush3.bf16.msra.mxu0 %v21509_v27 }
 0x6ff   :  { %18010 = vmatprep.subr.bf16.mxu0 %v21549_v25 }
 0x702   :  { %18012 = vmatpush3.bf16.msra.mxu0 %v21549_v25 }
 0x703   :  { %18014 = vmatprep.subr.bf16.mxu0 %v18013_v21 }
 0x705   :  { %15548 = vmatmul.mubr.f32.vlgmr.msra.gmra.mrb[8].mxu0 %v23698_v57  ;;  %v21835_v57 = vld [vmem:[#allocation7 + $0x170] sm:$0xff] }
 0x706   :  { %15550 = vmatprep.mubr.f32.mxu0 %v23699_v37  ;;  %18016 = vmatpush3.bf16.msra.mxu0 %v18013_v21  ;;  %v21837_v37 = vld [vmem:[#allocation7 + $0x178] sm:$0xff] }
 0x707   :  { %18018 = vmatprep.subr.bf16.mxu0 %v18017_v53 }
 0x709   :  { %15551 = vmatmul.mubr.f32.gmra.mrb[10].mxu0 %v23702_v41 }
 0x70a   :  { %18020 = vmatpush3.bf16.msra.mxu0 %v18017_v53  ;;  %15585 = vmatprep.mubr.f32.mxu0 %v21417_v4  ;;  %v21833_v53 = vpack.c.bf16 %v6340_v44, %v6337_v29 }
 0x70b   :  { %18022 = vmatprep.subr.bf16.mxu0 %v18021_v39 }
 0x70e   :  { %18024 = vmatpush3.bf16.msra.mxu0 %v18021_v39  ;;  %v21843_v39 = vand.u32 4294901760, %v6287_v8 }
 0x70f   :  { %18026 = vmatprep.subr.bf16.mxu0 %v18025_v10 }
 0x712   :  { %18028 = vmatpush3.bf16.msra.mxu0 %v18025_v10  ;;  %v6349_v10 = vand.u32 4294901760, %v21835_v57 }
 0x713   :  { %18030 = vmatprep.subr.bf16.mxu0 %v18029_v5 }
 0x716   :  { %18032 = vmatpush3.bf16.msra.mxu0 %v18029_v5  ;;  %v6352_v5 = vand.u32 4294901760, %v21837_v37 }
 0x717   :  { %18034 = vmatprep.subr.bf16.mxu0 %v18033_v0 }
 0x718   :  { %v21887_v42 = vpack.c.bf16 %v6352_v5, %v6349_v10 }
 0x71a   :  { %18036 = vmatpush3.bf16.msra.mxu0 %v18033_v0 }
 0x71b   :  { %18038 = vmatprep.subr.bf16.mxu0 %v18037_v17 }
 0x71e   :  { %18040 = vmatpush3.bf16.msra.mxu0 %v18037_v17 }
 0x71f   :  { %18042 = vmatprep.subr.bf16.mxu0 %v18041_v9 }
 0x722   :  { %18044 = vmatpush3.bf16.msra.mxu0 %v18041_v9  ;;  %v23575_v9 = vand.u32 4294901760, %v21839_v31 }
 0x723   :  { %18046 = vmatprep.subr.bf16.mxu0 %v21426_v23 }
 0x725   :  { %15586 = vmatmul.mubr.f32.vlgmr.msra.gmra.mrb[8].mxu0 %v21483_v1 }
 0x726   :  { %15588 = vmatprep.mubr.f32.mxu0 %v21503_v62  ;;  %18048 = vmatpush3.bf16.msra.mxu0 %v21426_v23  ;;  %v6290_v23 = vld [vmem:[#allocation7 + $0x100] sm:$0xff] }
 0x727   :  { %18050 = vmatprep.subr.bf16.mxu0 %v21435_v48 }
 0x729   :  { %15589 = vmatmul.mubr.f32.gmra.mrb[10].mxu0 %v21514_v33 }
 0x72a   :  { %18052 = vmatpush3.bf16.msra.mxu0 %v21435_v48  ;;  %15623 = vmatprep.mubr.f32.mxu0 %v21417_v4  ;;  %v21757_v48 = vand.u32 4294901760, %v6285_v47  ;;  %v6307_v4 = vand.u32 4294901760, %v6290_v23 }
 0x72b   :  { %18054 = vmatprep.subr.bf16.mxu0 %v21446_v36 }
 0x72c   :  { %v21808_v54 = vsub.f32 %v6290_v23, %v6307_v4 }
 0x72e   :  { %18056 = vmatpush3.bf16.msra.mxu0 %v21446_v36  ;;  %v6310_v36 = vand.u32 4294901760, %v6291_v3  ;;  %v6430_v21 = vand.u32 4294901760, %v21808_v54 }
 0x72f   :  { %18058 = vmatprep.subr.bf16.mxu0 %v21455_v30 }
 0x730   :  { %v21810_v38 = vsub.f32 %v6291_v3, %v6310_v36  ;;  %v6431_v0 = vsub.f32 %v21808_v54, %v6430_v21  ;;  %v21872_v3 = vsub.f32 %v21771_v6, %v6322_v61  ;;  %v21890_v6 = vsub.f32 %v6288_v40, %v21854_v34 }
 0x732   :  { %18060 = vmatpush3.bf16.msra.mxu0 %v21455_v30  ;;  %v21762_v30 = vsub.f32 %v6285_v47, %v21757_v48  ;;  %v23576_v15 = vand.u32 4294901760, %v21810_v38  ;;  %v23574_v47 = vand.u32 4294901760, %v21841_v60  ;;  %v6432_v52 = vand.u32 4294901760, %v6431_v0 }
 0x733   :  { %18062 = vmatprep.subr.bf16.mxu0 %v21477_v2  ;;  %v23569_v28 = vand.u32 4294901760, %v21872_v3  ;;  %v21917_v0 = vsub.f32 %v21790_v63, %v6334_v50 }
 0x734   :  { %v6389_v45 = vand.u32 4294901760, %v21762_v30  ;;  %v6438_v17 = vsub.f32 %v21810_v38, %v23576_v15 }
 0x736   :  { %18064 = vmatpush3.bf16.msra.mxu0 %v21477_v2  ;;  %v21766_v2 = vpack.c.bf16 %v6310_v36, %v6307_v4  ;;  %v6390_v32 = vsub.f32 %v21762_v30, %v6389_v45  ;;  %v21875_v4 = vsub.f32 %v6287_v8, %v21843_v39  ;;  %v23568_v36 = vand.u32 4294901760, %v21852_v22 }
 0x737   :  { %18066 = vmatprep.subr.bf16.mxu0 %v21493_v46  ;;  %v6419_v8 = vand.u32 4294901760, %v21890_v6 }
 0x738   :  { %v6391_v19 = vand.u32 4294901760, %v6390_v32  ;;  %v23573_v12 = vand.u32 4294901760, %v21875_v4 }
 0x73a   :  { %18068 = vmatpush3.bf16.msra.mxu0 %v21493_v46  ;;  %v21769_v46 = vld [vmem:[#allocation7 + $0x120] sm:$0xff] }
 0x73b   :  { %18070 = vmatprep.subr.bf16.mxu0 %v21509_v27 }
 0x73e   :  { %18072 = vmatpush3.bf16.msra.mxu0 %v21509_v27  ;;  %v6319_v27 = vand.u32 4294901760, %v21769_v46 }
 0x73f   :  { %18074 = vmatprep.subr.bf16.mxu0 %v21549_v25 }
 0x740   :  { %v21869_v23 = vsub.f32 %v21769_v46, %v6319_v27  ;;  %v6439_v46 = vand.u32 4294901760, %v6438_v17 }
 0x742   :  { %18076 = vmatpush3.bf16.msra.mxu0 %v21549_v25  ;;  %v21786_v25 = vpack.c.bf16 %v6322_v61, %v6319_v27  ;;  %v6445_v27 = vsub.f32 %v21839_v31, %v23575_v9  ;;  %v6452_v61 = vsub.f32 %v21841_v60, %v23574_v47  ;;  %v23572_v32 = vand.u32 4294901760, %v21869_v23 }
 0x743   :  { %18078 = vmatprep.subr.bf16.mxu0 %v21766_v2  ;;  %v18109_v14 = vpack.c.bf16 %v6439_v46, %v6432_v52  ;;  %v6466_v46 = vsub.f32 %v21872_v3, %v23569_v28  ;;  %v21941_v28 = vsub.f32 %v21799_v26, %v6337_v29 }
 0x744   :  { %v6446_v17 = vand.u32 4294901760, %v6445_v27  ;;  %v6459_v52 = vsub.f32 %v21869_v23, %v23572_v32 }
 0x745   :  { %15624 = vmatmul.mubr.f32.vlgmr.msra.gmra.mrb[8].mxu0 %v21483_v1  ;;  %v21795_v1 = vpack.c.bf16 %v6328_v35, %v6325_v24  ;;  %v6400_v24 = vsub.f32 %v21852_v22, %v23568_v36  ;;  %v23571_v35 = vand.u32 4294901760, %v21878_v18  ;;  %v6453_v36 = vand.u32 4294901760, %v6452_v61 }
 0x746   :  { %15626 = vmatprep.mubr.f32.mxu0 %v21503_v62  ;;  %18080 = vmatpush3.bf16.msra.mxu0 %v21766_v2  ;;  %v6331_v62 = vand.u32 4294901760, %v21788_v55  ;;  %v6493_v61 = vand.u32 4294901760, %v21917_v0  ;;  %v6460_v32 = vand.u32 4294901760, %v6459_v52  ;;  %v6500_v29 = vand.u32 4294901760, %v21941_v28 }
 0x747   :  { %18082 = vmatprep.subr.bf16.mxu0 %v21775_v59  ;;  %v6473_v63 = vsub.f32 %v21878_v18, %v23571_v35  ;;  %v18113_v35 = vpack.c.bf16 %v6453_v36, %v6446_v17 }
 0x748   :  { %v21817_v16 = vpack.c.bf16 %v6334_v50, %v6331_v62  ;;  %v21912_v40 = vsub.f32 %v21788_v55, %v6331_v62  ;;  %v6410_v55 = vsub.f32 %v21875_v4, %v23573_v12  ;;  %v6401_v62 = vand.u32 4294901760, %v6400_v24 }
 0x749   :  { %15627 = vmatmul.mubr.f32.gmra.mrb[10].mxu0 %v21514_v33  ;;  %v21806_v33 = vld [vmem:[#allocation7 + $0x168] sm:$0xff]  ;;  %v21946_v24 = vsub.f32 %v21801_v43, %v6340_v44  ;;  %v6467_v12 = vand.u32 4294901760, %v6466_v46  ;;  %v6474_v9 = vand.u32 4294901760, %v6473_v63  ;;  %v6494_v43 = vsub.f32 %v21917_v0, %v6493_v61 }
 0x74a   :  { %18084 = vmatpush3.bf16.msra.mxu0 %v21775_v59  ;;  %15661 = vmatprep.mubr.f32.mxu0 %v6391_v19  ;;  %v6346_v56 = vand.u32 4294901760, %v21806_v33  ;;  %v23570_v19 = vand.u32 4294901760, %v21880_v58  ;;  %v6486_v27 = vand.u32 4294901760, %v21912_v40  ;;  %v6411_v47 = vand.u32 4294901760, %v6410_v55 }
 0x74b   :  { %18086 = vmatprep.subr.bf16.mxu0 %v21786_v25  ;;  %v6507_v44 = vand.u32 4294901760, %v21946_v24  ;;  %v18117_v17 = vpack.c.bf16 %v6467_v12, %v6460_v32  ;;  %v6495_v55 = vand.u32 4294901760, %v6494_v43  ;;  %v6501_v32 = vsub.f32 %v21941_v28, %v6500_v29 }
 0x74c   :  { %v21849_v41 = vpack.c.bf16 %v6346_v56, %v6343_v11  ;;  %v6480_v50 = vsub.f32 %v21880_v58, %v23570_v19  ;;  %v6420_v19 = vsub.f32 %v21890_v6, %v6419_v8  ;;  %v6487_v26 = vsub.f32 %v21912_v40, %v6486_v27 }
 0x74d   :  { %v6502_v12 = vand.u32 4294901760, %v6501_v32  ;;  %v18149_v32 = vpack.c.bf16 %v21872_v3, %v21869_v23 }
 0x74e   :  { %18088 = vmatpush3.bf16.msra.mxu0 %v21786_v25  ;;  %v6481_v15 = vand.u32 4294901760, %v6480_v50  ;;  %v6421_v36 = vand.u32 4294901760, %v6420_v19  ;;  %v6488_v46 = vand.u32 4294901760, %v6487_v26 }
 0x74f   :  { %18090 = vmatprep.subr.bf16.mxu0 %v21795_v1 }
 0x750   :  { %v18121_v52 = vpack.c.bf16 %v6481_v15, %v6474_v9  ;;  %v21986_v15 = vsub.f32 %v21837_v37, %v6352_v5  ;;  %v18125_v9 = vpack.c.bf16 %v6495_v55, %v6488_v46  ;;  %v18141_v46 = vpack.c.bf16 %v21810_v38, %v21808_v54 }
 0x751   :  { %v18145_v55 = vpack.c.bf16 %v21841_v60, %v21839_v31  ;;  %v23710_v54 = vand.u32 4294901760, %v21869_v23  ;;  %v18221_v23 = vpack.c.bf16 %v6493_v61, %v6486_v27  ;;  %v7094_v27 = vld [vmem:[%s23506_s12 + $0x70] sm:$0xff]  ;;  %v7095_v61 = vld [vmem:[%s23506_s12 + $0x78] sm:$0xff] }
 0x752   :  { %18092 = vmatpush3.bf16.msra.mxu0 %v21795_v1 }
 0x753   :  { %18094 = vmatprep.subr.bf16.mxu0 %v21817_v16 }
 0x756   :  { %18096 = vmatpush3.bf16.msra.mxu0 %v21817_v16 }
 0x757   :  { %18098 = vmatprep.subr.bf16.mxu0 %v21833_v53 }
 0x75a   :  { %18100 = vmatpush3.bf16.msra.mxu0 %v21833_v53 }
 0x75b   :  { %18102 = vmatprep.subr.bf16.mxu0 %v21849_v41 }
 0x75e   :  { %18104 = vmatpush3.bf16.msra.mxu0 %v21849_v41 }
 0x75f   :  { %18106 = vmatprep.subr.bf16.mxu0 %v21887_v42 }
 0x762   :  { %18108 = vmatpush3.bf16.msra.mxu0 %v21887_v42 }
 0x763   :  { %18110 = vmatprep.subr.bf16.mxu0 %v18109_v14 }
 0x765   :  { %15662 = vmatmul.mubr.f32.vlgmr.msra.gmra.mrb[8].mxu0 %v6401_v62 }
 0x766   :  { %15664 = vmatprep.mubr.f32.mxu0 %v6411_v47  ;;  %18112 = vmatpush3.bf16.msra.mxu0 %v18109_v14  ;;  %v21962_v47 = vsub.f32 %v21804_v49, %v6343_v11  ;;  %v21967_v14 = vsub.f32 %v21806_v33, %v6346_v56  ;;  %v6508_v49 = vsub.f32 %v21946_v24, %v6507_v44 }
 0x767   :  { %18114 = vmatprep.subr.bf16.mxu0 %v18113_v35  ;;  %v21981_v56 = vsub.f32 %v21835_v57, %v6349_v10  ;;  %v23581_v10 = vand.u32 4294901760, %v21986_v15 }
 0x768   :  { %v23586_v11 = vand.u32 4294901760, %v21962_v47  ;;  %v23585_v33 = vand.u32 4294901760, %v21967_v14 }
 0x769   :  { %15665 = vmatmul.mubr.f32.gmra.mrb[10].mxu0 %v6421_v36  ;;  %v23584_v57 = vand.u32 4294901760, %v21981_v56  ;;  %v6536_v26 = vsub.f32 %v21986_v15, %v23581_v10  ;;  %v22093_v10 = vld [vmem:[%s23506_s12 + $0x48] sm:$0xff] }
 0x76a   :  { %18116 = vmatpush3.bf16.msra.mxu0 %v18113_v35  ;;  %15699 = vmatprep.mubr.f32.mxu0 %v21757_v48  ;;  %v6509_v35 = vand.u32 4294901760, %v6508_v49  ;;  %v6515_v19 = vsub.f32 %v21962_v47, %v23586_v11  ;;  %v6522_v62 = vsub.f32 %v21967_v14, %v23585_v33  ;;  %v22014_v49 = vld [vmem:[%s23506_s12] sm:$0xff]  ;;  %v23588_v33 = vand.u32 4294901760, %v22093_v10 }
 0x76b   :  { %18118 = vmatprep.subr.bf16.mxu0 %v18117_v17  ;;  %v6529_v50 = vsub.f32 %v21981_v56, %v23584_v57 }
 0x76c   :  { %v18129_v37 = vpack.c.bf16 %v6509_v35, %v6502_v12  ;;  %v6516_v5 = vand.u32 4294901760, %v6515_v19  ;;  %v6523_v63 = vand.u32 4294901760, %v6522_v62  ;;  %v22024_v12 = vld [vmem:[%s23506_s12 + $0x10] sm:$0xff]  ;;  %v23580_v35 = vand.u32 4294901760, %v22014_v49  ;;  %v22032_v62 = vld [vmem:[%s23506_s12 + $0x18] sm:$0xff] }
 0x76d   :  { %v6530_v36 = vand.u32 4294901760, %v6529_v50  ;;  %v18153_v50 = vpack.c.bf16 %v21880_v58, %v21878_v18 }
 0x76e   :  { %18120 = vmatpush3.bf16.msra.mxu0 %v18117_v17  ;;  %v18133_v43 = vpack.c.bf16 %v6523_v63, %v6516_v5  ;;  %v6537_v17 = vand.u32 4294901760, %v6536_v26  ;;  %v22038_v5 = vld [vmem:[%s23506_s12 + $0x20] sm:$0xff]  ;;  %v22043_v63 = vld [vmem:[%s23506_s12 + $0x28] sm:$0xff]  ;;  %v23578_v26 = vand.u32 4294901760, %v22032_v62 }
 0x76f   :  { %18122 = vmatprep.subr.bf16.mxu0 %v18121_v52 }
 0x772   :  { %18124 = vmatpush3.bf16.msra.mxu0 %v18121_v52  ;;  %v18137_v52 = vpack.c.bf16 %v6537_v17, %v6530_v36  ;;  %v23583_v36 = vand.u32 4294901760, %v22038_v5  ;;  %v23582_v17 = vand.u32 4294901760, %v22043_v63 }
 0x773   :  { %18126 = vmatprep.subr.bf16.mxu0 %v18125_v9 }
 0x776   :  { %18128 = vmatpush3.bf16.msra.mxu0 %v18125_v9  ;;  %v22019_v9 = vld [vmem:[%s23506_s12 + $0x8] sm:$0xff] }
 0x777   :  { %18130 = vmatprep.subr.bf16.mxu0 %v18129_v37  ;;  %v23577_v19 = vand.u32 4294901760, %v22019_v9 }
 0x77a   :  { %18132 = vmatpush3.bf16.msra.mxu0 %v18129_v37  ;;  %v23579_v37 = vand.u32 4294901760, %v22024_v12 }
 0x77b   :  { %18134 = vmatprep.subr.bf16.mxu0 %v18133_v43 }
 0x77e   :  { %18136 = vmatpush3.bf16.msra.mxu0 %v18133_v43  ;;  %v22052_v43 = vpack.c.bf16 %v23577_v19, %v23580_v35  ;;  %v18157_v19 = vpack.c.bf16 %v21917_v0, %v21912_v40  ;;  %v22088_v35 = vld [vmem:[%s23506_s12 + $0x40] sm:$0xff] }
 0x77f   :  { %18138 = vmatprep.subr.bf16.mxu0 %v18137_v52  ;;  %v7121_v57 = vand.u32 4294901760, %v22088_v35 }
 0x780   :  { %18270 = vmatprep.subr.bf16.mxu1 %v22052_v43 }
 0x781   :  { %18272 = vmatpush3.bf16.msra.mxu1 %v22052_v43  ;;  %v22115_v11 = vpack.c.bf16 %v23588_v33, %v7121_v57  ;;  %v23709_v33 = vand.u32 4294901760, %v21875_v4 }
 0x782   :  { %18140 = vmatpush3.bf16.msra.mxu0 %v18137_v52  ;;  %v22060_v52 = vpack.c.bf16 %v23578_v26, %v23579_v37  ;;  %v22081_v26 = vpack.c.bf16 %v23582_v17, %v23583_v36  ;;  %v18161_v17 = vpack.c.bf16 %v21946_v24, %v21941_v28  ;;  %v23719_v28 = vand.u32 4294901760, %v22019_v9 }
 0x783   :  { %18142 = vmatprep.subr.bf16.mxu0 %v18141_v46  ;;  %v7139_v24 = vand.u32 4294901760, %v7094_v27 }
 0x784   :  { %18274 = vmatprep.subr.bf16.mxu1 %v22060_v52  ;;  %v22243_v0 = vsub.f32 %v22019_v9, %v23719_v28 }
 0x785   :  { %15700 = vmatmul.mubr.f32.vlgmr.msra.gmra.mrb[8].mxu0 %v21823_v20  ;;  %18276 = vmatpush3.bf16.msra.mxu1 %v22060_v52 }
 0x786   :  { %15702 = vmatprep.mubr.f32.mxu0 %v21843_v39  ;;  %18144 = vmatpush3.bf16.msra.mxu0 %v18141_v46  ;;  %v22065_v46 = vld [vmem:[%s23506_s12 + $0x30] sm:$0xff] }
 0x787   :  { %18146 = vmatprep.subr.bf16.mxu0 %v18145_v55  ;;  %v7115_v37 = vand.u32 4294901760, %v22065_v46  ;;  %18278 = vmatprep.subr.bf16.mxu1 %v22081_v26 }
 0x789   :  { %15703 = vmatmul.mubr.f32.gmra.mrb[10].mxu0 %v21854_v34  ;;  %18280 = vmatpush3.bf16.msra.mxu1 %v22081_v26 }
 0x78a   :  { %18148 = vmatpush3.bf16.msra.mxu0 %v18145_v55  ;;  %15737 = vmatprep.mubr.f32.mxu0 %v21762_v30  ;;  %v22070_v55 = vld [vmem:[%s23506_s12 + $0x38] sm:$0xff]  ;;  %v23705_v30 = vand.u32 4294901760, %v21810_v38  ;;  %v23711_v38 = vand.u32 4294901760, %v21872_v3  ;;  %v18225_v3 = vpack.c.bf16 %v6507_v44, %v6500_v29  ;;  %v7142_v29 = vand.u32 4294901760, %v7095_v61 }
 0x78b   :  { %18150 = vmatprep.subr.bf16.mxu0 %v18149_v32 }
 0x78e   :  { %18152 = vmatpush3.bf16.msra.mxu0 %v18149_v32  ;;  %v23587_v32 = vand.u32 4294901760, %v22070_v55 }
 0x78f   :  { %18154 = vmatprep.subr.bf16.mxu0 %v18153_v50 }
 0x790   :  { %v22103_v36 = vpack.c.bf16 %v23587_v32, %v7115_v37  ;;  %v18169_v32 = vpack.c.bf16 %v21986_v15, %v21981_v56 }
 0x792   :  { %18156 = vmatpush3.bf16.msra.mxu0 %v18153_v50  ;;  %v18165_v50 = vpack.c.bf16 %v21967_v14, %v21962_v47  ;;  %18282 = vmatprep.subr.bf16.mxu1 %v22103_v36 }
 0x793   :  { %18158 = vmatprep.subr.bf16.mxu0 %v18157_v19  ;;  %18284 = vmatpush3.bf16.msra.mxu1 %v22103_v36 }
 0x794   :  { %18286 = vmatprep.subr.bf16.mxu1 %v22115_v11 }
 0x796   :  { %18160 = vmatpush3.bf16.msra.mxu0 %v18157_v19  ;;  %v23706_v19 = vand.u32 4294901760, %v21839_v31  ;;  %v23712_v31 = vand.u32 4294901760, %v21878_v18  ;;  %v23715_v18 = vand.u32 4294901760, %v21967_v14  ;;  %v22257_v14 = vpack.c.bf16 %v7142_v29, %v7139_v24 }
 0x797   :  { %18162 = vmatprep.subr.bf16.mxu0 %v18161_v17  ;;  %18288 = vmatpush3.bf16.msra.mxu1 %v22115_v11 }
 0x79a   :  { %18164 = vmatpush3.bf16.msra.mxu0 %v18161_v17  ;;  %v23707_v17 = vand.u32 4294901760, %v21841_v60  ;;  %v23713_v60 = vand.u32 4294901760, %v21880_v58 }
 0x79b   :  { %18166 = vmatprep.subr.bf16.mxu0 %v18165_v50 }
 0x79e   :  { %18168 = vmatpush3.bf16.msra.mxu0 %v18165_v50  ;;  %v23708_v50 = vand.u32 4294901760, %v21852_v22 }
 0x79f   :  { %18170 = vmatprep.subr.bf16.mxu0 %v18169_v32 }
 0x7a2   :  { %18172 = vmatpush3.bf16.msra.mxu0 %v18169_v32  ;;  %v18209_v32 = vpack.c.bf16 %v23707_v17, %v23706_v19 }
 0x7a3   :  { %18174 = vmatprep.subr.bf16.mxu0 %v21766_v2 }
 0x7a5   :  { %15738 = vmatmul.mubr.f32.vlgmr.msra.gmra.mrb[8].mxu0 %v21852_v22  ;;  %v18217_v22 = vpack.c.bf16 %v23713_v60, %v23712_v31 }
 0x7a6   :  { %15740 = vmatprep.mubr.f32.mxu0 %v21875_v4  ;;  %18176 = vmatpush3.bf16.msra.mxu0 %v21766_v2  ;;  %v23714_v4 = vand.u32 4294901760, %v21962_v47  ;;  %v23600_v47 = vand.u32 4294901760, %v22243_v0 }
 0x7a7   :  { %18178 = vmatprep.subr.bf16.mxu0 %v21775_v59 }
 0x7a8   :  { %v18229_v58 = vpack.c.bf16 %v23715_v18, %v23714_v4  ;;  %v22299_v18 = vsub.f32 %v7094_v27, %v7139_v24 }
 0x7a9   :  { %15741 = vmatmul.mubr.f32.gmra.mrb[10].mxu0 %v21890_v6  ;;  %v23716_v6 = vand.u32 4294901760, %v21981_v56  ;;  %v7228_v56 = vsub.f32 %v22243_v0, %v23600_v47 }
 0x7aa   :  { %18180 = vmatpush3.bf16.msra.mxu0 %v21775_v59  ;;  %15775 = vmatprep.mubr.f32.mxu0 %v6389_v45  ;;  %v18205_v45 = vpack.c.bf16 %v23705_v30, %v6430_v21  ;;  %v18213_v21 = vpack.c.bf16 %v23711_v38, %v23710_v54 }
 0x7ab   :  { %18182 = vmatprep.subr.bf16.mxu0 %v21786_v25 }
 0x7ae   :  { %18184 = vmatpush3.bf16.msra.mxu0 %v21786_v25 }
 0x7af   :  { %18186 = vmatprep.subr.bf16.mxu0 %v21795_v1 }
 0x7b2   :  { %18188 = vmatpush3.bf16.msra.mxu0 %v21795_v1 }
 0x7b3   :  { %18190 = vmatprep.subr.bf16.mxu0 %v21817_v16 }
 0x7b6   :  { %18192 = vmatpush3.bf16.msra.mxu0 %v21817_v16 }
 0x7b7   :  { %18194 = vmatprep.subr.bf16.mxu0 %v21833_v53 }
 0x7ba   :  { %18196 = vmatpush3.bf16.msra.mxu0 %v21833_v53 }
 0x7bb   :  { %18198 = vmatprep.subr.bf16.mxu0 %v21849_v41 }
 0x7be   :  { %18200 = vmatpush3.bf16.msra.mxu0 %v21849_v41 }
 0x7bf   :  { %18202 = vmatprep.subr.bf16.mxu0 %v21887_v42 }
 0x7c2   :  { %18204 = vmatpush3.bf16.msra.mxu0 %v21887_v42 }
 0x7c3   :  { %18206 = vmatprep.subr.bf16.mxu0 %v18205_v45 }
 0x7c5   :  { %15776 = vmatmul.mubr.f32.vlgmr.msra.gmra.mrb[8].mxu0 %v23708_v50 }
 0x7c6   :  { %15778 = vmatprep.mubr.f32.mxu0 %v23709_v33  ;;  %18208 = vmatpush3.bf16.msra.mxu0 %v18205_v45 }
 0x7c7   :  { %18210 = vmatprep.subr.bf16.mxu0 %v18209_v32 }
 0x7c9   :  { %15779 = vmatmul.mubr.f32.gmra.mrb[10].mxu0 %v6419_v8  ;;  %v23717_v8 = vand.u32 4294901760, %v21986_v15 }
 0x7ca   :  { %18212 = vmatpush3.bf16.msra.mxu0 %v18209_v32  ;;  %15813 = vmatprep.mubr.f32.mxu0 %v21757_v48 }
 0x7cb   :  { %18214 = vmatprep.subr.bf16.mxu0 %v18213_v21  ;;  %v18233_v40 = vpack.c.bf16 %v23717_v8, %v23716_v6 }
 0x7ce   :  { %18216 = vmatpush3.bf16.msra.mxu0 %v18213_v21 }
 0x7cf   :  { %18218 = vmatprep.subr.bf16.mxu0 %v18217_v22 }
 0x7d2   :  { %18220 = vmatpush3.bf16.msra.mxu0 %v18217_v22 }
 0x7d3   :  { %18222 = vmatprep.subr.bf16.mxu0 %v18221_v23 }
 0x7d6   :  { %18224 = vmatpush3.bf16.msra.mxu0 %v18221_v23 }
 0x7d7   :  { %18226 = vmatprep.subr.bf16.mxu0 %v18225_v3 }
 0x7da   :  { %18228 = vmatpush3.bf16.msra.mxu0 %v18225_v3 }
 0x7db   :  { %18230 = vmatprep.subr.bf16.mxu0 %v18229_v58 }
 0x7de   :  { %18232 = vmatpush3.bf16.msra.mxu0 %v18229_v58  ;;  %v22301_v58 = vsub.f32 %v7095_v61, %v7142_v29  ;;  %v23723_v61 = vand.u32 4294901760, %v22024_v12  ;;  %v23724_v29 = vand.u32 4294901760, %v22032_v62 }
 0x7df   :  { %18234 = vmatprep.subr.bf16.mxu0 %v18233_v40 }
 0x7e0   :  { %v22329_v27 = vpack.c.bf16 %v22301_v58, %v22299_v18  ;;  %v22334_v24 = vsub.f32 %v22024_v12, %v23723_v61 }
 0x7e2   :  { %18236 = vmatpush3.bf16.msra.mxu0 %v18233_v40  ;;  %v23590_v40 = vand.u32 4294901760, %v22299_v18  ;;  %23722 = vst [vmem:[#allocation20_spill] sm:$0xff] %v22329_v27 }
 0x7e3   :  { %18238 = vmatprep.subr.bf16.mxu0 %v21766_v2 }
 0x7e5   :  { %15814 = vmatmul.mubr.f32.vlgmr.msra.gmra.mrb[8].mxu0 %v21823_v20 }
 0x7e6   :  { %15816 = vmatprep.mubr.f32.mxu0 %v21843_v39  ;;  %18240 = vmatpush3.bf16.msra.mxu0 %v21766_v2  ;;  %v7091_v2 = vld [vmem:[%s23506_s12 + $0x58] sm:$0xff] }
 0x7e7   :  { %18242 = vmatprep.subr.bf16.mxu0 %v21775_v59 }
 0x7e9   :  { %15817 = vmatmul.mubr.f32.gmra.mrb[10].mxu0 %v21854_v34 }
 0x7ea   :  { %18244 = vmatpush3.bf16.msra.mxu0 %v21775_v59  ;;  %15851 = vmatprep.mubr.f32.mxu0 %v21757_v48  ;;  %v7090_v48 = vld [vmem:[%s23506_s12 + $0x50] sm:$0xff] }
 0x7eb   :  { %18246 = vmatprep.subr.bf16.mxu0 %v21786_v25  ;;  %v7127_v59 = vand.u32 4294901760, %v7090_v48 }
 0x7ed   :  { %v22273_v30 = vsub.f32 %v7090_v48, %v7127_v59  ;;  %v23589_v48 = vand.u32 4294901760, %v22301_v58 }
 0x7ee   :  { %18248 = vmatpush3.bf16.msra.mxu0 %v21786_v25  ;;  %v7130_v25 = vand.u32 4294901760, %v7091_v2 }
 0x7ef   :  { %18250 = vmatprep.subr.bf16.mxu0 %v21795_v1  ;;  %v23594_v19 = vand.u32 4294901760, %v22273_v30 }
 0x7f0   :  { %v22275_v45 = vsub.f32 %v7091_v2, %v7130_v25 }
 0x7f1   :  { %v7291_v32 = vsub.f32 %v22273_v30, %v23594_v19  ;;  %v23728_v19 = vand.u32 4294901760, %v22093_v10 }
 0x7f2   :  { %18252 = vmatpush3.bf16.msra.mxu0 %v21795_v1  ;;  %v22221_v1 = vpack.c.bf16 %v7130_v25, %v7127_v59  ;;  %v23593_v17 = vand.u32 4294901760, %v22275_v45  ;;  %v7319_v59 = vsub.f32 %v22299_v18, %v23590_v40  ;;  %v7326_v25 = vsub.f32 %v22301_v58, %v23589_v48 }
 0x7f3   :  { %18254 = vmatprep.subr.bf16.mxu0 %v21817_v16  ;;  %v7292_v21 = vand.u32 4294901760, %v7291_v32 }
 0x7f4   :  { %18290 = vmatprep.subr.bf16.mxu1 %v22221_v1  ;;  %v7298_v50 = vsub.f32 %v22275_v45, %v23593_v17  ;;  %v22419_v17 = vsub.f32 %v22088_v35, %v7121_v57 }
 0x7f5   :  { %18292 = vmatpush3.bf16.msra.mxu1 %v22221_v1 }
 0x7f6   :  { %18256 = vmatpush3.bf16.msra.mxu0 %v21817_v16  ;;  %v7092_v16 = vld [vmem:[%s23506_s12 + $0x60] sm:$0xff]  ;;  %v7299_v31 = vand.u32 4294901760, %v7298_v50  ;;  %v23726_v50 = vand.u32 4294901760, %v22043_v63 }
 0x7f7   :  { %18258 = vmatprep.subr.bf16.mxu0 %v21833_v53 }
 0x7f8   :  { %v22291_v23 = vpack.c.bf16 %v7299_v31, %v7292_v21  ;;  %v22351_v21 = vsub.f32 %v22043_v63, %v23726_v50 }
 0x7fa   :  { %18260 = vmatpush3.bf16.msra.mxu0 %v21833_v53  ;;  %v7133_v53 = vand.u32 4294901760, %v7092_v16  ;;  %v23595_v63 = vand.u32 4294901760, %v22351_v21 }
 0x7fb   :  { %18262 = vmatprep.subr.bf16.mxu0 %v21849_v41 }
 0x7fc   :  { %v22285_v54 = vsub.f32 %v7092_v16, %v7133_v53  ;;  %v7320_v16 = vand.u32 4294901760, %v7319_v59  ;;  %v23727_v59 = vand.u32 4294901760, %v22070_v55 }
 0x7fe   :  { %18264 = vmatpush3.bf16.msra.mxu0 %v21849_v41  ;;  %v23592_v60 = vand.u32 4294901760, %v22285_v54 }
 0x7ff   :  { %18266 = vmatprep.subr.bf16.mxu0 %v21887_v42 }
 0x800   :  { %v7305_v3 = vsub.f32 %v22285_v54, %v23592_v60 }
 0x802   :  { %18268 = vmatpush3.bf16.msra.mxu0 %v21887_v42  ;;  %v7306_v6 = vand.u32 4294901760, %v7305_v3 }
 0x803   :  { %18750 = vmatprep.subr.bf16.mxu0 %v22052_v43 }
 0x805   :  { %15852 = vmatmul.mubr.f32.vlgmr.msra.gmra.mrb[8].mxu0 %v21823_v20  ;;  %v7093_v20 = vld [vmem:[%s23506_s12 + $0x68] sm:$0xff] }
 0x806   :  { %15854 = vmatprep.mubr.f32.mxu0 %v21843_v39  ;;  %18752 = vmatpush3.bf16.msra.mxu0 %v22052_v43  ;;  %v7136_v39 = vand.u32 4294901760, %v7093_v20 }
 0x807   :  { %18754 = vmatprep.subr.bf16.mxu0 %v22060_v52 }
 0x808   :  { %v22233_v41 = vpack.c.bf16 %v7136_v39, %v7133_v53  ;;  %v22287_v38 = vsub.f32 %v7093_v20, %v7136_v39  ;;  %v7327_v20 = vand.u32 4294901760, %v7326_v25  ;;  %v22379_v25 = vsub.f32 %v22070_v55, %v23727_v59 }
 0x809   :  { %15855 = vmatmul.mubr.f32.gmra.mrb[10].mxu0 %v21854_v34  ;;  %v23718_v34 = vand.u32 4294901760, %v22014_v49  ;;  %v7256_v59 = vsub.f32 %v22351_v21, %v23595_v63  ;;  %v22424_v63 = vsub.f32 %v22093_v10, %v23728_v19 }
 0x80a   :  { %18756 = vmatpush3.bf16.msra.mxu0 %v22060_v52  ;;  %18294 = vmatprep.subr.bf16.mxu1 %v22233_v41  ;;  %v23591_v22 = vand.u32 4294901760, %v22287_v38  ;;  %v22313_v53 = vpack.c.bf16 %v7327_v20, %v7320_v16  ;;  %v22325_v28 = vpack.c.bf16 %v22287_v38, %v22285_v54  ;;  %v23605_v40 = vand.u32 4294901760, %v22379_v25 }
 0x80b   :  { %18758 = vmatprep.subr.bf16.mxu0 %v22081_v26  ;;  %v22238_v42 = vsub.f32 %v22014_v49, %v23718_v34  ;;  %18296 = vmatpush3.bf16.msra.mxu1 %v22233_v41  ;;  %v7229_v49 = vand.u32 4294901760, %v7228_v56  ;;  %v22321_v34 = vpack.c.bf16 %v22275_v45, %v22273_v30  ;;  %v23599_v56 = vand.u32 4294901760, %v22334_v24 }
 0x80c   :  { %18298 = vmatprep.subr.bf16.mxu1 %v22257_v14  ;;  %v7312_v4 = vsub.f32 %v22287_v38, %v23591_v22  ;;  %23721 = vst [vmem:[#allocation19_spill] sm:$0xff] %v22325_v28  ;;  %v7257_v57 = vand.u32 4294901760, %v7256_v59  ;;  %v7270_v19 = vsub.f32 %v22379_v25, %v23605_v40 }
 0x80d   :  { %v23601_v44 = vand.u32 4294901760, %v22238_v42  ;;  %v22317_v39 = vpack.c.bf16 %v22243_v0, %v22238_v42  ;;  %23720 = vst [vmem:[#allocation18_spill] sm:$0xff] %v22321_v34 }
 0x80e   :  { %18760 = vmatpush3.bf16.msra.mxu0 %v22081_v26  ;;  %v7313_v8 = vand.u32 4294901760, %v7312_v4 }
 0x80f   :  { %18762 = vmatprep.subr.bf16.mxu0 %v22103_v36  ;;  %v7221_v33 = vsub.f32 %v22238_v42, %v23601_v44  ;;  %18300 = vmatpush3.bf16.msra.mxu1 %v22257_v14 }
 0x810   :  { %v22305_v2 = vpack.c.bf16 %v7313_v8, %v7306_v6  ;;  %v22374_v8 = vsub.f32 %v22065_v46, %v7115_v37 }
 0x811   :  { %v7222_v15 = vand.u32 4294901760, %v7221_v33  ;;  %v22339_v33 = vsub.f32 %v22032_v62, %v23724_v29  ;;  %v7235_v62 = vsub.f32 %v22334_v24, %v23599_v56 }
 0x812   :  { %18764 = vmatpush3.bf16.msra.mxu0 %v22103_v36 }
 0x813   :  { %18766 = vmatprep.subr.bf16.mxu0 %v22115_v11  ;;  %v22269_v9 = vpack.c.bf16 %v7229_v49, %v7222_v15  ;;  %v23598_v15 = vand.u32 4294901760, %v22339_v33  ;;  %v23725_v49 = vand.u32 4294901760, %v22038_v5  ;;  %v7236_v29 = vand.u32 4294901760, %v7235_v62 }
 0x815   :  { %18302 = vmatprep.subr.bf16.mxu1 %v22269_v9  ;;  %v22346_v32 = vsub.f32 %v22038_v5, %v23725_v49  ;;  %v7242_v31 = vsub.f32 %v22339_v33, %v23598_v15 }
 0x816   :  { %18768 = vmatpush3.bf16.msra.mxu0 %v22115_v11 }
 0x817   :  { %18770 = vmatprep.subr.bf16.mxu0 %v22221_v1  ;;  %v23596_v4 = vand.u32 4294901760, %v22346_v32  ;;  %v7243_v49 = vand.u32 4294901760, %v7242_v31  ;;  %v23604_v31 = vand.u32 4294901760, %v22374_v8 }
 0x819   :  { %v7249_v55 = vsub.f32 %v22346_v32, %v23596_v4  ;;  %v22433_v15 = vpack.c.bf16 %v7243_v49, %v7236_v29  ;;  %v7263_v10 = vsub.f32 %v22374_v8, %v23604_v31  ;;  %v7276_v49 = vand.u32 4294901760, %v22419_v17 }
 0x81a   :  { %18772 = vmatpush3.bf16.msra.mxu0 %v22221_v1 }
 0x81b   :  { %18774 = vmatprep.subr.bf16.mxu0 %v22233_v41  ;;  %v7250_v47 = vand.u32 4294901760, %v7249_v55  ;;  %v7283_v55 = vand.u32 4294901760, %v22424_v63 }
 0x81d   :  { %v22452_v31 = vpack.c.bf16 %v7257_v57, %v7250_v47 }
 0x81e   :  { %18776 = vmatpush3.bf16.msra.mxu0 %v22233_v41 }
 0x81f   :  { %18778 = vmatprep.subr.bf16.mxu0 %v22257_v14 }
 0x822   :  { %18780 = vmatpush3.bf16.msra.mxu0 %v22257_v14 }
 0x823   :  { %18782 = vmatprep.subr.bf16.mxu0 %v22269_v9 }
 0x8d8   :  { %v22353_v12 = vpop.f32.mrb[8].mxu0 }
 0x8d9   :  { %v22362_v3 = vand.u32 4294901760, %v22353_v12  ;;  %v22364_v5 = vpop.f32.mrb[9].mxu0 }
 0x8da   :  { %v22369_v6 = vand.u32 4294901760, %v22364_v5 }
 0x8db   :  { %v22383_v16 = vsub.f32 %v22353_v12, %v22362_v3 }
 0x8dc   :  { %v22387_v20 = vsub.f32 %v22364_v5, %v22369_v6  ;;  %v22389_v61 = vpop.f32.mrb[10].mxu0 }
 0x8dd   :  { %v23597_v37 = vand.u32 4294901760, %v22383_v16  ;;  %v22393_v46 = vand.u32 4294901760, %v22389_v61  ;;  %v22395_v50 = vpop.f32.mrb[11].mxu0 }
 0x8de   :  { %v22404_v48 = vand.u32 4294901760, %v22395_v50  ;;  %v23607_v62 = vand.u32 4294901760, %v22387_v20 }
 0x8df   :  { %v7190_v22 = vsub.f32 %v22383_v16, %v23597_v37  ;;  %v22414_v60 = vsub.f32 %v22389_v61, %v22393_v46 }
 0x8e0   :  { %v22428_v4 = vsub.f32 %v22395_v50, %v22404_v48  ;;  %v7180_v37 = vsub.f32 %v22387_v20, %v23607_v62  ;;  %v7277_v62 = vsub.f32 %v22419_v17, %v7276_v49 }
 0x8e1   :  { %v23606_v56 = vand.u32 4294901760, %v22414_v60  ;;  %v7191_v7 = vand.u32 4294901760, %v7190_v22  ;;  %v7264_v22 = vand.u32 4294901760, %v7263_v10 }
 0x8e2   :  { %v7181_v35 = vand.u32 4294901760, %v7180_v37  ;;  %v7199_v44 = vand.u32 4294901760, %v22428_v4  ;;  %v7278_v47 = vand.u32 4294901760, %v7277_v62  ;;  %v22498_v62 = vpack.c.bf16 %v22379_v25, %v22374_v8 }
 0x8e3   :  { %v7210_v29 = vsub.f32 %v22414_v60, %v23606_v56  ;;  %v7271_v56 = vand.u32 4294901760, %v7270_v19  ;;  %v22504_v19 = vpack.c.bf16 %v22424_v63, %v22419_v17  ;;  %v23748_v17 = vand.u32 4294901760, %v22285_v54 }
 0x8e4   :  { %15889 = vmatprep.mubr.f32.mxu1 %v7181_v35  ;;  %v7200_v37 = vsub.f32 %v22428_v4, %v7199_v44  ;;  %v7284_v35 = vsub.f32 %v22424_v63, %v7283_v55  ;;  %v23749_v63 = vand.u32 4294901760, %v22287_v38  ;;  %v7879_v54 = vmul.f32 %v22364_v5, %v22364_v5 }
 0x8e5   :  { %15890 = vmatmul.mubr.f32.vlgmr.msra.gmra.mrb[8].mxu1 %v7191_v7  ;;  %v7211_v40 = vand.u32 4294901760, %v7210_v29  ;;  %v22464_v7 = vpack.c.bf16 %v7271_v56, %v7264_v22  ;;  %v22490_v56 = vpack.c.bf16 %v22351_v21, %v22346_v32  ;;  %v23729_v29 = vand.u32 4294901760, %v22387_v20 }
 0x8e6   :  { %18304 = vmatpush3.bf16.msra.mxu1 %v22269_v9  ;;  %v7201_v59 = vand.u32 4294901760, %v7200_v37  ;;  %v7285_v57 = vand.u32 4294901760, %v7284_v35  ;;  %v23731_v37 = vand.u32 4294901760, %v22243_v0  ;;  %v23733_v22 = vand.u32 4294901760, %v22334_v24 }
 0x8e7   :  { %18306 = vmatprep.subr.bf16.mxu1 %v22433_v15  ;;  %v23734_v35 = vand.u32 4294901760, %v22339_v33  ;;  %v23738_v0 = vand.u32 4294901760, %v22351_v21  ;;  %v23746_v21 = vand.u32 4294901760, %v22275_v45  ;;  %v23752_v45 = vand.u32 4294901760, %v22301_v58 }
 0x8e8   :  { %15892 = vmatprep.mubr.f32.mxu1 %v7201_v59  ;;  %v22468_v10 = vpack.c.bf16 %v7285_v57, %v7278_v47  ;;  %v23736_v57 = vand.u32 4294901760, %v22383_v16  ;;  %v22624_v38 = vand.u32 4294901760, %v7879_v54 }
 0x8e9   :  { %15893 = vmatmul.mubr.f32.gmra.mrb[10].mxu1 %v7211_v40  ;;  %v22482_v40 = vpack.c.bf16 %v22339_v33, %v22334_v24  ;;  %v22547_v47 = vpack.c.bf16 %v23734_v35, %v23733_v22  ;;  %v23740_v24 = vand.u32 4294901760, %v22414_v60  ;;  %v23742_v33 = vand.u32 4294901760, %v22379_v25 }
 0x8ea   :  { %18308 = vmatpush3.bf16.msra.mxu1 %v22433_v15  ;;  %15927 = vmatprep.mubr.f32.mxu1 %v22369_v6  ;;  %v22594_v25 = vpack.c.bf16 %v23749_v63, %v23748_v17 }
 0x8eb   :  { %18310 = vmatprep.subr.bf16.mxu1 %v22452_v31  ;;  %23735 = vst [vmem:[#allocation22_spill] sm:$0xff] %v22547_v47 }
 0x8ec   :  { %23750 = vst [vmem:[#allocation27_spill] sm:$0xff] %v22594_v25 }
 0x8ee   :  { %18312 = vmatpush3.bf16.msra.mxu1 %v22452_v31 }
 0x8ef   :  { %18314 = vmatprep.subr.bf16.mxu1 %v22464_v7 }
 0x8f2   :  { %18316 = vmatpush3.bf16.msra.mxu1 %v22464_v7 }
 0x8f3   :  { %18318 = vmatprep.subr.bf16.mxu1 %v22468_v10 }
 0x8f6   :  { %18320 = vmatpush3.bf16.msra.mxu1 %v22468_v10 }
 0x8f7   :  { %18322 = vmatprep.subr.bf16.mxu1 %v22291_v23 }
 0x8fa   :  { %18324 = vmatpush3.bf16.msra.mxu1 %v22291_v23 }
 0x8fb   :  { %18326 = vmatprep.subr.bf16.mxu1 %v22305_v2 }
 0x8fe   :  { %18328 = vmatpush3.bf16.msra.mxu1 %v22305_v2 }
 0x8ff   :  { %18330 = vmatprep.subr.bf16.mxu1 %v22313_v53 }
 0x902   :  { %18332 = vmatpush3.bf16.msra.mxu1 %v22313_v53 }
 0x903   :  { %18334 = vmatprep.subr.bf16.mxu1 %v22317_v39 }
 0x905   :  { %15928 = vmatmul.mubr.f32.vlgmr.msra.gmra.mrb[8].mxu1 %v22362_v3 }
 0x906   :  { %15930 = vmatprep.mubr.f32.mxu1 %v22404_v48  ;;  %18336 = vmatpush3.bf16.msra.mxu1 %v22317_v39 }
 0x907   :  { %18338 = vmatprep.subr.bf16.mxu1 %v22482_v40 }
 0x909   :  { %15931 = vmatmul.mubr.f32.gmra.mrb[10].mxu1 %v22393_v46 }
 0x90a   :  { %18340 = vmatpush3.bf16.msra.mxu1 %v22482_v40  ;;  %15965 = vmatprep.mubr.f32.mxu1 %v22387_v20  ;;  %v23730_v20 = vand.u32 4294901760, %v22238_v42  ;;  %v23737_v42 = vand.u32 4294901760, %v22346_v32  ;;  %v23745_v32 = vand.u32 4294901760, %v22273_v30  ;;  %v23751_v30 = vand.u32 4294901760, %v22299_v18 }
 0x90b   :  { %18342 = vmatprep.subr.bf16.mxu1 %v22490_v56  ;;  %v22629_v18 = vsub.f32 %v7879_v54, %v22624_v38 }
 0x90c   :  { %v22539_v59 = vpack.c.bf16 %v23731_v37, %v23730_v20 }
 0x90d   :  { %v7966_v58 = vand.u32 4294901760, %v22629_v18 }
 0x90e   :  { %18344 = vmatpush3.bf16.msra.mxu1 %v22490_v56  ;;  %23732 = vst [vmem:[#allocation21_spill] sm:$0xff] %v22539_v59 }
 0x90f   :  { %18346 = vmatprep.subr.bf16.mxu1 %v22498_v62 }
 0x912   :  { %18348 = vmatpush3.bf16.msra.mxu1 %v22498_v62 }
 0x913   :  { %18350 = vmatprep.subr.bf16.mxu1 %v22504_v19 }
 0x916   :  { %18352 = vmatpush3.bf16.msra.mxu1 %v22504_v19 }
 0x917   :  { %18354 = vmatprep.subr.bf16.mxu1 %v22321_v34 }
 0x91a   :  { %18356 = vmatpush3.bf16.msra.mxu1 %v22321_v34 }
 0x91b   :  { %18358 = vmatprep.subr.bf16.mxu1 %v22325_v28 }
 0x91e   :  { %18360 = vmatpush3.bf16.msra.mxu1 %v22325_v28 }
 0x91f   :  { %18362 = vmatprep.subr.bf16.mxu1 %v22329_v27 }
 0x922   :  { %18364 = vmatpush3.bf16.msra.mxu1 %v22329_v27 }
 0x923   :  { %18366 = vmatprep.subr.bf16.mxu1 %v22052_v43 }
 0x925   :  { %15966 = vmatmul.mubr.f32.vlgmr.msra.gmra.mrb[8].mxu1 %v22383_v16  ;;  %v22602_v16 = vpack.c.bf16 %v23752_v45, %v23751_v30 }
 0x926   :  { %15968 = vmatprep.mubr.f32.mxu1 %v22428_v4  ;;  %18368 = vmatpush3.bf16.msra.mxu1 %v22052_v43 }
 0x927   :  { %18370 = vmatprep.subr.bf16.mxu1 %v22060_v52  ;;  %23753 = vst [vmem:[#allocation28_spill] sm:$0xff] %v22602_v16 }
 0x929   :  { %15969 = vmatmul.mubr.f32.gmra.mrb[10].mxu1 %v22414_v60  ;;  %v22578_v60 = vpack.c.bf16 %v7283_v55, %v7276_v49  ;;  %v7880_v55 = vmul.f32 %v22353_v12, %v22353_v12 }
 0x92a   :  { %18372 = vmatpush3.bf16.msra.mxu1 %v22060_v52  ;;  %16003 = vmatprep.mubr.f32.mxu1 %v23729_v29  ;;  %v22559_v29 = vpack.c.bf16 %v23738_v0, %v23737_v42 }
 0x92b   :  { %18374 = vmatprep.subr.bf16.mxu1 %v22081_v26  ;;  %23744 = vst [vmem:[#allocation25_spill] sm:$0xff] %v22578_v60 }
 0x92c   :  { %23739 = vst [vmem:[#allocation23_spill] sm:$0xff] %v22559_v29 }
 0x92e   :  { %18376 = vmatpush3.bf16.msra.mxu1 %v22081_v26 }
 0x92f   :  { %18378 = vmatprep.subr.bf16.mxu1 %v22103_v36 }
 0x932   :  { %18380 = vmatpush3.bf16.msra.mxu1 %v22103_v36 }
 0x933   :  { %18382 = vmatprep.subr.bf16.mxu1 %v22115_v11 }
 0x936   :  { %18384 = vmatpush3.bf16.msra.mxu1 %v22115_v11 }
 0x937   :  { %18386 = vmatprep.subr.bf16.mxu1 %v22221_v1 }
 0x93a   :  { %18388 = vmatpush3.bf16.msra.mxu1 %v22221_v1 }
 0x93b   :  { %18390 = vmatprep.subr.bf16.mxu1 %v22233_v41 }
 0x93e   :  { %18392 = vmatpush3.bf16.msra.mxu1 %v22233_v41 }
 0x93f   :  { %18394 = vmatprep.subr.bf16.mxu1 %v22257_v14 }
 0x942   :  { %18396 = vmatpush3.bf16.msra.mxu1 %v22257_v14 }
 0x943   :  { %18398 = vmatprep.subr.bf16.mxu1 %v22539_v59 }
 0x945   :  { %16004 = vmatmul.mubr.f32.vlgmr.msra.gmra.mrb[8].mxu1 %v23736_v57 }
 0x946   :  { %16006 = vmatprep.mubr.f32.mxu1 %v7199_v44  ;;  %18400 = vmatpush3.bf16.msra.mxu1 %v22539_v59  ;;  %v23741_v44 = vand.u32 4294901760, %v22374_v8  ;;  %v22586_v8 = vpack.c.bf16 %v23746_v21, %v23745_v32 }
 0x947   :  { %18402 = vmatprep.subr.bf16.mxu1 %v22547_v47 }
 0x948   :  { %v22570_v4 = vpack.c.bf16 %v23742_v33, %v23741_v44  ;;  %23747 = vst [vmem:[#allocation26_spill] sm:$0xff] %v22586_v8 }
 0x949   :  { %16007 = vmatmul.mubr.f32.gmra.mrb[10].mxu1 %v23740_v24 }
 0x94a   :  { %18404 = vmatpush3.bf16.msra.mxu1 %v22547_v47  ;;  %16041 = vmatprep.mubr.f32.mxu1 %v22369_v6  ;;  %23743 = vst [vmem:[#allocation24_spill] sm:$0xff] %v22570_v4 }
 0x94b   :  { %18406 = vmatprep.subr.bf16.mxu1 %v22559_v29 }
 0x94e   :  { %18408 = vmatpush3.bf16.msra.mxu1 %v22559_v29 }
 0x94f   :  { %18410 = vmatprep.subr.bf16.mxu1 %v22570_v4 }
 0x952   :  { %18412 = vmatpush3.bf16.msra.mxu1 %v22570_v4 }
 0x953   :  { %18414 = vmatprep.subr.bf16.mxu1 %v22578_v60 }
 0x956   :  { %18416 = vmatpush3.bf16.msra.mxu1 %v22578_v60 }
 0x957   :  { %18418 = vmatprep.subr.bf16.mxu1 %v22586_v8 }
 0x95a   :  { %18420 = vmatpush3.bf16.msra.mxu1 %v22586_v8 }
 0x95b   :  { %18422 = vmatprep.subr.bf16.mxu1 %v22594_v25 }
 0x95e   :  { %18424 = vmatpush3.bf16.msra.mxu1 %v22594_v25 }
 0x95f   :  { %18426 = vmatprep.subr.bf16.mxu1 %v22602_v16 }
 0x962   :  { %18428 = vmatpush3.bf16.msra.mxu1 %v22602_v16 }
 0x963   :  { %18430 = vmatprep.subr.bf16.mxu1 %v22052_v43 }
 0x965   :  { %16042 = vmatmul.mubr.f32.vlgmr.msra.gmra.mrb[8].mxu1 %v22362_v3 }
 0x966   :  { %16044 = vmatprep.mubr.f32.mxu1 %v22404_v48  ;;  %18432 = vmatpush3.bf16.msra.mxu1 %v22052_v43 }
 0x967   :  { %18434 = vmatprep.subr.bf16.mxu1 %v22060_v52 }
 0x969   :  { %16045 = vmatmul.mubr.f32.gmra.mrb[10].mxu1 %v22393_v46 }
 0x96a   :  { %18436 = vmatpush3.bf16.msra.mxu1 %v22060_v52  ;;  %16079 = vmatprep.mubr.f32.mxu1 %v22369_v6  ;;  %v7967_v6 = vsub.f32 %v22629_v18, %v7966_v58 }
 0x96b   :  { %18438 = vmatprep.subr.bf16.mxu1 %v22081_v26 }
 0x96c   :  { %v7968_v49 = vand.u32 4294901760, %v7967_v6 }
 0x96e   :  { %18440 = vmatpush3.bf16.msra.mxu1 %v22081_v26 }
 0x96f   :  { %18442 = vmatprep.subr.bf16.mxu1 %v22103_v36 }
 0x972   :  { %18444 = vmatpush3.bf16.msra.mxu1 %v22103_v36 }
 0x973   :  { %18446 = vmatprep.subr.bf16.mxu1 %v22115_v11 }
 0x976   :  { %18448 = vmatpush3.bf16.msra.mxu1 %v22115_v11 }
 0x977   :  { %18450 = vmatprep.subr.bf16.mxu1 %v22221_v1 }
 0x97a   :  { %18452 = vmatpush3.bf16.msra.mxu1 %v22221_v1 }
 0x97b   :  { %18454 = vmatprep.subr.bf16.mxu1 %v22233_v41 }
 0x97e   :  { %18456 = vmatpush3.bf16.msra.mxu1 %v22233_v41 }
 0x97f   :  { %18458 = vmatprep.subr.bf16.mxu1 %v22257_v14 }
 0x982   :  { %18460 = vmatpush3.bf16.msra.mxu1 %v22257_v14 }
 0x983   :  { %18462 = vmatprep.subr.bf16.mxu1 %v22052_v43 }
 0x985   :  { %16080 = vmatmul.mubr.f32.vlgmr.msra.gmra.mrb[8].mxu1 %v22362_v3  ;;  %v22653_v3 = vand.u32 4294901760, %v7880_v55 }
 0x986   :  { %16082 = vmatprep.mubr.f32.mxu1 %v22404_v48  ;;  %18464 = vmatpush3.bf16.msra.mxu1 %v22052_v43  ;;  %v7881_v48 = vmul.f32 %v22395_v50, %v22395_v50 }
 0x987   :  { %18466 = vmatprep.subr.bf16.mxu1 %v22060_v52  ;;  %v22662_v37 = vsub.f32 %v7880_v55, %v22653_v3 }
 0x988   :  { %v22658_v20 = vand.u32 4294901760, %v7881_v48 }
 0x989   :  { %16083 = vmatmul.mubr.f32.gmra.mrb[10].mxu1 %v22393_v46  ;;  %v7882_v46 = vmul.f32 %v22389_v61, %v22389_v61  ;;  %v7976_v57 = vand.u32 4294901760, %v22662_v37 }
 0x98a   :  { %18468 = vmatpush3.bf16.msra.mxu1 %v22060_v52  ;;  %16117 = vmatprep.mubr.f32.mxu1 %v7968_v49  ;;  %v22668_v35 = vsub.f32 %v7881_v48, %v22658_v20 }
 0x98b   :  { %18470 = vmatprep.subr.bf16.mxu1 %v22081_v26  ;;  %v22664_v22 = vand.u32 4294901760, %v7882_v46  ;;  %v7977_v24 = vsub.f32 %v22662_v37, %v7976_v57 }
 0x98c   :  { %v7986_v0 = vand.u32 4294901760, %v22668_v35 }
 0x98d   :  { %v22673_v42 = vsub.f32 %v7882_v46, %v22664_v22  ;;  %v7978_v32 = vand.u32 4294901760, %v7977_v24  ;;  %v8678_v46 = vld [vmem:[%s23507_s13] sm:$0xff] }
 0x98e   :  { %18472 = vmatpush3.bf16.msra.mxu1 %v22081_v26  ;;  %v7987_v33 = vsub.f32 %v22668_v35, %v7986_v0 }
 0x98f   :  { %18474 = vmatprep.subr.bf16.mxu1 %v22103_v36  ;;  %v7996_v44 = vand.u32 4294901760, %v22673_v42 }
 0x990   :  { %v7988_v17 = vand.u32 4294901760, %v7987_v33 }
 0x991   :  { %v7997_v21 = vsub.f32 %v22673_v42, %v7996_v44 }
 0x992   :  { %18476 = vmatpush3.bf16.msra.mxu1 %v22103_v36 }
 0x993   :  { %18478 = vmatprep.subr.bf16.mxu1 %v22115_v11  ;;  %v7998_v63 = vand.u32 4294901760, %v7997_v21 }
 0x996   :  { %18480 = vmatpush3.bf16.msra.mxu1 %v22115_v11 }
 0x997   :  { %18482 = vmatprep.subr.bf16.mxu1 %v22221_v1 }
 0x99a   :  { %18484 = vmatpush3.bf16.msra.mxu1 %v22221_v1 }
 0x99b   :  { %18486 = vmatprep.subr.bf16.mxu1 %v22233_v41 }
 0x99e   :  { %18488 = vmatpush3.bf16.msra.mxu1 %v22233_v41 }
 0x99f   :  { %18490 = vmatprep.subr.bf16.mxu1 %v22257_v14 }
 0x9a2   :  { %18492 = vmatpush3.bf16.msra.mxu1 %v22257_v14 }
 0x9a3   :  { %18494 = vmatprep.subr.bf16.mxu1 %v22269_v9 }
 0x9a5   :  { %16118 = vmatmul.mubr.f32.vlgmr.msra.gmra.mrb[12].mxu1 %v7978_v32 }
 0x9a6   :  { %16120 = vmatprep.mubr.f32.mxu1 %v7988_v17  ;;  %18496 = vmatpush3.bf16.msra.mxu1 %v22269_v9 }
 0x9a7   :  { %18498 = vmatprep.subr.bf16.mxu1 %v22433_v15 }
 0x9a9   :  { %16121 = vmatmul.mubr.f32.gmra.mrb[14].mxu1 %v7998_v63 }
 0x9aa   :  { %18500 = vmatpush3.bf16.msra.mxu1 %v22433_v15  ;;  %16155 = vmatprep.mubr.f32.mxu1 %v22624_v38 }
 0x9ab   :  { %18502 = vmatprep.subr.bf16.mxu1 %v22452_v31 }
 0x9ae   :  { %18504 = vmatpush3.bf16.msra.mxu1 %v22452_v31 }
 0x9af   :  { %18506 = vmatprep.subr.bf16.mxu1 %v22464_v7 }
 0x9b2   :  { %18508 = vmatpush3.bf16.msra.mxu1 %v22464_v7 }
 0x9b3   :  { %18510 = vmatprep.subr.bf16.mxu1 %v22468_v10 }
 0x9b6   :  { %18512 = vmatpush3.bf16.msra.mxu1 %v22468_v10 }
 0x9b7   :  { %18514 = vmatprep.subr.bf16.mxu1 %v22291_v23 }
 0x9ba   :  { %18516 = vmatpush3.bf16.msra.mxu1 %v22291_v23 }
 0x9bb   :  { %18518 = vmatprep.subr.bf16.mxu1 %v22305_v2 }
 0x9be   :  { %18520 = vmatpush3.bf16.msra.mxu1 %v22305_v2 }
 0x9bf   :  { %18522 = vmatprep.subr.bf16.mxu1 %v22313_v53 }
 0x9c2   :  { %18524 = vmatpush3.bf16.msra.mxu1 %v22313_v53 }
 0x9c3   :  { %18526 = vmatprep.subr.bf16.mxu1 %v22317_v39 }
 0x9c5   :  { %16156 = vmatmul.mubr.f32.vlgmr.msra.gmra.mrb[12].mxu1 %v22653_v3 }
 0x9c6   :  { %16158 = vmatprep.mubr.f32.mxu1 %v22658_v20  ;;  %18528 = vmatpush3.bf16.msra.mxu1 %v22317_v39 }
 0x9c7   :  { %18530 = vmatprep.subr.bf16.mxu1 %v22482_v40 }
 0x9c9   :  { %16159 = vmatmul.mubr.f32.gmra.mrb[14].mxu1 %v22664_v22 }
 0x9ca   :  { %18532 = vmatpush3.bf16.msra.mxu1 %v22482_v40  ;;  %16193 = vmatprep.mubr.f32.mxu1 %v22629_v18 }
 0x9cb   :  { %18534 = vmatprep.subr.bf16.mxu1 %v22490_v56 }
 0x9ce   :  { %18536 = vmatpush3.bf16.msra.mxu1 %v22490_v56 }
 0x9cf   :  { %18538 = vmatprep.subr.bf16.mxu1 %v22498_v62 }
 0x9d2   :  { %18540 = vmatpush3.bf16.msra.mxu1 %v22498_v62 }
 0x9d3   :  { %18542 = vmatprep.subr.bf16.mxu1 %v22504_v19 }
 0x9d6   :  { %18544 = vmatpush3.bf16.msra.mxu1 %v22504_v19 }
 0x9d7   :  { %18546 = vmatprep.subr.bf16.mxu1 %v22321_v34 }
 0x9da   :  { %18548 = vmatpush3.bf16.msra.mxu1 %v22321_v34 }
 0x9db   :  { %18550 = vmatprep.subr.bf16.mxu1 %v22325_v28 }
 0x9de   :  { %18552 = vmatpush3.bf16.msra.mxu1 %v22325_v28 }
 0x9df   :  { %18554 = vmatprep.subr.bf16.mxu1 %v22329_v27 }
 0x9e2   :  { %18556 = vmatpush3.bf16.msra.mxu1 %v22329_v27 }
 0x9e3   :  { %18558 = vmatprep.subr.bf16.mxu1 %v22052_v43 }
 0x9e5   :  { %16194 = vmatmul.mubr.f32.vlgmr.msra.gmra.mrb[12].mxu1 %v22662_v37 }
 0x9e6   :  { %16196 = vmatprep.mubr.f32.mxu1 %v22668_v35  ;;  %18560 = vmatpush3.bf16.msra.mxu1 %v22052_v43 }
 0x9e7   :  { %18562 = vmatprep.subr.bf16.mxu1 %v22060_v52 }
 0x9e9   :  { %16197 = vmatmul.mubr.f32.gmra.mrb[14].mxu1 %v22673_v42 }
 0x9ea   :  { %18564 = vmatpush3.bf16.msra.mxu1 %v22060_v52  ;;  %16231 = vmatprep.mubr.f32.mxu1 %v7966_v58 }
 0x9eb   :  { %18566 = vmatprep.subr.bf16.mxu1 %v22081_v26 }
 0x9ee   :  { %18568 = vmatpush3.bf16.msra.mxu1 %v22081_v26 }
 0x9ef   :  { %18570 = vmatprep.subr.bf16.mxu1 %v22103_v36 }
 0x9f2   :  { %18572 = vmatpush3.bf16.msra.mxu1 %v22103_v36 }
 0x9f3   :  { %18574 = vmatprep.subr.bf16.mxu1 %v22115_v11 }
 0x9f6   :  { %18576 = vmatpush3.bf16.msra.mxu1 %v22115_v11 }
 0x9f7   :  { %18578 = vmatprep.subr.bf16.mxu1 %v22221_v1 }
 0x9fa   :  { %18580 = vmatpush3.bf16.msra.mxu1 %v22221_v1 }
 0x9fb   :  { %18582 = vmatprep.subr.bf16.mxu1 %v22233_v41 }
 0x9fe   :  { %18584 = vmatpush3.bf16.msra.mxu1 %v22233_v41 }
 0x9ff   :  { %18586 = vmatprep.subr.bf16.mxu1 %v22257_v14 }
 0xa02   :  { %18588 = vmatpush3.bf16.msra.mxu1 %v22257_v14 }
 0xa03   :  { %18590 = vmatprep.subr.bf16.mxu1 %v22539_v59 }
 0xa05   :  { %16232 = vmatmul.mubr.f32.vlgmr.msra.gmra.mrb[12].mxu1 %v7976_v57 }
 0xa06   :  { %16234 = vmatprep.mubr.f32.mxu1 %v7986_v0  ;;  %18592 = vmatpush3.bf16.msra.mxu1 %v22539_v59 }
 0xa07   :  { %18594 = vmatprep.subr.bf16.mxu1 %v22547_v47 }
 0xa09   :  { %16235 = vmatmul.mubr.f32.gmra.mrb[14].mxu1 %v7996_v44 }
 0xa0a   :  { %18596 = vmatpush3.bf16.msra.mxu1 %v22547_v47  ;;  %16269 = vmatprep.mubr.f32.mxu1 %v22624_v38 }
 0xa0b   :  { %18598 = vmatprep.subr.bf16.mxu1 %v22559_v29 }
 0xa0e   :  { %18600 = vmatpush3.bf16.msra.mxu1 %v22559_v29 }
 0xa0f   :  { %18602 = vmatprep.subr.bf16.mxu1 %v22570_v4 }
 0xa12   :  { %18604 = vmatpush3.bf16.msra.mxu1 %v22570_v4 }
 0xa13   :  { %18606 = vmatprep.subr.bf16.mxu1 %v22578_v60 }
 0xa16   :  { %18608 = vmatpush3.bf16.msra.mxu1 %v22578_v60 }
 0xa17   :  { %18610 = vmatprep.subr.bf16.mxu1 %v22586_v8 }
 0xa1a   :  { %18612 = vmatpush3.bf16.msra.mxu1 %v22586_v8 }
 0xa1b   :  { %18614 = vmatprep.subr.bf16.mxu1 %v22594_v25 }
 0xa1e   :  { %18616 = vmatpush3.bf16.msra.mxu1 %v22594_v25 }
 0xa1f   :  { %18618 = vmatprep.subr.bf16.mxu1 %v22602_v16 }
 0xa22   :  { %18620 = vmatpush3.bf16.msra.mxu1 %v22602_v16 }
 0xa23   :  { %18622 = vmatprep.subr.bf16.mxu1 %v22052_v43 }
 0xa25   :  { %16270 = vmatmul.mubr.f32.vlgmr.msra.gmra.mrb[12].mxu1 %v22653_v3 }
 0xa26   :  { %16272 = vmatprep.mubr.f32.mxu1 %v22658_v20  ;;  %18624 = vmatpush3.bf16.msra.mxu1 %v22052_v43 }
 0xa27   :  { %18626 = vmatprep.subr.bf16.mxu1 %v22060_v52 }
 0xa29   :  { %16273 = vmatmul.mubr.f32.gmra.mrb[14].mxu1 %v22664_v22 }
 0xa2a   :  { %18628 = vmatpush3.bf16.msra.mxu1 %v22060_v52  ;;  %16307 = vmatprep.mubr.f32.mxu1 %v22624_v38 }
 0xa2b   :  { %18630 = vmatprep.subr.bf16.mxu1 %v22081_v26 }
 0xa2e   :  { %18632 = vmatpush3.bf16.msra.mxu1 %v22081_v26 }
 0xa2f   :  { %18634 = vmatprep.subr.bf16.mxu1 %v22103_v36 }
 0xa32   :  { %18636 = vmatpush3.bf16.msra.mxu1 %v22103_v36 }
 0xa33   :  { %18638 = vmatprep.subr.bf16.mxu1 %v22115_v11 }
 0xa36   :  { %18640 = vmatpush3.bf16.msra.mxu1 %v22115_v11 }
 0xa37   :  { %18642 = vmatprep.subr.bf16.mxu1 %v22221_v1 }
 0xa3a   :  { %18644 = vmatpush3.bf16.msra.mxu1 %v22221_v1 }
 0xa3b   :  { %18646 = vmatprep.subr.bf16.mxu1 %v22233_v41 }
 0xa3e   :  { %18648 = vmatpush3.bf16.msra.mxu1 %v22233_v41 }
 0xa3f   :  { %18650 = vmatprep.subr.bf16.mxu1 %v22257_v14 }
 0xa42   :  { %18652 = vmatpush3.bf16.msra.mxu1 %v22257_v14 }
 0xa43   :  { %16313 = vmatprep.subr.mxu1 %v23649_v51 }
 0xa45   :  { %16308 = vmatmul.mubr.f32.vlgmr.msra.gmra.mrb[12].mxu1 %v22653_v3 }
 0xa46   :  { %16310 = vmatprep.mubr.f32.mxu1 %v22658_v20  ;;  %v22804_v20 = vand.u32 4294901760, %v8678_v46 }
 0xa48   :  { %23754 = vst [vmem:[#allocation29_spill] sm:$0xff] %v22804_v20  ;;  %16314 = vmatpush3.msra.mxu1 %v22804_v20 }
 0xa49   :  { %16311 = vmatmul.mubr.f32.gmra.mrb[14].mxu1 %v22664_v22  ;;  %16318 = vmatprep.subr.mxu1 %v23649_v51 }
 0xa4a   :  { %16315 = vmatprep.mubr.msk.f32.mxu1 %vm19583_vm3, %v23649_v51 }
 0xa58   :  { %v16081_v30 = vpop.f32.mrb[8].mxu1 }
 0xa59   :  { %v7867_v45 = vsel %vm2963_vm2, %v16081_v30, 0.0  ;;  %v7844_v54 = vpop.f32.mrb[9].mxu1 }
 0xa5a   :  { %v7866_v38 = vsel %vm2963_vm2, %v7844_v54, 0.0 }
 0xa5b   :  { %v7868_v18 = vadd.f32 %v7867_v45, %v7866_v38 }
 0xa5c   :  { %v16084_v58 = vpop.f32.mrb[10].mxu1 }
 0xa5d   :  { %v7856_v6 = vpop.f32.mrb[11].mxu1  ;;  %v7871_v48 = vsel %vm2963_vm2, %v16084_v58, 0.0 }
 0xa5e   :  { %v7869_v49 = vsel %vm2963_vm2, %v7856_v6, 0.0 }
 0xa5f   :  { %v7870_v55 = vadd.f32 %v7869_v49, %v7868_v18 }
 0xa61   :  { %v7872_v3 = vadd.f32 %v7871_v48, %v7870_v55 }
 0xa63   :  { %v7873_v37 = vrot.slane %v7872_v3, 4 }
 0xa65   :  { %v7874_v22 = vadd.f32 %v7873_v37, %v7872_v3 }
 0xa67   :  { %v7875_v24 = vrot.slane %v7874_v22, 2 }
 0xa69   :  { %v7876_v17 = vadd.f32 %v7875_v24, %v7874_v22  ;;  %v8671_v22 = vld [vmem:[#allocation9] sm:$0x1]  ;;  %v22813_v24 = vsub.f32 %v8678_v46, %v22804_v20 }
 0xa6a   :  { %v8675_v46 = vld [vmem:[%s23500_s6] sm:$0x1] }
 0xa6b   :  { %v7877_v54 = vrot.slane %v7876_v17, 1  ;;  %23755 = vst [vmem:[#allocation30_spill] sm:$0xff] %v22813_v24 }
 0xa6d   :  { %v7878_v58 = vadd.f32 %v7877_v54, %v7876_v17 }
 0xa6f   :  { %v8666_v55 = vmul.f32 0.001953125, %v7878_v58 }
 0xa71   :  { %v8668_v37 = vmul.f32 %v8666_v55, %v8666_v55 }
 0xb18   :  { %v16309_v35 = vpop.f32.mrb[12].mxu1 }
 0xb19   :  { %v8654_v57 = vsel %vm2963_vm2, %v16309_v35, 0.0  ;;  %v8631_v42 = vpop.f32.mrb[13].mxu1 }
 0xb1a   :  { %v8653_v0 = vsel %vm2963_vm2, %v8631_v42, 0.0 }
 0xb1b   :  { %v8655_v44 = vadd.f32 %v8654_v57, %v8653_v0 }
 0xb1c   :  { %v16312_v33 = vpop.f32.mrb[14].mxu1 }
 0xb1d   :  { %v8643_v32 = vpop.f32.mrb[15].mxu1  ;;  %v8658_v30 = vsel %vm2963_vm2, %v16312_v33, 0.0 }
 0xb1e   :  { %v8656_v21 = vsel %vm2963_vm2, %v8643_v32, 0.0 }
 0xb1f   :  { %v8657_v63 = vadd.f32 %v8656_v21, %v8655_v44  ;;  %v22817_v21 = vand.u32 4294901760, %v22813_v24 }
 0xb21   :  { %v8659_v45 = vadd.f32 %v8658_v30, %v8657_v63  ;;  %23756 = vst [vmem:[#allocation31_spill] sm:$0xff] %v22817_v21 }
 0xb23   :  { %v8660_v38 = vrot.slane %v8659_v45, 4 }
 0xb25   :  { %v8661_v18 = vadd.f32 %v8660_v38, %v8659_v45  ;;  %v8762_v45 = vsub.f32 %v22813_v24, %v22817_v21 }
 0xb27   :  { %v8662_v6 = vrot.slane %v8661_v18, 2 }
 0xb29   :  { %v8663_v49 = vadd.f32 %v8662_v6, %v8661_v18  ;;  %v22821_v18 = vand.u32 4294901760, %v8762_v45 }
 0xb2b   :  { %v8664_v48 = vrot.slane %v8663_v49, 1  ;;  %23757 = vst [vmem:[#allocation32_spill] sm:$0xff] %v22821_v18 }
 0xb2d   :  { %v8665_v3 = vadd.f32 %v8664_v48, %v8663_v49 }
 0xb2f   :  { %v8667_v35 = vmul.f32 0.001953125, %v8665_v3 }
 0xb31   :  { %v8669_v57 = vsub.f32 %v8667_v35, %v8668_v37 }
 0xb33   :  { %v8670_v42 = vmax.f32 %v8669_v57, 0.0  ;;  %v9602_v57 = vsel %vm96_vm1, %v19741_v13, 0 }
 0xb35   :  { %v8672_v0 = vadd.f32 1e-05, %v8670_v42  ;;  %v22869_v42 = vand.u32 4294901760, %v9602_v57 }
 0xb37   :  { %19479 = vrsqrt.f32 %v8672_v0  ;;  %v9593_v0 = vld [vmem:[%s23501_s7] sm:$0xff] }
 0xb38   :  { %v9614_v13 = vand.u32 4294901760, %v9593_v0 }
 0xb3a   :  { %v22894_v45 = vsub.f32 %v9593_v0, %v9614_v13 }
 0xb3c   :  { %v23761_v16 = vand.u32 4294901760, %v22894_v45 }
 0xb3e   :  { %v9730_v25 = vsub.f32 %v22894_v45, %v23761_v16 }
 0xb40   :  { %v9731_v4 = vand.u32 4294901760, %v9730_v25 }
 0xb41   :  { %v19480_v44 = vpop.eup %19479 }
 0xb42   :  { %v8674_v33 = vmul.f32 %v19480_v44, %v8671_v22  ;;  %v9594_v22 = vld [vmem:[%s23501_s7 + $0x8] sm:$0xff]  ;;  %v22881_v44 = vsub.f32 %v9602_v57, %v22869_v42  ;;  %v9599_v57 = vld [vmem:[%s23501_s7 + $0x30] sm:$0xff] }
 0xb44   :  { %v8680_v32 = vsel %vm2963_vm2, %v8674_v33, 0  ;;  %v8676_v17 = vmul.f32 %v8674_v33, %v8666_v55  ;;  %v9617_v33 = vand.u32 4294901760, %v9594_v22 }
 0xb45   :  { %v8748_v63 = vand.u32 4294901760, %v8680_v32 }
 0xb46   :  { %v8677_v6 = vsub.f32 %v8675_v46, %v8676_v17  ;;  %v22885_v17 = vpack.c.bf16 %v9617_v33, %v9614_v13 }
 0xb47   :  { %v8749_v30 = vsub.f32 %v8680_v32, %v8748_v63  ;;  %v23608_v32 = vand.u32 4294901760, %v22881_v44 }
 0xb48   :  { %v9129_v49 = vsel %vm2963_vm2, %v8677_v6, 0 }
 0xb49   :  { %v8750_v54 = vand.u32 4294901760, %v8749_v30  ;;  %v22843_v55 = vand.u32 4294901760, %v9129_v49 }
 0xb4b   :  { %v8751_v38 = vsub.f32 %v8749_v30, %v8750_v54  ;;  %v9198_v48 = vsub.f32 %v9129_v49, %v22843_v55 }
 0xb4d   :  { %v8752_v58 = vand.u32 4294901760, %v8751_v38  ;;  %v9199_v3 = vand.u32 4294901760, %v9198_v48  ;;  %v9689_v38 = vsub.f32 %v22881_v44, %v23608_v32 }
 0xb4f   :  { %16316 = vmatmul.mubr.f32.vlgmr.msra.gmra.mrb[16].mxu1 %v8752_v58  ;;  %v9200_v37 = vsub.f32 %v9198_v48, %v9199_v3  ;;  %v23758_v58 = vld [vmem:[#allocation14_spill] sm:$0xff] }
 0xb50   :  { %16319 = vmatpush3.msra.mxu1 %v22821_v18  ;;  %16320 = vmatprep.mubr.msk.f32.mxu1 %vm19583_vm3, %v23649_v51  ;;  %v9605_v46 = vsel %vm96_vm1, %v23758_v58, 0  ;;  %v9600_v58 = vld [vmem:[%s23501_s7 + $0x38] sm:$0xff] }
 0xb51   :  { %16323 = vmatprep.subr.mxu1 %v23649_v51  ;;  %v9201_v35 = vand.u32 4294901760, %v9200_v37  ;;  %v9597_v37 = vld [vmem:[%s23501_s7 + $0x20] sm:$0xff]  ;;  %v22920_v13 = vand.u32 4294901760, %v9605_v46 }
 0xb52   :  { %v9626_v0 = vand.u32 4294901760, %v9597_v37 }
 0xb57   :  { %16321 = vmatmul.mubr.f32.vlgmr.msra.gmra.mrb[16].mxu1 %v8748_v63 }
 0xb58   :  { %16324 = vmatpush3.msra.mxu1 %v22813_v24  ;;  %16325 = vmatprep.mubr.msk.f32.mxu1 %vm19583_vm3, %v23649_v51 }
 0xb59   :  { %16328 = vmatprep.subr.mxu1 %v23649_v51 }
 0xb5f   :  { %16326 = vmatmul.mubr.f32.vlgmr.msra.gmra.mrb[16].mxu1 %v8749_v30  ;;  %v9596_v30 = vld [vmem:[%s23501_s7 + $0x18] sm:$0xff] }
 0xb60   :  { %16329 = vmatpush3.msra.mxu1 %v22804_v20  ;;  %16330 = vmatprep.mubr.msk.f32.mxu1 %vm19583_vm3, %v23649_v51  ;;  %v9623_v49 = vand.u32 4294901760, %v9596_v30 }
 0xb61   :  { %16333 = vmatprep.subr.mxu1 %v23649_v51 }
 0xb62   :  { %v22927_v32 = vsub.f32 %v9596_v30, %v9623_v49  ;;  %v22940_v30 = vsub.f32 %v9605_v46, %v22920_v13  ;;  %v22956_v46 = vsub.f32 %v9597_v37, %v9626_v0 }
 0xb64   :  { %v23764_v37 = vand.u32 4294901760, %v22927_v32 }
 0xb67   :  { %16331 = vmatmul.mubr.f32.vlgmr.msra.gmra.mrb[16].mxu1 %v8750_v54  ;;  %v22896_v54 = vsub.f32 %v9594_v22, %v9617_v33 }
 0xb68   :  { %16334 = vmatpush3.msra.mxu1 %v22817_v21  ;;  %16335 = vmatprep.mubr.msk.f32.mxu1 %vm19583_vm3, %v23649_v51 }
 0xb69   :  { %16338 = vmatprep.subr.mxu1 %v23649_v51 }
 0xb6f   :  { %16336 = vmatmul.mubr.f32.vlgmr.msra.gmra.mrb[16].mxu1 %v8748_v63 }
 0xb70   :  { %16339 = vmatpush3.msra.mxu1 %v22804_v20  ;;  %16340 = vmatprep.mubr.msk.f32.mxu1 %vm19583_vm3, %v23649_v51 }
 0xb71   :  { %16343 = vmatprep.subr.mxu1 %v23649_v51 }
 0xb77   :  { %16341 = vmatmul.mubr.f32.vlgmr.msra.gmra.mrb[16].mxu1 %v8748_v63  ;;  %v9595_v63 = vld [vmem:[%s23501_s7 + $0x10] sm:$0xff] }
 0xb78   :  { %16344 = vmatpush3.msra.mxu1 %v22804_v20  ;;  %16345 = vmatprep.mubr.msk.f32.mxu1 %vm19583_vm3, %v23649_v51  ;;  %v9620_v6 = vand.u32 4294901760, %v9595_v63 }
 0xb79   :  { %16348 = vmatprep.subr.mxu1 %v23649_v51 }
 0xb7a   :  { %v22922_v33 = vsub.f32 %v9595_v63, %v9620_v6  ;;  %v9635_v63 = vand.u32 4294901760, %v9600_v58 }
 0xb7b   :  { %16346 = vmatmul.mubr.f32.vlgmr.msra.gmra.mrb[18].mxu1 %v9201_v35  ;;  %v9598_v35 = vld [vmem:[%s23501_s7 + $0x28] sm:$0xff] }
 0xb7c   :  { %16349 = vmatpush3.msra.mxu1 %v22821_v18  ;;  %16350 = vmatprep.mubr.msk.f32.mxu1 %vm19583_vm3, %v23649_v51  ;;  %v9629_v22 = vand.u32 4294901760, %v9598_v35 }
 0xb7d   :  { %16353 = vmatprep.subr.mxu1 %v23649_v51 }
 0xb7e   :  { %v22954_v16 = vpack.c.bf16 %v9629_v22, %v9626_v0  ;;  %v22958_v60 = vsub.f32 %v9598_v35, %v9629_v22  ;;  %v9751_v35 = vsub.f32 %v22927_v32, %v23764_v37 }
 0xb80   :  { %v9752_v59 = vand.u32 4294901760, %v9751_v35 }
 0xb83   :  { %16351 = vmatmul.mubr.f32.vlgmr.msra.gmra.mrb[18].mxu1 %v22843_v55 }
 0xb84   :  { %16354 = vmatpush3.msra.mxu1 %v22813_v24  ;;  %16355 = vmatprep.mubr.msk.f32.mxu1 %vm19583_vm3, %v23649_v51  ;;  %v23760_v24 = vld [vmem:[#allocation16_spill] sm:$0xff] }
 0xb85   :  { %16358 = vmatprep.subr.mxu1 %v23649_v51  ;;  %v9611_v18 = vsel %vm96_vm1, %v23760_v24, 0  ;;  %v23762_v24 = vand.u32 4294901760, %v22896_v54 }
 0xb8b   :  { %16356 = vmatmul.mubr.f32.vlgmr.msra.gmra.mrb[18].mxu1 %v9198_v48  ;;  %v23759_v48 = vld [vmem:[#allocation15_spill] sm:$0xff] }
 0xb8c   :  { %16359 = vmatpush3.msra.mxu1 %v22804_v20  ;;  %16360 = vmatprep.mubr.msk.f32.mxu1 %vm19583_vm3, %v23649_v51 }
 0xb8d   :  { %16363 = vmatprep.subr.mxu1 %v23649_v51 }
 0xb93   :  { %16361 = vmatmul.mubr.f32.vlgmr.msra.gmra.mrb[18].mxu1 %v9199_v3  ;;  %v9608_v3 = vsel %vm96_vm1, %v23759_v48, 0  ;;  %v9690_v48 = vand.u32 4294901760, %v9689_v38  ;;  %v22942_v38 = vand.u32 4294901760, %v9611_v18 }
 0xb94   :  { %16364 = vmatpush3.msra.mxu1 %v22817_v21  ;;  %16365 = vmatprep.mubr.msk.f32.mxu1 %vm19583_vm3, %v23649_v51  ;;  %v22929_v21 = vand.u32 4294901760, %v9608_v3 }
 0xb95   :  { %16368 = vmatprep.subr.mxu1 %v23649_v51 }
 0xb96   :  { %v22951_v8 = vsub.f32 %v9608_v3, %v22929_v21 }
 0xb98   :  { %v23766_v27 = vand.u32 4294901760, %v22951_v8 }
 0xb9a   :  { %v9709_v25 = vsub.f32 %v22951_v8, %v23766_v27 }
 0xb9b   :  { %16366 = vmatmul.mubr.f32.vlgmr.msra.gmra.mrb[18].mxu1 %v22843_v55 }
 0xb9c   :  { %16369 = vmatpush3.msra.mxu1 %v22804_v20  ;;  %16370 = vmatprep.mubr.msk.f32.mxu1 %vm19583_vm3, %v23649_v51  ;;  %v22933_v20 = vpack.c.bf16 %v9623_v49, %v9620_v6  ;;  %v9632_v51 = vand.u32 4294901760, %v9599_v57  ;;  %v9737_v6 = vsub.f32 %v22896_v54, %v23762_v24  ;;  %v22964_v49 = vsub.f32 %v9611_v18, %v22942_v38 }
 0xb9d   :  { %18654 = vmatprep.subr.bf16.mxu1 %v22885_v17  ;;  %v23636_v18 = vand.u32 4294901760, %v22958_v60  ;;  %v22979_v24 = vsub.f32 %v9600_v58, %v9635_v63  ;;  %v9710_v35 = vand.u32 4294901760, %v9709_v25  ;;  %v18685_v25 = vpack.c.bf16 %v22896_v54, %v22894_v45 }
 0xb9e   :  { %v9738_v3 = vand.u32 4294901760, %v9737_v6  ;;  %v22977_v22 = vsub.f32 %v9599_v57, %v9632_v51  ;;  %v23765_v6 = vand.u32 4294901760, %v22940_v30  ;;  %v23639_v47 = vand.u32 4294901760, %v22964_v49 }
 0xb9f   :  { %v9765_v58 = vsub.f32 %v22958_v60, %v23636_v18 }
 0xba0   :  { %v18669_v37 = vpack.c.bf16 %v9738_v3, %v9731_v4  ;;  %v9778_v4 = vand.u32 4294901760, %v22979_v24  ;;  %v9719_v3 = vsub.f32 %v22964_v49, %v23639_v47 }
 0xba2   :  { %v9779_v28 = vsub.f32 %v22979_v24, %v9778_v4 }
 0xba3   :  { %16371 = vmatmul.mubr.f32.vlgmr.msra.gmra.mrb[18].mxu1 %v22843_v55  ;;  %v23763_v55 = vand.u32 4294901760, %v22922_v33 }
 0xba4   :  { %18656 = vmatpush3.bf16.msra.mxu1 %v22885_v17  ;;  %16389 = vmatprep.mubr.f32.mxu1 %v9690_v48  ;;  %v22960_v48 = vpack.c.bf16 %v9635_v63, %v9632_v51  ;;  %v23767_v51 = vand.u32 4294901760, %v22956_v46  ;;  %v9771_v63 = vand.u32 4294901760, %v22977_v22 }
 0xba5   :  { %18658 = vmatprep.subr.bf16.mxu1 %v22933_v20  ;;  %v9744_v29 = vsub.f32 %v22922_v33, %v23763_v55  ;;  %v9699_v55 = vsub.f32 %v22940_v30, %v23765_v6 }
 0xba6   :  { %v9758_v57 = vsub.f32 %v22956_v46, %v23767_v51  ;;  %v9766_v51 = vand.u32 4294901760, %v9765_v58  ;;  %v9772_v18 = vsub.f32 %v22977_v22, %v9771_v63 }
 0xba7   :  { %v9745_v0 = vand.u32 4294901760, %v9744_v29  ;;  %v9700_v29 = vand.u32 4294901760, %v9699_v55  ;;  %v9720_v55 = vand.u32 4294901760, %v9719_v3  ;;  %v23772_v3 = vand.u32 4294901760, %v22927_v32 }
 0xba8   :  { %18660 = vmatpush3.bf16.msra.mxu1 %v22933_v20  ;;  %v9759_v6 = vand.u32 4294901760, %v9758_v57  ;;  %v9773_v34 = vand.u32 4294901760, %v9772_v18  ;;  %v23769_v18 = vand.u32 4294901760, %v22894_v45  ;;  %v23770_v57 = vand.u32 4294901760, %v22896_v54 }
 0xba9   :  { %18662 = vmatprep.subr.bf16.mxu1 %v22954_v16  ;;  %v18673_v27 = vpack.c.bf16 %v9752_v59, %v9745_v0  ;;  %v9780_v59 = vand.u32 4294901760, %v9779_v28  ;;  %v18693_v28 = vpack.c.bf16 %v22958_v60, %v22956_v46  ;;  %v23775_v45 = vand.u32 4294901760, %v22956_v46 }
 0xbaa   :  { %v18677_v47 = vpack.c.bf16 %v9766_v51, %v9759_v6  ;;  %v18717_v58 = vpack.c.bf16 %v23770_v57, %v23769_v18  ;;  %v23776_v54 = vand.u32 4294901760, %v22958_v60  ;;  %v23777_v51 = vand.u32 4294901760, %v22964_v49 }
 0xbab   :  { %v18681_v0 = vpack.c.bf16 %v9780_v59, %v9773_v34  ;;  %v18697_v34 = vpack.c.bf16 %v22979_v24, %v22977_v22 }
 0xbac   :  { %18664 = vmatpush3.bf16.msra.mxu1 %v22954_v16  ;;  %v18725_v6 = vpack.c.bf16 %v23776_v54, %v23775_v45 }
 0xbad   :  { %18666 = vmatprep.subr.bf16.mxu1 %v22960_v48 }
 0xbb0   :  { %18668 = vmatpush3.bf16.msra.mxu1 %v22960_v48 }
 0xbb1   :  { %18670 = vmatprep.subr.bf16.mxu1 %v18669_v37 }
 0xbb3   :  { %16390 = vmatmul.mubr.f32.vlgmr.msra.gmra.mrb[20].mxu1 %v9700_v29  ;;  %v23771_v29 = vand.u32 4294901760, %v22922_v33 }
 0xbb4   :  { %18672 = vmatpush3.bf16.msra.mxu1 %v18669_v37  ;;  %16392 = vmatprep.mubr.f32.mxu1 %v9710_v35  ;;  %v18689_v37 = vpack.c.bf16 %v22927_v32, %v22922_v33  ;;  %v23774_v35 = vand.u32 4294901760, %v22951_v8  ;;  %v18729_v32 = vpack.c.bf16 %v9778_v4, %v9771_v63 }
 0xbb5   :  { %18674 = vmatprep.subr.bf16.mxu1 %v18673_v27 }
 0xbb7   :  { %16393 = vmatmul.mubr.f32.gmra.mrb[22].mxu1 %v9720_v55 }
 0xbb8   :  { %18676 = vmatpush3.bf16.msra.mxu1 %v18673_v27  ;;  %16411 = vmatprep.mubr.f32.mxu1 %v22869_v42  ;;  %v23773_v27 = vand.u32 4294901760, %v22940_v30 }
 0xbb9   :  { %18678 = vmatprep.subr.bf16.mxu1 %v18677_v47 }
 0xbbc   :  { %18680 = vmatpush3.bf16.msra.mxu1 %v18677_v47  ;;  %v23768_v47 = vand.u32 4294901760, %v22881_v44 }
 0xbbd   :  { %18682 = vmatprep.subr.bf16.mxu1 %v18681_v0 }
 0xbc0   :  { %18684 = vmatpush3.bf16.msra.mxu1 %v18681_v0 }
 0xbc1   :  { %18686 = vmatprep.subr.bf16.mxu1 %v18685_v25 }
 0xbc3   :  { %16412 = vmatmul.mubr.f32.vlgmr.msra.gmra.mrb[20].mxu1 %v22920_v13 }
 0xbc4   :  { %18688 = vmatpush3.bf16.msra.mxu1 %v18685_v25  ;;  %16414 = vmatprep.mubr.f32.mxu1 %v22929_v21 }
 0xbc5   :  { %18690 = vmatprep.subr.bf16.mxu1 %v18689_v37 }
 0xbc7   :  { %16415 = vmatmul.mubr.f32.gmra.mrb[22].mxu1 %v22942_v38 }
 0xbc8   :  { %18692 = vmatpush3.bf16.msra.mxu1 %v18689_v37  ;;  %16433 = vmatprep.mubr.f32.mxu1 %v22881_v44  ;;  %v18721_v44 = vpack.c.bf16 %v23772_v3, %v23771_v29 }
 0xbc9   :  { %18694 = vmatprep.subr.bf16.mxu1 %v18693_v28 }
 0xbcc   :  { %18696 = vmatpush3.bf16.msra.mxu1 %v18693_v28 }
 0xbcd   :  { %18698 = vmatprep.subr.bf16.mxu1 %v18697_v34 }
 0xbd0   :  { %18700 = vmatpush3.bf16.msra.mxu1 %v18697_v34 }
 0xbd1   :  { %18702 = vmatprep.subr.bf16.mxu1 %v22885_v17 }
 0xbd3   :  { %16434 = vmatmul.mubr.f32.vlgmr.msra.gmra.mrb[20].mxu1 %v22940_v30 }
 0xbd4   :  { %18704 = vmatpush3.bf16.msra.mxu1 %v22885_v17  ;;  %16436 = vmatprep.mubr.f32.mxu1 %v22951_v8  ;;  %v23778_v8 = vld [vmem:[#allocation17_spill] sm:$0xff] }
 0xbd5   :  { %18706 = vmatprep.subr.bf16.mxu1 %v22933_v20 }
 0xbd7   :  { %16437 = vmatmul.mubr.f32.gmra.mrb[22].mxu1 %v22964_v49 }
 0xbd8   :  { %18708 = vmatpush3.bf16.msra.mxu1 %v22933_v20  ;;  %16455 = vmatprep.mubr.f32.mxu1 %v23768_v47 }
 0xbd9   :  { %18710 = vmatprep.subr.bf16.mxu1 %v22954_v16 }
 0xbdc   :  { %18712 = vmatpush3.bf16.msra.mxu1 %v22954_v16 }
 0xbdd   :  { %18714 = vmatprep.subr.bf16.mxu1 %v22960_v48 }
 0xbe0   :  { %18716 = vmatpush3.bf16.msra.mxu1 %v22960_v48 }
 0xbe1   :  { %18718 = vmatprep.subr.bf16.mxu1 %v18717_v58 }
 0xbe3   :  { %16456 = vmatmul.mubr.f32.vlgmr.msra.gmra.mrb[20].mxu1 %v23773_v27 }
 0xbe4   :  { %18720 = vmatpush3.bf16.msra.mxu1 %v18717_v58  ;;  %16458 = vmatprep.mubr.f32.mxu1 %v23774_v35 }
 0xbe5   :  { %18722 = vmatprep.subr.bf16.mxu1 %v18721_v44 }
 0xbe7   :  { %16459 = vmatmul.mubr.f32.gmra.mrb[22].mxu1 %v23777_v51 }
 0xbe8   :  { %18724 = vmatpush3.bf16.msra.mxu1 %v18721_v44  ;;  %16477 = vmatprep.mubr.f32.mxu1 %v22869_v42 }
 0xbe9   :  { %18726 = vmatprep.subr.bf16.mxu1 %v18725_v6 }
 0xbec   :  { %18728 = vmatpush3.bf16.msra.mxu1 %v18725_v6 }
 0xbed   :  { %18730 = vmatprep.subr.bf16.mxu1 %v18729_v32 }
 0xbf0   :  { %18732 = vmatpush3.bf16.msra.mxu1 %v18729_v32 }
 0xbf1   :  { %18734 = vmatprep.subr.bf16.mxu1 %v22885_v17 }
 0xbf3   :  { %16478 = vmatmul.mubr.f32.vlgmr.msra.gmra.mrb[20].mxu1 %v22920_v13 }
 0xbf4   :  { %18736 = vmatpush3.bf16.msra.mxu1 %v22885_v17  ;;  %16480 = vmatprep.mubr.f32.mxu1 %v22929_v21 }
 0xbf5   :  { %18738 = vmatprep.subr.bf16.mxu1 %v22933_v20 }
 0xbf7   :  { %16481 = vmatmul.mubr.f32.gmra.mrb[22].mxu1 %v22942_v38 }
 0xbf8   :  { %18740 = vmatpush3.bf16.msra.mxu1 %v22933_v20  ;;  %16499 = vmatprep.mubr.f32.mxu1 %v22869_v42 }
 0xbf9   :  { %18742 = vmatprep.subr.bf16.mxu1 %v22954_v16 }
 0xbfc   :  { %18744 = vmatpush3.bf16.msra.mxu1 %v22954_v16 }
 0xbfd   :  { %18746 = vmatprep.subr.bf16.mxu1 %v22960_v48 }
 0xc00   :  { %18748 = vmatpush3.bf16.msra.mxu1 %v22960_v48 }
 0xc01   :  { %18942 = vmatprep.subr.bf16.mxu1 %v22052_v43 }
 0xc03   :  { %16500 = vmatmul.mubr.f32.vlgmr.msra.gmra.mrb[20].mxu1 %v22920_v13 }
 0xc04   :  { %16502 = vmatprep.mubr.f32.mxu1 %v22929_v21  ;;  %18944 = vmatpush3.bf16.msra.mxu1 %v22052_v43 }
 0xc05   :  { %18946 = vmatprep.subr.bf16.mxu1 %v22060_v52 }
 0xc07   :  { %16503 = vmatmul.mubr.f32.gmra.mrb[22].mxu1 %v22942_v38 }
 0xc08   :  { %18948 = vmatpush3.bf16.msra.mxu1 %v22060_v52 }
 0xc09   :  { %18950 = vmatprep.subr.bf16.mxu1 %v22081_v26 }
 0xc0c   :  { %18952 = vmatpush3.bf16.msra.mxu1 %v22081_v26 }
 0xc0d   :  { %18954 = vmatprep.subr.bf16.mxu1 %v22103_v36 }
 0xc10   :  { %18956 = vmatpush3.bf16.msra.mxu1 %v22103_v36 }
 0xc11   :  { %18958 = vmatprep.subr.bf16.mxu1 %v22115_v11 }
 0xc14   :  { %18960 = vmatpush3.bf16.msra.mxu1 %v22115_v11 }
 0xc15   :  { %18962 = vmatprep.subr.bf16.mxu1 %v22221_v1 }
 0xc18   :  { %18964 = vmatpush3.bf16.msra.mxu1 %v22221_v1 }
 0xc19   :  { %18966 = vmatprep.subr.bf16.mxu1 %v22233_v41 }
 0xc1c   :  { %18968 = vmatpush3.bf16.msra.mxu1 %v22233_v41 }
 0xc1d   :  { %18970 = vmatprep.subr.bf16.mxu1 %v22257_v14 }
 0xc20   :  { %18972 = vmatpush3.bf16.msra.mxu1 %v22257_v14 }
 0xc21   :  { %18974 = vmatprep.subr.bf16.mxu1 %v22269_v9 }
 0xc4a   :  { %v9124_v60 = vpop.f32.mrb[16].mxu1 }
 0xc4b   :  { %v9580_v20 = vrot.slane %v9124_v60, %v23778_v8  ;;  %v16342_v21 = vpop.f32.mrb[17].mxu1 }
 0xc4d   :  { %v9581_v42 = vmul.f32 %v9580_v20, %v22364_v5  ;;  %v9582_v17 = vmul.f32 %v22353_v12, %v9580_v20  ;;  %v9583_v13 = vmul.f32 %v9580_v20, %v22395_v50  ;;  %v9584_v33 = vmul.f32 %v22389_v61, %v9580_v20 }
 0xc76   :  { %v9573_v30 = vpop.f32.mrb[18].mxu1 }
 0xc77   :  { %v9588_v38 = vrot.slane %v9573_v30, %v23778_v8  ;;  %v16372_v49 = vpop.f32.mrb[19].mxu1 }
 0xc79   :  { %v23095_v16 = vadd.f32 %v9588_v38, %v9581_v42  ;;  %v23097_v46 = vadd.f32 %v9588_v38, %v9582_v17  ;;  %v23099_v48 = vadd.f32 %v9588_v38, %v9583_v13  ;;  %v23101_v24 = vadd.f32 %v9588_v38, %v9584_v33 }
 0xcd6   :  { %v23103_v22 = vpop.f32.mrb[20].mxu1 }
 0xcd7   :  { %v23106_v12 = vand.u32 4294901760, %v23103_v22  ;;  %v11063_v5 = vmul.f32 %v23103_v22, %v23103_v22  ;;  %v23110_v61 = vpop.f32.mrb[21].mxu1 }
 0xcd8   :  { %v23113_v50 = vand.u32 4294901760, %v23110_v61  ;;  %v11062_v63 = vmul.f32 %v23110_v61, %v23110_v61 }
 0xcd9   :  { %v23119_v4 = vsub.f32 %v23103_v22, %v23106_v12  ;;  %v23121_v55 = vand.u32 4294901760, %v11063_v5 }
 0xcda   :  { %v23125_v59 = vsub.f32 %v23110_v61, %v23113_v50  ;;  %v23127_v0 = vand.u32 4294901760, %v11062_v63  ;;  %v23129_v25 = vpop.f32.mrb[22].mxu1 }
 0xcdb   :  { %v10372_v37 = vand.u32 4294901760, %v23119_v4  ;;  %v23133_v28 = vsub.f32 %v11063_v5, %v23121_v55  ;;  %v23136_v34 = vand.u32 4294901760, %v23129_v25  ;;  %v11065_v47 = vmul.f32 %v23129_v25, %v23129_v25  ;;  %v23140_v18 = vpop.f32.mrb[23].mxu1 }
 0xcdc   :  { %v23143_v57 = vsub.f32 %v11062_v63, %v23127_v0  ;;  %v23146_v58 = vand.u32 4294901760, %v23140_v18  ;;  %v11064_v29 = vmul.f32 %v23140_v18, %v23140_v18  ;;  %v10362_v3 = vand.u32 4294901760, %v23125_v59 }
 0xcdd   :  { %v10373_v44 = vsub.f32 %v23119_v4, %v10372_v37  ;;  %v11159_v27 = vand.u32 4294901760, %v23133_v28  ;;  %v23157_v35 = vsub.f32 %v23129_v25, %v23136_v34  ;;  %v23159_v45 = vand.u32 4294901760, %v11065_v47 }
 0xcde   :  { %v23163_v54 = vsub.f32 %v23140_v18, %v23146_v58  ;;  %v23165_v6 = vand.u32 4294901760, %v11064_v29  ;;  %v10363_v51 = vsub.f32 %v23125_v59, %v10362_v3  ;;  %v11149_v32 = vand.u32 4294901760, %v23143_v57 }
 0xcdf   :  { %v11160_v60 = vsub.f32 %v23133_v28, %v11159_v27  ;;  %v23175_v20 = vsub.f32 %v11065_v47, %v23159_v45  ;;  %v10392_v21 = vand.u32 4294901760, %v23157_v35  ;;  %v10374_v30 = vand.u32 4294901760, %v10373_v44 }
 0xce0   :  { %v23179_v42 = vsub.f32 %v11064_v29, %v23165_v6  ;;  %v10364_v17 = vand.u32 4294901760, %v10363_v51  ;;  %v11150_v13 = vsub.f32 %v23143_v57, %v11149_v32  ;;  %v10382_v33 = vand.u32 4294901760, %v23163_v54 }
 0xce1   :  { %v10393_v38 = vsub.f32 %v23157_v35, %v10392_v21  ;;  %v11179_v49 = vand.u32 4294901760, %v23175_v20  ;;  %v11161_v29 = vand.u32 4294901760, %v11160_v60 }
 0xce2   :  { %16537 = vmatprep.mubr.f32.mxu0 %v10364_v17  ;;  %v11151_v5 = vand.u32 4294901760, %v11150_v13  ;;  %v10383_v63 = vsub.f32 %v23163_v54, %v10382_v33  ;;  %v11169_v47 = vand.u32 4294901760, %v23179_v42 }
 0xce3   :  { %16538 = vmatmul.mubr.f32.vlgmr.msra.gmra.mrb[12].mxu0 %v10374_v30  ;;  %v11180_v17 = vsub.f32 %v23175_v20, %v11179_v49  ;;  %v10394_v13 = vand.u32 4294901760, %v10393_v38 }
 0xce4   :  { %18784 = vmatpush3.bf16.msra.mxu0 %v22269_v9  ;;  %16765 = vmatprep.mubr.f32.mxu1 %v11151_v5  ;;  %v10384_v44 = vand.u32 4294901760, %v10383_v63  ;;  %v11170_v51 = vsub.f32 %v23179_v42, %v11169_v47 }
 0xce5   :  { %16766 = vmatmul.mubr.f32.vlgmr.msra.gmra.mrb[24].mxu1 %v11161_v29  ;;  %18786 = vmatprep.subr.bf16.mxu0 %v22433_v15  ;;  %v11181_v30 = vand.u32 4294901760, %v11180_v17 }
 0xce6   :  { %18976 = vmatpush3.bf16.msra.mxu1 %v22269_v9  ;;  %16540 = vmatprep.mubr.f32.mxu0 %v10384_v44  ;;  %v11171_v60 = vand.u32 4294901760, %v11170_v51  ;;  %v23779_v9 = vld [vmem:[#allocation18_spill] sm:$0xff] }
 0xce7   :  { %16541 = vmatmul.mubr.f32.gmra.mrb[14].mxu0 %v10394_v13  ;;  %18978 = vmatprep.subr.bf16.mxu1 %v22433_v15 }
 0xce8   :  { %18788 = vmatpush3.bf16.msra.mxu0 %v22433_v15  ;;  %16575 = vmatprep.mubr.f32.mxu0 %v23113_v50 }
 0xce9   :  { %16768 = vmatprep.mubr.f32.mxu1 %v11171_v60  ;;  %18790 = vmatprep.subr.bf16.mxu0 %v22452_v31  ;;  %v11854_v60 = vld [vmem:[%s23502_s8] sm:$0x1]  ;;  %s19584_s8 = smov [#allocation10]  }
 0xcea   :  { %16769 = vmatmul.mubr.f32.gmra.mrb[26].mxu1 %v11181_v30 }
 0xceb   :  { %18980 = vmatpush3.bf16.msra.mxu1 %v22433_v15  ;;  %16803 = vmatprep.mubr.f32.mxu1 %v23127_v0  ;;  %v23784_v15 = vld [vmem:[#allocation23_spill] sm:$0xff] }
 0xcec   :  { %18792 = vmatpush3.bf16.msra.mxu0 %v22452_v31  ;;  %18982 = vmatprep.subr.bf16.mxu1 %v22452_v31 }
 0xced   :  { %18794 = vmatprep.subr.bf16.mxu0 %v22464_v7 }
 0xcef   :  { %18984 = vmatpush3.bf16.msra.mxu1 %v22452_v31  ;;  %v23785_v31 = vld [vmem:[#allocation24_spill] sm:$0xff] }
 0xcf0   :  { %18796 = vmatpush3.bf16.msra.mxu0 %v22464_v7  ;;  %18986 = vmatprep.subr.bf16.mxu1 %v22464_v7 }
 0xcf1   :  { %18798 = vmatprep.subr.bf16.mxu0 %v22468_v10 }
 0xcf3   :  { %18988 = vmatpush3.bf16.msra.mxu1 %v22464_v7  ;;  %v23786_v7 = vld [vmem:[#allocation25_spill] sm:$0xff] }
 0xcf4   :  { %18800 = vmatpush3.bf16.msra.mxu0 %v22468_v10  ;;  %18990 = vmatprep.subr.bf16.mxu1 %v22468_v10 }
 0xcf5   :  { %18802 = vmatprep.subr.bf16.mxu0 %v22291_v23 }
 0xcf7   :  { %18992 = vmatpush3.bf16.msra.mxu1 %v22468_v10  ;;  %v23787_v10 = vld [vmem:[#allocation26_spill] sm:$0xff] }
 0xcf8   :  { %18804 = vmatpush3.bf16.msra.mxu0 %v22291_v23  ;;  %18994 = vmatprep.subr.bf16.mxu1 %v22291_v23 }
 0xcf9   :  { %18806 = vmatprep.subr.bf16.mxu0 %v22305_v2 }
 0xcfb   :  { %18996 = vmatpush3.bf16.msra.mxu1 %v22291_v23  ;;  %v23780_v23 = vld [vmem:[#allocation19_spill] sm:$0xff] }
 0xcfc   :  { %18808 = vmatpush3.bf16.msra.mxu0 %v22305_v2  ;;  %18998 = vmatprep.subr.bf16.mxu1 %v22305_v2 }
 0xcfd   :  { %18810 = vmatprep.subr.bf16.mxu0 %v22313_v53 }
 0xcff   :  { %19000 = vmatpush3.bf16.msra.mxu1 %v22305_v2  ;;  %v23781_v2 = vld [vmem:[#allocation20_spill] sm:$0xff] }
 0xd00   :  { %18812 = vmatpush3.bf16.msra.mxu0 %v22313_v53  ;;  %19002 = vmatprep.subr.bf16.mxu1 %v22313_v53 }
 0xd01   :  { %18814 = vmatprep.subr.bf16.mxu0 %v22317_v39 }
 0xd03   :  { %19004 = vmatpush3.bf16.msra.mxu1 %v22313_v53  ;;  %16576 = vmatmul.mubr.f32.vlgmr.msra.gmra.mrb[12].mxu0 %v23106_v12  ;;  %v23782_v53 = vld [vmem:[#allocation21_spill] sm:$0xff] }
 0xd04   :  { %16578 = vmatprep.mubr.f32.mxu0 %v23146_v58  ;;  %18816 = vmatpush3.bf16.msra.mxu0 %v22317_v39 }
 0xd05   :  { %19006 = vmatprep.subr.bf16.mxu1 %v22317_v39  ;;  %18818 = vmatprep.subr.bf16.mxu0 %v22482_v40 }
 0xd06   :  { %16804 = vmatmul.mubr.f32.vlgmr.msra.gmra.mrb[24].mxu1 %v23121_v55 }
 0xd07   :  { %16806 = vmatprep.mubr.f32.mxu1 %v23165_v6  ;;  %19008 = vmatpush3.bf16.msra.mxu1 %v22317_v39  ;;  %v23783_v39 = vld [vmem:[#allocation22_spill] sm:$0xff] }
 0xd08   :  { %16579 = vmatmul.mubr.f32.gmra.mrb[14].mxu0 %v23136_v34  ;;  %19010 = vmatprep.subr.bf16.mxu1 %v22482_v40 }
 0xd09   :  { %18820 = vmatpush3.bf16.msra.mxu0 %v22482_v40  ;;  %16613 = vmatprep.mubr.f32.mxu0 %v23125_v59 }
 0xd0a   :  { %16807 = vmatmul.mubr.f32.gmra.mrb[26].mxu1 %v23159_v45  ;;  %18822 = vmatprep.subr.bf16.mxu0 %v22490_v56 }
 0xd0b   :  { %19012 = vmatpush3.bf16.msra.mxu1 %v22482_v40  ;;  %16841 = vmatprep.mubr.f32.mxu1 %v23143_v57  ;;  %v23788_v40 = vld [vmem:[#allocation27_spill] sm:$0xff] }
 0xd0c   :  { %19014 = vmatprep.subr.bf16.mxu1 %v22490_v56 }
 0xd0d   :  { %18824 = vmatpush3.bf16.msra.mxu0 %v22490_v56 }
 0xd0e   :  { %18826 = vmatprep.subr.bf16.mxu0 %v22498_v62 }
 0xd0f   :  { %19016 = vmatpush3.bf16.msra.mxu1 %v22490_v56  ;;  %v23789_v56 = vld [vmem:[#allocation28_spill] sm:$0xff] }
 0xd10   :  { %19018 = vmatprep.subr.bf16.mxu1 %v22498_v62 }
 0xd11   :  { %18828 = vmatpush3.bf16.msra.mxu0 %v22498_v62 }
 0xd12   :  { %18830 = vmatprep.subr.bf16.mxu0 %v22504_v19 }
 0xd13   :  { %19020 = vmatpush3.bf16.msra.mxu1 %v22498_v62 }
 0xd14   :  { %19022 = vmatprep.subr.bf16.mxu1 %v22504_v19 }
 0xd15   :  { %18832 = vmatpush3.bf16.msra.mxu0 %v22504_v19 }
 0xd16   :  { %18834 = vmatprep.subr.bf16.mxu0 %v23779_v9 }
 0xd17   :  { %19024 = vmatpush3.bf16.msra.mxu1 %v22504_v19 }
 0xd18   :  { %19026 = vmatprep.subr.bf16.mxu1 %v23779_v9 }
 0xd19   :  { %18836 = vmatpush3.bf16.msra.mxu0 %v23779_v9 }
 0xd1a   :  { %18838 = vmatprep.subr.bf16.mxu0 %v23780_v23 }
 0xd1b   :  { %19028 = vmatpush3.bf16.msra.mxu1 %v23779_v9 }
 0xd1c   :  { %19030 = vmatprep.subr.bf16.mxu1 %v23780_v23 }
 0xd1d   :  { %18840 = vmatpush3.bf16.msra.mxu0 %v23780_v23 }
 0xd1e   :  { %18842 = vmatprep.subr.bf16.mxu0 %v23781_v2 }
 0xd1f   :  { %19032 = vmatpush3.bf16.msra.mxu1 %v23780_v23  ;;  %v11858_v23 = vld [vmem:[%s23503_s9] sm:$0x1]  ;;  %s12792_s9 = sshll.u32 %s19584_s8, 4  ;;  %s12793_s9 = int_to_ptr.vmem [resolvable:$true] %s12792_s9 }
 0xd20   :  { %19034 = vmatprep.subr.bf16.mxu1 %v23781_v2  ;;  %s19549_s30 = scalar_lea.vmem %s12793_s9, 512  ;;  %p19554_p11 = scmp.lt.s32.totalorder %s12793_s9, %s12793_s9 }
 0xd21   :  { %18844 = vmatpush3.bf16.msra.mxu0 %v23781_v2  ;;  %p19550_p10 = scmp.ne.s32.totalorder %s12793_s9, %s19549_s30  ;;  %p19555_p12 = scmp.lt.s32.totalorder %s19549_s30, %s19549_s30 }
 0xd22   :  { %18846 = vmatprep.subr.bf16.mxu0 %v22052_v43 }
 0xd23   :  { %19036 = vmatpush3.bf16.msra.mxu1 %v23781_v2  ;;  %p19556_p13 = por %p19555_p12, %p19554_p11 }
 0xd24   :  { %16614 = vmatmul.mubr.f32.vlgmr.msra.gmra.mrb[12].mxu0 %v23119_v4  ;;  %19038 = vmatprep.subr.bf16.mxu1 %v22052_v43 }
 0xd25   :  { %16616 = vmatprep.mubr.f32.mxu0 %v23163_v54  ;;  %18848 = vmatpush3.bf16.msra.mxu0 %v22052_v43  ;;  %p19557_p0 = pnand %p19556_p13, %p19550_p10 }
 0xd26   :  { %16842 = vmatmul.mubr.f32.vlgmr.msra.gmra.mrb[24].mxu1 %v23133_v28  ;;  %18850 = vmatprep.subr.bf16.mxu0 %v22060_v52 }
 0xd27   :  { %16844 = vmatprep.mubr.f32.mxu1 %v23179_v42  ;;  %19040 = vmatpush3.bf16.msra.mxu1 %v22052_v43 }
 0xd28   :  { %16617 = vmatmul.mubr.f32.gmra.mrb[14].mxu0 %v23157_v35  ;;  %19042 = vmatprep.subr.bf16.mxu1 %v22060_v52 }
 0xd29   :  { %18852 = vmatpush3.bf16.msra.mxu0 %v22060_v52  ;;  %16651 = vmatprep.mubr.f32.mxu0 %v10362_v3 }
 0xd2a   :  { %16845 = vmatmul.mubr.f32.gmra.mrb[26].mxu1 %v23175_v20  ;;  %18854 = vmatprep.subr.bf16.mxu0 %v22081_v26 }
 0xd2b   :  { %19044 = vmatpush3.bf16.msra.mxu1 %v22060_v52  ;;  %16879 = vmatprep.mubr.f32.mxu1 %v11149_v32 }
 0xd2c   :  { %19046 = vmatprep.subr.bf16.mxu1 %v22081_v26 }
 0xd2d   :  { %18856 = vmatpush3.bf16.msra.mxu0 %v22081_v26 }
 0xd2e   :  { %18858 = vmatprep.subr.bf16.mxu0 %v22103_v36 }
 0xd2f   :  { %19048 = vmatpush3.bf16.msra.mxu1 %v22081_v26 }
 0xd30   :  { %19050 = vmatprep.subr.bf16.mxu1 %v22103_v36 }
 0xd31   :  { %18860 = vmatpush3.bf16.msra.mxu0 %v22103_v36 }
 0xd32   :  { %18862 = vmatprep.subr.bf16.mxu0 %v22115_v11 }
 0xd33   :  { %19052 = vmatpush3.bf16.msra.mxu1 %v22103_v36 }
 0xd34   :  { %19054 = vmatprep.subr.bf16.mxu1 %v22115_v11 }
 0xd35   :  { %18864 = vmatpush3.bf16.msra.mxu0 %v22115_v11 }
 0xd36   :  { %18866 = vmatprep.subr.bf16.mxu0 %v22221_v1 }
 0xd37   :  { %19056 = vmatpush3.bf16.msra.mxu1 %v22115_v11 }
 0xd38   :  { %19058 = vmatprep.subr.bf16.mxu1 %v22221_v1 }
 0xd39   :  { %18868 = vmatpush3.bf16.msra.mxu0 %v22221_v1 }
 0xd3a   :  { %18870 = vmatprep.subr.bf16.mxu0 %v22233_v41 }
 0xd3b   :  { %19060 = vmatpush3.bf16.msra.mxu1 %v22221_v1 }
 0xd3c   :  { %19062 = vmatprep.subr.bf16.mxu1 %v22233_v41 }
 0xd3d   :  { %18872 = vmatpush3.bf16.msra.mxu0 %v22233_v41 }
 0xd3e   :  { %18874 = vmatprep.subr.bf16.mxu0 %v22257_v14 }
 0xd3f   :  { %19064 = vmatpush3.bf16.msra.mxu1 %v22233_v41 }
 0xd40   :  { %19066 = vmatprep.subr.bf16.mxu1 %v22257_v14 }
 0xd41   :  { %18876 = vmatpush3.bf16.msra.mxu0 %v22257_v14 }
 0xd42   :  { %18878 = vmatprep.subr.bf16.mxu0 %v23782_v53 }
 0xd43   :  { %19068 = vmatpush3.bf16.msra.mxu1 %v22257_v14 }
 0xd44   :  { %16652 = vmatmul.mubr.f32.vlgmr.msra.gmra.mrb[12].mxu0 %v10372_v37  ;;  %19070 = vmatprep.subr.bf16.mxu1 %v23782_v53 }
 0xd45   :  { %16654 = vmatprep.mubr.f32.mxu0 %v10382_v33  ;;  %18880 = vmatpush3.bf16.msra.mxu0 %v23782_v53 }
 0xd46   :  { %16880 = vmatmul.mubr.f32.vlgmr.msra.gmra.mrb[24].mxu1 %v11159_v27  ;;  %18882 = vmatprep.subr.bf16.mxu0 %v23783_v39 }
 0xd47   :  { %16882 = vmatprep.mubr.f32.mxu1 %v11169_v47  ;;  %19072 = vmatpush3.bf16.msra.mxu1 %v23782_v53 }
 0xd48   :  { %16655 = vmatmul.mubr.f32.gmra.mrb[14].mxu0 %v10392_v21  ;;  %19074 = vmatprep.subr.bf16.mxu1 %v23783_v39 }
 0xd49   :  { %18884 = vmatpush3.bf16.msra.mxu0 %v23783_v39  ;;  %16689 = vmatprep.mubr.f32.mxu0 %v23113_v50 }
 0xd4a   :  { %16883 = vmatmul.mubr.f32.gmra.mrb[26].mxu1 %v11179_v49  ;;  %18886 = vmatprep.subr.bf16.mxu0 %v23784_v15 }
 0xd4b   :  { %19076 = vmatpush3.bf16.msra.mxu1 %v23783_v39  ;;  %16917 = vmatprep.mubr.f32.mxu1 %v23127_v0 }
 0xd4c   :  { %19078 = vmatprep.subr.bf16.mxu1 %v23784_v15 }
 0xd4d   :  { %18888 = vmatpush3.bf16.msra.mxu0 %v23784_v15 }
 0xd4e   :  { %18890 = vmatprep.subr.bf16.mxu0 %v23785_v31 }
 0xd4f   :  { %19080 = vmatpush3.bf16.msra.mxu1 %v23784_v15 }
 0xd50   :  { %19082 = vmatprep.subr.bf16.mxu1 %v23785_v31 }
 0xd51   :  { %18892 = vmatpush3.bf16.msra.mxu0 %v23785_v31 }
 0xd52   :  { %18894 = vmatprep.subr.bf16.mxu0 %v23786_v7 }
 0xd53   :  { %19084 = vmatpush3.bf16.msra.mxu1 %v23785_v31 }
 0xd54   :  { %19086 = vmatprep.subr.bf16.mxu1 %v23786_v7 }
 0xd55   :  { %18896 = vmatpush3.bf16.msra.mxu0 %v23786_v7 }
 0xd56   :  { %18898 = vmatprep.subr.bf16.mxu0 %v23787_v10 }
 0xd57   :  { %19088 = vmatpush3.bf16.msra.mxu1 %v23786_v7 }
 0xd58   :  { %19090 = vmatprep.subr.bf16.mxu1 %v23787_v10 }
 0xd59   :  { %18900 = vmatpush3.bf16.msra.mxu0 %v23787_v10 }
 0xd5a   :  { %18902 = vmatprep.subr.bf16.mxu0 %v23788_v40 }
 0xd5b   :  { %19092 = vmatpush3.bf16.msra.mxu1 %v23787_v10 }
 0xd5c   :  { %19094 = vmatprep.subr.bf16.mxu1 %v23788_v40 }
 0xd5d   :  { %18904 = vmatpush3.bf16.msra.mxu0 %v23788_v40 }
 0xd5e   :  { %18906 = vmatprep.subr.bf16.mxu0 %v23789_v56 }
 0xd5f   :  { %19096 = vmatpush3.bf16.msra.mxu1 %v23788_v40 }
 0xd60   :  { %19098 = vmatprep.subr.bf16.mxu1 %v23789_v56 }
 0xd61   :  { %18908 = vmatpush3.bf16.msra.mxu0 %v23789_v56 }
 0xd62   :  { %18910 = vmatprep.subr.bf16.mxu0 %v22052_v43 }
 0xd63   :  { %19100 = vmatpush3.bf16.msra.mxu1 %v23789_v56 }
 0xd64   :  { %16690 = vmatmul.mubr.f32.vlgmr.msra.gmra.mrb[12].mxu0 %v23106_v12  ;;  %19102 = vmatprep.subr.bf16.mxu1 %v22052_v43 }
 0xd65   :  { %16692 = vmatprep.mubr.f32.mxu0 %v23146_v58  ;;  %18912 = vmatpush3.bf16.msra.mxu0 %v22052_v43 }
 0xd66   :  { %16918 = vmatmul.mubr.f32.vlgmr.msra.gmra.mrb[24].mxu1 %v23121_v55  ;;  %18914 = vmatprep.subr.bf16.mxu0 %v22060_v52 }
 0xd67   :  { %16920 = vmatprep.mubr.f32.mxu1 %v23165_v6  ;;  %19104 = vmatpush3.bf16.msra.mxu1 %v22052_v43 }
 0xd68   :  { %16693 = vmatmul.mubr.f32.gmra.mrb[14].mxu0 %v23136_v34  ;;  %19106 = vmatprep.subr.bf16.mxu1 %v22060_v52 }
 0xd69   :  { %18916 = vmatpush3.bf16.msra.mxu0 %v22060_v52  ;;  %16727 = vmatprep.mubr.f32.mxu0 %v23113_v50 }
 0xd6a   :  { %16921 = vmatmul.mubr.f32.gmra.mrb[26].mxu1 %v23159_v45  ;;  %18918 = vmatprep.subr.bf16.mxu0 %v22081_v26 }
 0xd6b   :  { %19108 = vmatpush3.bf16.msra.mxu1 %v22060_v52  ;;  %16955 = vmatprep.mubr.f32.mxu1 %v23127_v0 }
 0xd6c   :  { %19110 = vmatprep.subr.bf16.mxu1 %v22081_v26 }
 0xd6d   :  { %18920 = vmatpush3.bf16.msra.mxu0 %v22081_v26 }
 0xd6e   :  { %18922 = vmatprep.subr.bf16.mxu0 %v22103_v36 }
 0xd6f   :  { %19112 = vmatpush3.bf16.msra.mxu1 %v22081_v26  ;;  %v23791_v26 = vld [vmem:[#allocation29_spill] sm:$0xff] }
 0xd70   :  { %19114 = vmatprep.subr.bf16.mxu1 %v22103_v36 }
 0xd71   :  { %18924 = vmatpush3.bf16.msra.mxu0 %v22103_v36 }
 0xd72   :  { %18926 = vmatprep.subr.bf16.mxu0 %v22115_v11 }
 0xd73   :  { %19116 = vmatpush3.bf16.msra.mxu1 %v22103_v36 }
 0xd74   :  { %19118 = vmatprep.subr.bf16.mxu1 %v22115_v11 }
 0xd75   :  { %18928 = vmatpush3.bf16.msra.mxu0 %v22115_v11 }
 0xd76   :  { %18930 = vmatprep.subr.bf16.mxu0 %v22221_v1 }
 0xd77   :  { %19120 = vmatpush3.bf16.msra.mxu1 %v22115_v11  ;;  %v23790_v11 = vmov 0.0  }
 0xd78   :  { %19122 = vmatprep.subr.bf16.mxu1 %v22221_v1 }
 0xd79   :  { %18932 = vmatpush3.bf16.msra.mxu0 %v22221_v1 }
 0xd7a   :  { %18934 = vmatprep.subr.bf16.mxu0 %v22233_v41 }
 0xd7b   :  { %19124 = vmatpush3.bf16.msra.mxu1 %v22221_v1 }
 0xd7c   :  { %19126 = vmatprep.subr.bf16.mxu1 %v22233_v41 }
 0xd7d   :  { %18936 = vmatpush3.bf16.msra.mxu0 %v22233_v41 }
 0xd7e   :  { %18938 = vmatprep.subr.bf16.mxu0 %v22257_v14 }
 0xd7f   :  { %19128 = vmatpush3.bf16.msra.mxu1 %v22233_v41 }
 0xd80   :  { %19130 = vmatprep.subr.bf16.mxu1 %v22257_v14 }
 0xd81   :  { %18940 = vmatpush3.bf16.msra.mxu0 %v22257_v14 }
 0xd82   :  { %16961 = vmatprep.subr.mxu0 %v23790_v11 }
 0xd83   :  { %19132 = vmatpush3.bf16.msra.mxu1 %v22257_v14 }
 0xd84   :  { %16728 = vmatmul.mubr.f32.vlgmr.msra.gmra.mrb[12].mxu0 %v23106_v12  ;;  %16991 = vmatprep.subr.mxu1 %v23790_v11 }
 0xd85   :  { %16730 = vmatprep.mubr.f32.mxu0 %v23146_v58  ;;  %16962 = vmatpush3.msra.mxu0 %v23791_v26 }
 0xd86   :  { %16956 = vmatmul.mubr.f32.vlgmr.msra.gmra.mrb[24].mxu1 %v23121_v55  ;;  %16966 = vmatprep.subr.mxu0 %v23790_v11 }
 0xd87   :  { %16958 = vmatprep.mubr.f32.mxu1 %v23165_v6  ;;  %16992 = vmatpush3.msra.mxu1 %v23791_v26 }
 0xd88   :  { %16731 = vmatmul.mubr.f32.gmra.mrb[14].mxu0 %v23136_v34  ;;  %16996 = vmatprep.subr.mxu1 %v23790_v11 }
 0xd89   :  { %16963 = vmatprep.mubr.msk.f32.mxu0 %vm19583_vm3, %v23790_v11 }
 0xd8a   :  { %16959 = vmatmul.mubr.f32.gmra.mrb[26].mxu1 %v23159_v45 }
 0xd8b   :  { %16993 = vmatprep.mubr.msk.f32.mxu1 %vm19583_vm3, %v23790_v11 }
 0xe57   :  { %v16729_v43 = vpop.f32.mrb[12].mxu0 }
 0xe58   :  { %v11050_v36 = vsel %vm2963_vm2, %v16729_v43, 0.0  ;;  %v11027_v52 = vpop.f32.mrb[13].mxu0 }
 0xe59   :  { %v11049_v1 = vsel %vm2963_vm2, %v11027_v52, 0.0  ;;  %v16957_v41 = vpop.f32.mrb[24].mxu1 }
 0xe5a   :  { %v11051_v14 = vadd.f32 %v11050_v36, %v11049_v1  ;;  %v11837_v62 = vsel %vm2963_vm2, %v16957_v41, 0.0  ;;  %v11814_v19 = vpop.f32.mrb[25].mxu1  ;;  %v23792_v41 = vld [vmem:[#allocation32_spill] sm:$0xff] }
 0xe5b   :  { %v11836_v12 = vsel %vm2963_vm2, %v11814_v19, 0.0  ;;  %v16732_v50 = vpop.f32.mrb[14].mxu0  ;;  %v23794_v19 = vld [vmem:[#allocation31_spill] sm:$0xff] }
 0xe5c   :  { %v11838_v4 = vadd.f32 %v11837_v62, %v11836_v12  ;;  %v11039_v55 = vpop.f32.mrb[15].mxu0  ;;  %v11054_v34 = vsel %vm2963_vm2, %v16732_v50, 0.0  ;;  %v23793_v62 = vld [vmem:[#allocation30_spill] sm:$0xff] }
 0xe5d   :  { %v11052_v59 = vsel %vm2963_vm2, %v11039_v55, 0.0  ;;  %v16960_v0 = vpop.f32.mrb[26].mxu1 }
 0xe5e   :  { %v11053_v37 = vadd.f32 %v11052_v59, %v11051_v14  ;;  %v11826_v28 = vpop.f32.mrb[27].mxu1  ;;  %v11841_v27 = vsel %vm2963_vm2, %v16960_v0, 0.0 }
 0xe5f   :  { %v11839_v57 = vsel %vm2963_vm2, %v11826_v28, 0.0 }
 0xe60   :  { %v11055_v58 = vadd.f32 %v11054_v34, %v11053_v37  ;;  %v11840_v3 = vadd.f32 %v11839_v57, %v11838_v4 }
 0xe62   :  { %v11056_v35 = vrot.slane %v11055_v58, 4  ;;  %v11842_v45 = vadd.f32 %v11841_v27, %v11840_v3 }
 0xe64   :  { %v11057_v54 = vadd.f32 %v11056_v35, %v11055_v58  ;;  %v11843_v6 = vrot.slane %v11842_v45, 4 }
 0xe66   :  { %v11058_v32 = vrot.slane %v11057_v54, 2  ;;  %v11844_v20 = vadd.f32 %v11843_v6, %v11842_v45 }
 0xe68   :  { %v11059_v21 = vadd.f32 %v11058_v32, %v11057_v54  ;;  %v11845_v42 = vrot.slane %v11844_v20, 2 }
 0xe6a   :  { %v11060_v33 = vrot.slane %v11059_v21, 1  ;;  %v11846_v38 = vadd.f32 %v11845_v42, %v11844_v20 }
 0xe6c   :  { %v11061_v49 = vadd.f32 %v11060_v33, %v11059_v21  ;;  %v11847_v5 = vrot.slane %v11846_v38, 1 }
 0xe6e   :  { %v11849_v63 = vmul.f32 0.001953125, %v11061_v49  ;;  %v11848_v47 = vadd.f32 %v11847_v5, %v11846_v38 }
 0xe70   :  { %v11851_v29 = vmul.f32 %v11849_v63, %v11849_v63  ;;  %v11850_v44 = vmul.f32 0.001953125, %v11848_v47 }
 0xe72   :  { %v11852_v51 = vsub.f32 %v11850_v44, %v11851_v29 }
 0xe74   :  { %v11853_v17 = vmax.f32 %v11852_v51, 0.0 }
 0xe76   :  { %v11855_v13 = vadd.f32 1e-05, %v11853_v17 }
 0xe78   :  { %19481 = vrsqrt.f32 %v11855_v13 }
 0xe82   :  { %v19482_v30 = vpop.eup %19481 }
 0xe83   :  { %v11857_v9 = vmul.f32 %v19482_v30, %v11854_v60 }
 0xe85   :  { %v11862_v2 = vsel %vm2963_vm2, %v11857_v9, 0  ;;  %v11859_v53 = vmul.f32 %v11857_v9, %v11849_v63 }
 0xe86   :  { %v11930_v39 = vand.u32 4294901760, %v11862_v2 }
 0xe87   :  { %v11860_v15 = vsub.f32 %v11858_v23, %v11859_v53 }
 0xe88   :  { %v11931_v31 = vsub.f32 %v11862_v2, %v11930_v39 }
 0xe89   :  { %v12311_v7 = vsel %vm2963_vm2, %v11860_v15, 0 }
 0xe8a   :  { %v11932_v10 = vand.u32 4294901760, %v11931_v31  ;;  %v12379_v40 = vand.u32 4294901760, %v12311_v7 }
 0xe8c   :  { %v11933_v56 = vsub.f32 %v11931_v31, %v11932_v10  ;;  %v12380_v43 = vsub.f32 %v12311_v7, %v12379_v40 }
 0xe8e   :  { %v11934_v36 = vand.u32 4294901760, %v11933_v56  ;;  %v12381_v52 = vand.u32 4294901760, %v12380_v43 }
 0xe90   :  { %16964 = vmatmul.mubr.f32.vlgmr.msra.gmra.mrb[16].mxu0 %v11934_v36  ;;  %v12382_v1 = vsub.f32 %v12380_v43, %v12381_v52 }
 0xe91   :  { %16967 = vmatpush3.msra.mxu0 %v23792_v41  ;;  %16968 = vmatprep.mubr.msk.f32.mxu0 %vm19583_vm3, %v23790_v11 }
 0xe92   :  { %v12383_v14 = vand.u32 4294901760, %v12382_v1  ;;  %16971 = vmatprep.subr.mxu0 %v23790_v11 }
 0xe94   :  { %16994 = vmatmul.mubr.f32.vlgmr.msra.gmra.mrb[28].mxu1 %v12383_v14 }
 0xe95   :  { %16997 = vmatpush3.msra.mxu1 %v23792_v41  ;;  %16998 = vmatprep.mubr.msk.f32.mxu1 %vm19583_vm3, %v23790_v11 }
 0xe96   :  { %17001 = vmatprep.subr.mxu1 %v23790_v11 }
 0xe98   :  { %16969 = vmatmul.mubr.f32.vlgmr.msra.gmra.mrb[16].mxu0 %v11930_v39 }
 0xe99   :  { %16972 = vmatpush3.msra.mxu0 %v23793_v62  ;;  %16973 = vmatprep.mubr.msk.f32.mxu0 %vm19583_vm3, %v23790_v11 }
 0xe9a   :  { %16976 = vmatprep.subr.mxu0 %v23790_v11 }
 0xe9c   :  { %16999 = vmatmul.mubr.f32.vlgmr.msra.gmra.mrb[28].mxu1 %v12379_v40 }
 0xe9d   :  { %17002 = vmatpush3.msra.mxu1 %v23793_v62  ;;  %17003 = vmatprep.mubr.msk.f32.mxu1 %vm19583_vm3, %v23790_v11 }
 0xe9e   :  { %17006 = vmatprep.subr.mxu1 %v23790_v11 }
 0xea0   :  { %16974 = vmatmul.mubr.f32.vlgmr.msra.gmra.mrb[16].mxu0 %v11931_v31 }
 0xea1   :  { %16977 = vmatpush3.msra.mxu0 %v23791_v26  ;;  %16978 = vmatprep.mubr.msk.f32.mxu0 %vm19583_vm3, %v23790_v11 }
 0xea2   :  { %16981 = vmatprep.subr.mxu0 %v23790_v11 }
 0xea4   :  { %17004 = vmatmul.mubr.f32.vlgmr.msra.gmra.mrb[28].mxu1 %v12380_v43 }
 0xea5   :  { %17007 = vmatpush3.msra.mxu1 %v23791_v26  ;;  %17008 = vmatprep.mubr.msk.f32.mxu1 %vm19583_vm3, %v23790_v11 }
 0xea6   :  { %17011 = vmatprep.subr.mxu1 %v23790_v11 }
 0xea8   :  { %16979 = vmatmul.mubr.f32.vlgmr.msra.gmra.mrb[16].mxu0 %v11932_v10 }
 0xea9   :  { %16982 = vmatpush3.msra.mxu0 %v23794_v19  ;;  %16983 = vmatprep.mubr.msk.f32.mxu0 %vm19583_vm3, %v23790_v11 }
 0xeaa   :  { %16986 = vmatprep.subr.mxu0 %v23790_v11 }
 0xeac   :  { %17009 = vmatmul.mubr.f32.vlgmr.msra.gmra.mrb[28].mxu1 %v12381_v52 }
 0xead   :  { %17012 = vmatpush3.msra.mxu1 %v23794_v19  ;;  %17013 = vmatprep.mubr.msk.f32.mxu1 %vm19583_vm3, %v23790_v11 }
 0xeae   :  { %17016 = vmatprep.subr.mxu1 %v23790_v11 }
 0xeb0   :  { %16984 = vmatmul.mubr.f32.vlgmr.msra.gmra.mrb[16].mxu0 %v11930_v39 }
 0xeb1   :  { %16987 = vmatpush3.msra.mxu0 %v23791_v26  ;;  %16988 = vmatprep.mubr.msk.f32.mxu0 %vm19583_vm3, %v23790_v11 }
 0xeb4   :  { %17014 = vmatmul.mubr.f32.vlgmr.msra.gmra.mrb[28].mxu1 %v12379_v40 }
 0xeb5   :  { %17017 = vmatpush3.msra.mxu1 %v23791_v26  ;;  %17018 = vmatprep.mubr.msk.f32.mxu1 %vm19583_vm3, %v23790_v11 }
 0xeb8   :  { %16989 = vmatmul.mubr.f32.vlgmr.msra.gmra.mrb[16].mxu0 %v11930_v39 }
 0xebc   :  { %17019 = vmatmul.mubr.f32.vlgmr.msra.gmra.mrb[28].mxu1 %v12379_v40 }
 0xf8b   :  { %v12306_v12 = vpop.f32.mrb[16].mxu0 }
 0xf8c   :  { %v12762_v50 = vrot.slane %v12306_v12, %v23778_v8  ;;  %v16990_v4 = vpop.f32.mrb[17].mxu0 }
 0xf8e   :  { %v12763_v55 = vmul.f32 %v12762_v50, %v23110_v61  ;;  %v12764_v59 = vmul.f32 %v23103_v22, %v12762_v50  ;;  %v12765_v0 = vmul.f32 %v12762_v50, %v23140_v18  ;;  %v12766_v37 = vmul.f32 %v23129_v25, %v12762_v50 }
 0xf8f   :  { %v12755_v28 = vpop.f32.mrb[28].mxu1 }
 0xf90   :  { %v12770_v26 = vrot.slane %v12755_v28, %v23778_v8  ;;  %v17020_v34 = vpop.f32.mrb[29].mxu1 }
 0xf92   :  { %v12771_v57 = vadd.f32 %v12770_v26, %v12763_v55  ;;  %v12772_v11 = vadd.f32 %v12770_v26, %v12764_v59  ;;  %v12773_v58 = vadd.f32 %v12770_v26, %v12765_v0  ;;  %v12774_v3 = vadd.f32 %v12770_v26, %v12766_v37 }
 0xf94   :  { %v12775_v27 = vadd.f32 %v12771_v57, %v23095_v16  ;;  %v12776_v61 = vadd.f32 %v12772_v11, %v23097_v46  ;;  %v12777_v22 = vadd.f32 %v12773_v58, %v23099_v48  ;;  %v12778_v18 = vadd.f32 %v12774_v3, %v23101_v24 }
 0xf96   :  { %v12779_v35 = vmax.f32 %v12775_v27, 0.0  ;;  %v12780_v25 = vmax.f32 %v12776_v61, 0.0  ;;  %v12781_v45 = vmax.f32 %v12777_v22, 0.0  ;;  %v12782_v54 = vmax.f32 %v12778_v18, 0.0 }
 0xf98   :  { %12783 = vst [vmem:[#allocation10] sm:$0xff] %v12779_v35  ;;  %12784 = vst [vmem:[#allocation10 + $0x8] sm:$0xff] %v12780_v25 }
 0xf99   :  { %12785 = vst [vmem:[#allocation10 + $0x10] sm:$0xff] %v12781_v45  ;;  %12786 = vst [vmem:[#allocation10 + $0x18] sm:$0xff] %v12782_v54 }
 0xf9a   :  { %19560 = shalt.err (!%p19557_p0)
}
 0xf9b   :  { %s19561_s24 = scalar_lea.hbm %s23508_s14, 512 }
 0xf9c   :  { %p19562_p1 = scmp.ne.s32.totalorder %s23508_s14, %s19561_s24  ;;  %p19565_p2 = scmp.lt.u32.totalorder %s19561_s24, %s23508_s14 }
 0xf9e   :  { %p19567_p3 = pnand %p19565_p2, %p19562_p1 }
 0xfa0   :  { %19570 = shalt.err (!%p19567_p3)
}
 0xfa1   :  { %12798 = dma.vmem_to_hbm [thread:$0]  %s12793_s9, 512, %s23508_s14, [#allocation6], %s19579_s25, %s19579_s25, %s19580_s26  }
 0xfa2   :  { %19575 = dma.done.wait [#allocation6], 512  }
 0xfa3   :  { %19576 = vsyncadd [#allocation6], 4294966784 }
 0xfa4   :  { %12802 = vsyncpa [#allocation5], 1 }
 0xfa5   :  { %12803 = vsyncpa [#allocation8], 1 }
 0xfa6   :  { %12804 = vsyncpa [#allocation6], 1 }

</bundles_post_ra>
